<compile_context>
chip_gen: v7x
topology: tpu7x:2x2x1
jax: 0.10.0
libtpu: 0.0.40
codegen_flags: <defaults>
</compile_context>

<pallas_src>
import jax
import jax.numpy as jnp
import numpy as np
from jax import lax
from jax.experimental import pallas as pl
from jax.experimental.pallas import tpu as pltpu

C = 256           # channels (fixed by the module)
GROUPS = 32
CG = C // GROUPS  # 8 channels per group
EPS = 1e-5
VMEM_LIMIT = 48 * 1024 * 1024


# ---------- kernel 1: 1x1 conv (NCHW in -> NHWC out) + per-image BN partial stats -----
def pw_conv_stats_kernel(x_ref, w_ref, y_ref, sum_ref, ssq_ref):
    xm = x_ref[0].astype(jnp.bfloat16)                 # (Cin, H*W), f32 read, bf16 MXU
    # transposed-lhs matmul does the NCHW -> NHWC layout change on-chip
    y = jnp.dot(xm.T, w_ref[...], preferred_element_type=jnp.float32)   # (H*W, Cout)
    y_ref[0] = y.astype(y_ref.dtype)
    # partial reduce to (8, C); the final 8 -> 1 (and cross-image) reduce happens in JAX
    p = y.reshape(-1, 8, y.shape[-1])
    sum_ref[...] = jnp.sum(p, axis=0)[None]
    ssq_ref[...] = jnp.sum(p * p, axis=0)[None]


# ---------- kernel 2: BN1+ReLU -> grouped 3x3 conv on H-strips (3 folded matmuls) -----
def grouped_conv_kernel(y1_ref, s1_ref, b1_ref, w_ref, y2_ref, sum_ref, ssq_ref,
                        stk_ref):
    s = pl.program_id(1)
    n_strips = pl.num_programs(1)
    _, H, W, Cc = y1_ref.shape
    SH = y2_ref.shape[1]

    scale = s1_ref[...].reshape(1, 1, Cc)
    bias = b1_ref[...].reshape(1, 1, Cc)
    img = y1_ref.at[0]                        # (H, W, C) bf16 view; resident per image

    def bn_relu(rows_bf16):                   # -> bf16 (f32 math)
        return jnp.maximum(rows_bf16.astype(jnp.float32) * scale + bias,
                           0.0).astype(jnp.bfloat16)

    # --- middle (dx==1) channel slot of the stacked scratch: strip body rows plus a
    #     1-row halo above/below (zero at the image border), written directly ---
    row0 = pl.multiple_of(s * SH, SH)
    top = bn_relu(img[pl.ds(jnp.maximum(s * SH - 1, 0), 1), :, :])       # (1, W, C)
    top = jnp.where(s > 0, top, jnp.zeros_like(top))
    bot = bn_relu(img[pl.ds(jnp.minimum(s * SH + SH, H - 1), 1), :, :])  # (1, W, C)
    bot = jnp.where(s < n_strips - 1, bot, jnp.zeros_like(bot))
    stk_ref[0:1, :, Cc:2 * Cc] = top
    stk_ref[1:SH + 1, :, Cc:2 * Cc] = bn_relu(img[pl.ds(row0, SH), :, :])
    stk_ref[SH + 1:SH + 2, :, Cc:2 * Cc] = bot

    # --- horizontal taps dx==0 / dx==2: column-shifted copies of the middle slot with
    #     a zero column at the image border (no W+2 padded buffer, no stacked value) ---
    mid = stk_ref[:, :, Cc:2 * Cc]                                       # (SH+2, W, C)
    zcol = jnp.zeros((SH + 2, 1, Cc), jnp.bfloat16)
    stk_ref[:, :, 0:Cc] = jnp.concatenate([zcol, mid[:, :W - 1, :]], axis=1)
    stk_ref[:, :, 2 * Cc:3 * Cc] = jnp.concatenate([mid[:, 1:, :], zcol], axis=1)

    # --- 3 vertical taps = 3 matmuls of K = 3C over row-shifted views of the scratch
    #     (the (SH, W, 3C) -> (SH*W, 3C) merge is layout-preserving since W % 8 == 0) ---
    acc = jnp.dot(stk_ref[0:SH].reshape(SH * W, 3 * Cc), w_ref[0],
                  preferred_element_type=jnp.float32)
    acc += jnp.dot(stk_ref[1:SH + 1].reshape(SH * W, 3 * Cc), w_ref[1],
                   preferred_element_type=jnp.float32)
    acc += jnp.dot(stk_ref[2:SH + 2].reshape(SH * W, 3 * Cc), w_ref[2],
                   preferred_element_type=jnp.float32)

    y2_ref[...] = acc.reshape(1, SH, W, Cc).astype(y2_ref.dtype)
    p = acc.reshape(-1, 8, Cc)
    sum_ref[...] = jnp.sum(p, axis=0)[None, None]
    ssq_ref[...] = jnp.sum(p * p, axis=0)[None, None]


# ---------- kernel 3: BN2+ReLU -> final 1x1 conv (NHWC in -> NCHW out, f32) -----------
def bnrelu_pw_conv_kernel(x_ref, s_ref, b_ref, w_ref, y_ref):
    a = jnp.maximum(x_ref[0].astype(jnp.float32) * s_ref[...] + b_ref[...], 0.0)
    # transposed-rhs matmul does the NHWC -> NCHW layout change on-chip
    y_ref[0] = lax.dot_general(
        w_ref[...], a.astype(jnp.bfloat16),
        dimension_numbers=(((1,), (1,)), ((), ())),
        preferred_element_type=jnp.float32)            # (Cout, H*W)


# ------------------------------ glue helpers ------------------------------------------
def _bn_train_scale_bias(sum_p, ssq_p, gamma, beta, count):
    axes = tuple(range(sum_p.ndim - 1))
    s = jnp.sum(sum_p, axis=axes)
    q = jnp.sum(ssq_p, axis=axes)
    mean = s / count
    var = jnp.maximum(q / count - mean * mean, 0.0)    # biased variance (training-mode)
    scale = gamma / jnp.sqrt(var + EPS)
    bias = beta - mean * scale
    return scale[None, :].astype(jnp.float32), bias[None, :].astype(jnp.float32)


def _grouped_weights_3tap(w2):
    # w2: (C_out, C_in/groups, 3, 3) torch layout -> block-diagonal with the 3 horizontal
    # taps folded into the contraction axis: (3, 3*C, C), index [dy, dx*C + cin, cout].
    w2r = w2.reshape(GROUPS, CG, CG, 3, 3)            # (g, co, ci, kh, kw)
    blk = jnp.transpose(w2r, (3, 4, 0, 2, 1))         # (kh, kw, g, ci, co)
    eye = jnp.eye(GROUPS, dtype=w2.dtype)
    full = jnp.einsum('gh,klgio->klgiho', eye, blk)   # (kh, kw, g, ci, h, co)
    return full.reshape(3, 3 * C, C)


def _strip_height(h, cap=32):
    sh = min(cap, h)
    while h % sh:
        sh -= 1
    return sh


@jax.jit
def resnext_block(x_nchw, params):
    N, Cc, H, W = x_nchw.shape
    assert Cc == C
    assert W % 8 == 0, "W must be a multiple of 8 (sublane tiling)"
    HW = H * W
    rows = N * HW
    SH = _strip_height(H)
    S = H // SH

    x3 = x_nchw.reshape(N, C, HW)                                        # free reshape
    w1t = jnp.transpose(params['w1'][:, :, 0, 0]).astype(jnp.bfloat16)   # (Cin, Cout)
    w3oi = params['w3'][:, :, 0, 0].astype(jnp.bfloat16)                 # (Cout, Cin)
    wg = _grouped_weights_3tap(params['w2']).astype(jnp.bfloat16)        # (3, 3C, C)

    # ---- stage 1: 1x1 conv (layout change fused) + BN1 partial batch stats ----
    y1, sum1, ssq1 = pl.pallas_call(
        pw_conv_stats_kernel,
        out_shape=(jax.ShapeDtypeStruct((N, HW, C), jnp.bfloat16),
                   jax.ShapeDtypeStruct((N, 8, C), jnp.float32),
                   jax.ShapeDtypeStruct((N, 8, C), jnp.float32)),
        grid_spec=pltpu.PrefetchScalarGridSpec(
            num_scalar_prefetch=0, grid=(N,),
            in_specs=[pl.BlockSpec((1, C, HW), lambda n: (n, 0, 0)),
                      pl.BlockSpec((C, C), lambda n: (0, 0))],
            out_specs=[pl.BlockSpec((1, HW, C), lambda n: (n, 0, 0)),
                       pl.BlockSpec((1, 8, C), lambda n: (n, 0, 0)),
                       pl.BlockSpec((1, 8, C), lambda n: (n, 0, 0))]),
        compiler_params=pltpu.CompilerParams(
            dimension_semantics=("parallel",), vmem_limit_bytes=VMEM_LIMIT),
    )(x3, w1t)

    scale1, bias1 = _bn_train_scale_bias(sum1, ssq1, params['g1'], params['b1'], rows)

    # ---- stage 2: BN1+ReLU fused into grouped 3x3 conv (H-strips) + BN2 partial stats
    y2, sum2, ssq2 = pl.pallas_call(
        grouped_conv_kernel,
        out_shape=(jax.ShapeDtypeStruct((N, H, W, C), jnp.bfloat16),
                   jax.ShapeDtypeStruct((N, S, 8, C), jnp.float32),
                   jax.ShapeDtypeStruct((N, S, 8, C), jnp.float32)),
        grid_spec=pltpu.PrefetchScalarGridSpec(
            num_scalar_prefetch=0, grid=(N, S),
            in_specs=[pl.BlockSpec((1, H, W, C), lambda n, s: (n, 0, 0, 0)),
                      pl.BlockSpec((1, C), lambda n, s: (0, 0)),
                      pl.BlockSpec((1, C), lambda n, s: (0, 0)),
                      pl.BlockSpec((3, 3 * C, C), lambda n, s: (0, 0, 0))],
            out_specs=[pl.BlockSpec((1, SH, W, C), lambda n, s: (n, s, 0, 0)),
                       pl.BlockSpec((1, 1, 8, C), lambda n, s: (n, s, 0, 0)),
                       pl.BlockSpec((1, 1, 8, C), lambda n, s: (n, s, 0, 0))],
            scratch_shapes=[pltpu.VMEM((SH + 2, W, 3 * C), jnp.bfloat16)]),
        compiler_params=pltpu.CompilerParams(
            dimension_semantics=("parallel", "parallel"),
            vmem_limit_bytes=VMEM_LIMIT),
    )(y1.reshape(N, H, W, C), scale1, bias1, wg)

    scale2, bias2 = _bn_train_scale_bias(sum2, ssq2, params['g2'], params['b2'], rows)

    # ---- stage 3: BN2+ReLU fused into final 1x1 conv (NCHW output fused) ----
    y3 = pl.pallas_call(
        bnrelu_pw_conv_kernel,
        out_shape=jax.ShapeDtypeStruct((N, C, HW), jnp.float32),
        grid_spec=pltpu.PrefetchScalarGridSpec(
            num_scalar_prefetch=0, grid=(N,),
            in_specs=[pl.BlockSpec((1, HW, C), lambda n: (n, 0, 0)),
                      pl.BlockSpec((1, C), lambda n: (0, 0)),
                      pl.BlockSpec((1, C), lambda n: (0, 0)),
                      pl.BlockSpec((C, C), lambda n: (0, 0))],
            out_specs=pl.BlockSpec((1, C, HW), lambda n: (n, 0, 0))),
        compiler_params=pltpu.CompilerParams(
            dimension_semantics=("parallel",), vmem_limit_bytes=VMEM_LIMIT),
    )(y2.reshape(N, HW, C), scale2, bias2, w3oi)

    return y3.reshape(N, C, H, W)


# ------------------------------ pure-JAX reference ------------------------------------
def reference(x, params):
    dn = ('NCHW', 'OIHW', 'NCHW')

    def bn_relu(y, gamma, beta):
        mean = jnp.mean(y, axis=(0, 2, 3), keepdims=True)
        var = jnp.mean(jnp.square(y - mean), axis=(0, 2, 3), keepdims=True)
        out = (y - mean) / jnp.sqrt(var + EPS) * gamma.reshape(1, -1, 1, 1) \
              + beta.reshape(1, -1, 1, 1)
        return jnp.maximum(out, 0.0)

    y = lax.conv_general_dilated(x, params['w1'], (1, 1), 'VALID', dimension_numbers=dn)
    y = bn_relu(y, params['g1'], params['b1'])
    y = lax.conv_general_dilated(y, params['w2'], (1, 1), ((1, 1), (1, 1)),
                                 dimension_numbers=dn, feature_group_count=GROUPS)
    y = bn_relu(y, params['g2'], params['b2'])
    y = lax.conv_general_dilated(y, params['w3'], (1, 1), 'VALID', dimension_numbers=dn)
    return y


if __name__ == "__main__":
    key = jax.random.PRNGKey(0)
    ks = jax.random.split(key, 8)
    params = {
        'w1': jax.random.normal(ks[0], (C, C, 1, 1), jnp.float32) * 0.05,
        'w2': jax.random.normal(ks[1], (C, CG, 3, 3), jnp.float32) * 0.05,
        'w3': jax.random.normal(ks[2], (C, C, 1, 1), jnp.float32) * 0.05,
        'g1': 1.0 + 0.1 * jax.random.normal(ks[3], (C,), jnp.float32),
        'b1': 0.1 * jax.random.normal(ks[4], (C,), jnp.float32),
        'g2': 1.0 + 0.1 * jax.random.normal(ks[5], (C,), jnp.float32),
        'b2': 0.1 * jax.random.normal(ks[6], (C,), jnp.float32),
    }
    # small-shape analogue of the original [1, 256, 56, 56] input (channels fixed at 256)
    x = jax.random.normal(ks[7], (2, C, 16, 16), jnp.float32)

    out = jax.block_until_ready(resnext_block(x, params))
    ref = jax.block_until_ready(reference(x, params))

    assert out.shape == ref.shape == (2, C, 16, 16)
    # bf16 matmul operands / bf16 intermediates vs. full-f32 reference
    np.testing.assert_allclose(np.asarray(out), np.asarray(ref), rtol=5e-2, atol=5e-2)
    print("KERNEL_OK")
</pallas_src>

<mosaic_0001>
module attributes {stable_mosaic.version = 11 : i64} {
  func.func @pw_conv_stats_kernel(%arg0: i32, %arg1: memref<1x256x256xf32, #tpu.memory_space<vmem>>, %arg2: memref<256x256xbf16, #tpu.memory_space<vmem>>, %arg3: memref<1x256x256xbf16, #tpu.memory_space<vmem>>, %arg4: memref<1x8x256xf32, #tpu.memory_space<vmem>>, %arg5: memref<1x8x256xf32, #tpu.memory_space<vmem>>) attributes {dimension_semantics = [#tpu.dimension_semantics<parallel>], iteration_bounds = array<i64: 2>, scalar_prefetch = 0 : i64, scratch_operands = 0 : i64, tpu.core_type = #tpu.core_type<tc>, window_params = [{transform_indices = @transform_0, window_bounds = array<i64: 1, 256, 256>}, {pipeline_mode = #tpu.pipeline_mode<synchronous>, transform_indices = @transform_1, window_bounds = array<i64: 256, 256>}, {transform_indices = @transform_2, window_bounds = array<i64: 1, 256, 256>}, {transform_indices = @transform_3, window_bounds = array<i64: 1, 8, 256>}, {transform_indices = @transform_4, window_bounds = array<i64: 1, 8, 256>}]} {
    %c0 = arith.constant 0 : index
    %c0_0 = arith.constant 0 : index
    %c0_1 = arith.constant 0 : index
    %0 = vector.load %arg1[%c0, %c0_0, %c0_1] : memref<1x256x256xf32, #tpu.memory_space<vmem>>, vector<1x256x256xf32>
    %1 = vector.shape_cast %0 : vector<1x256x256xf32> to vector<256x256xf32>
    %2 = arith.truncf %1 : vector<256x256xf32> to vector<256x256xbf16>
    %3 = tpu.transpose %2, [1, 0] : vector<256x256xbf16> -> vector<256x256xbf16>
    %c0_2 = arith.constant 0 : index
    %c0_3 = arith.constant 0 : index
    %4 = vector.load %arg2[%c0_2, %c0_3] : memref<256x256xbf16, #tpu.memory_space<vmem>>, vector<256x256xbf16>
    %cst = arith.constant dense<0.000000e+00> : vector<256x256xf32>
    %5 = tpu.matmul %3, %4, %cst {dimension_numbers = #tpu.dot_dimension_numbers<[1], [0], [0], [1], [0, 0, 1, 1], [], []>} : vector<256x256xbf16>, vector<256x256xbf16>, vector<256x256xf32> -> vector<256x256xf32>
    %6 = arith.truncf %5 : vector<256x256xf32> to vector<256x256xbf16>
    %c0_4 = arith.constant 0 : index
    %c0_5 = arith.constant 0 : index
    %c0_6 = arith.constant 0 : index
    %7 = vector.load %arg3[%c0_4, %c0_5, %c0_6] : memref<1x256x256xbf16, #tpu.memory_space<vmem>>, vector<1x256x256xbf16>
    %8 = vector.shape_cast %7 : vector<1x256x256xbf16> to vector<256x256xbf16>
    %9 = vector.shape_cast %6 : vector<256x256xbf16> to vector<1x256x256xbf16>
    tpu.vector_store %arg3[%c0_4, %c0_5, %c0_6], %9 {strides = array<i32>} : memref<1x256x256xbf16, #tpu.memory_space<vmem>>, vector<1x256x256xbf16>,
    %10 = vector.shape_cast %5 : vector<256x256xf32> to vector<32x8x256xf32>
    %cst_7 = arith.constant dense<0.000000e+00> : vector<8x256xf32>
    %11 = vector.multi_reduction <add>, %10, %cst_7 [0] : vector<32x8x256xf32> to vector<8x256xf32>
    %12 = vector.shape_cast %11 : vector<8x256xf32> to vector<1x8x256xf32>
    %c0_8 = arith.constant 0 : index
    %c0_9 = arith.constant 0 : index
    %c0_10 = arith.constant 0 : index
    %13 = vector.load %arg4[%c0_8, %c0_9, %c0_10] : memref<1x8x256xf32, #tpu.memory_space<vmem>>, vector<1x8x256xf32>
    tpu.vector_store %arg4[%c0_8, %c0_9, %c0_10], %12 {strides = array<i32>} : memref<1x8x256xf32, #tpu.memory_space<vmem>>, vector<1x8x256xf32>,
    %14 = arith.mulf %10, %10 : vector<32x8x256xf32>
    %cst_11 = arith.constant dense<0.000000e+00> : vector<8x256xf32>
    %15 = vector.multi_reduction <add>, %14, %cst_11 [0] : vector<32x8x256xf32> to vector<8x256xf32>
    %16 = vector.shape_cast %15 : vector<8x256xf32> to vector<1x8x256xf32>
    %c0_12 = arith.constant 0 : index
    %c0_13 = arith.constant 0 : index
    %c0_14 = arith.constant 0 : index
    %17 = vector.load %arg5[%c0_12, %c0_13, %c0_14] : memref<1x8x256xf32, #tpu.memory_space<vmem>>, vector<1x8x256xf32>
    tpu.vector_store %arg5[%c0_12, %c0_13, %c0_14], %16 {strides = array<i32>} : memref<1x8x256xf32, #tpu.memory_space<vmem>>, vector<1x8x256xf32>,
    return
  }
  func.func @transform_0(%arg0: i32) -> (i32, i32, i32) {
    %c0_i32 = arith.constant 0 : i32
    %c0_i32_0 = arith.constant 0 : i32
    %c0_i32_1 = arith.constant 0 : i32
    return %arg0, %c0_i32, %c0_i32_0 : i32, i32, i32
  }
  func.func @transform_1(%arg0: i32) -> (i32, i32) {
    %c0_i32 = arith.constant 0 : i32
    %c0_i32_0 = arith.constant 0 : i32
    %c0_i32_1 = arith.constant 0 : i32
    return %c0_i32, %c0_i32_0 : i32, i32
  }
  func.func @transform_2(%arg0: i32) -> (i32, i32, i32) {
    %c0_i32 = arith.constant 0 : i32
    %c0_i32_0 = arith.constant 0 : i32
    %c0_i32_1 = arith.constant 0 : i32
    return %arg0, %c0_i32, %c0_i32_0 : i32, i32, i32
  }
  func.func @transform_3(%arg0: i32) -> (i32, i32, i32) {
    %c0_i32 = arith.constant 0 : i32
    %c0_i32_0 = arith.constant 0 : i32
    %c0_i32_1 = arith.constant 0 : i32
    return %arg0, %c0_i32, %c0_i32_0 : i32, i32, i32
  }
  func.func @transform_4(%arg0: i32) -> (i32, i32, i32) {
    %c0_i32 = arith.constant 0 : i32
    %c0_i32_0 = arith.constant 0 : i32
    %c0_i32_1 = arith.constant 0 : i32
    return %arg0, %c0_i32, %c0_i32_0 : i32, i32, i32
  }
}

module attributes {stable_mosaic.version = 11 : i64} {
  func.func @grouped_conv_kernel(%arg0: i32, %arg1: i32, %arg2: memref<1x16x16x256xbf16, #tpu.memory_space<vmem>>, %arg3: memref<1x256xf32, #tpu.memory_space<vmem>>, %arg4: memref<1x256xf32, #tpu.memory_space<vmem>>, %arg5: memref<3x768x256xbf16, #tpu.memory_space<vmem>>, %arg6: memref<1x16x16x256xbf16, #tpu.memory_space<vmem>>, %arg7: memref<1x1x8x256xf32, #tpu.memory_space<vmem>>, %arg8: memref<1x1x8x256xf32, #tpu.memory_space<vmem>>, %arg9: memref<18x16x768xbf16, #tpu.memory_space<vmem>>) attributes {dimension_semantics = [#tpu.dimension_semantics<parallel>, #tpu.dimension_semantics<parallel>], iteration_bounds = array<i64: 2, 1>, scalar_prefetch = 0 : i64, scratch_operands = 1 : i64, tpu.core_type = #tpu.core_type<tc>, window_params = [{transform_indices = @transform_0, window_bounds = array<i64: 1, 16, 16, 256>}, {pipeline_mode = #tpu.pipeline_mode<synchronous>, transform_indices = @transform_1, window_bounds = array<i64: 1, 256>}, {pipeline_mode = #tpu.pipeline_mode<synchronous>, transform_indices = @transform_2, window_bounds = array<i64: 1, 256>}, {pipeline_mode = #tpu.pipeline_mode<synchronous>, transform_indices = @transform_3, window_bounds = array<i64: 3, 768, 256>}, {transform_indices = @transform_4, window_bounds = array<i64: 1, 16, 16, 256>}, {transform_indices = @transform_5, window_bounds = array<i64: 1, 1, 8, 256>}, {transform_indices = @transform_6, window_bounds = array<i64: 1, 1, 8, 256>}]} {
    %c0 = arith.constant 0 : index
    %c0_0 = arith.constant 0 : index
    %0 = vector.load %arg3[%c0, %c0_0] : memref<1x256xf32, #tpu.memory_space<vmem>>, vector<1x256xf32>
    %1 = vector.shape_cast %0 : vector<1x256xf32> to vector<1x1x256xf32>
    %c0_1 = arith.constant 0 : index
    %c0_2 = arith.constant 0 : index
    %2 = vector.load %arg4[%c0_1, %c0_2] : memref<1x256xf32, #tpu.memory_space<vmem>>, vector<1x256xf32>
    %3 = vector.shape_cast %2 : vector<1x256xf32> to vector<1x1x256xf32>
    %c16_i32 = arith.constant 16 : i32
    %4 = arith.muli %arg1, %c16_i32 : i32
    %5 = tpu.assume_multiple %4, 16 : i32
    %c16_i32_3 = arith.constant 16 : i32
    %6 = arith.muli %arg1, %c16_i32_3 : i32
    %c1_i32 = arith.constant 1 : i32
    %7 = arith.subi %6, %c1_i32 : i32
    %c0_i32 = arith.constant 0 : i32
    %8 = arith.maxsi %7, %c0_i32 : i32
    %c0_i32_4 = arith.constant 0 : i32
    %c0_i32_5 = arith.constant 0 : i32
    %c0_i32_6 = arith.constant 0 : i32
    %c0_i32_7 = arith.constant 0 : i32
    %9 = tpu.memref_slice %arg2[%c0_i32_4, %c0_i32_5, %c0_i32_6, %c0_i32_7] : memref<1x16x16x256xbf16, #tpu.memory_space<vmem>> -> memref<1x16x16x256xbf16, #tpu.memory_space<vmem>>
    %10 = tpu.memref_squeeze %9 : memref<1x16x16x256xbf16, #tpu.memory_space<vmem>> -> memref<16x16x256xbf16, #tpu.memory_space<vmem>>
    %11 = arith.index_cast %8 : i32 to index
    %c0_8 = arith.constant 0 : index
    %c0_9 = arith.constant 0 : index
    %12 = vector.load %10[%11, %c0_8, %c0_9] : memref<16x16x256xbf16, #tpu.memory_space<vmem>>, vector<1x16x256xbf16>
    %13 = arith.extf %12 : vector<1x16x256xbf16> to vector<1x16x256xf32>
    %14 = vector.broadcast %1 : vector<1x1x256xf32> to vector<1x16x256xf32>
    %15 = arith.mulf %13, %14 : vector<1x16x256xf32>
    %16 = vector.broadcast %3 : vector<1x1x256xf32> to vector<1x16x256xf32>
    %17 = arith.addf %15, %16 : vector<1x16x256xf32>
    %cst = arith.constant 0.000000e+00 : f32
    %18 = vector.broadcast %cst : f32 to vector<1x16x256xf32>
    %19 = arith.maximumf %17, %18 : vector<1x16x256xf32>
    %20 = arith.truncf %19 : vector<1x16x256xf32> to vector<1x16x256xbf16>
    %c0_i32_10 = arith.constant 0 : i32
    %21 = arith.cmpi sgt, %arg1, %c0_i32_10 : i32
    %cst_11 = arith.constant 0.000000e+00 : bf16
    %22 = vector.broadcast %cst_11 : bf16 to vector<1x16x256xbf16>
    %23 = arith.select %21, %20, %22 : vector<1x16x256xbf16>
    %c16_i32_12 = arith.constant 16 : i32
    %24 = arith.muli %arg1, %c16_i32_12 : i32
    %c16_i32_13 = arith.constant 16 : i32
    %25 = arith.addi %24, %c16_i32_13 : i32
    %c15_i32 = arith.constant 15 : i32
    %26 = arith.minsi %25, %c15_i32 : i32
    %c0_i32_14 = arith.constant 0 : i32
    %c0_i32_15 = arith.constant 0 : i32
    %c0_i32_16 = arith.constant 0 : i32
    %c0_i32_17 = arith.constant 0 : i32
    %27 = tpu.memref_slice %arg2[%c0_i32_14, %c0_i32_15, %c0_i32_16, %c0_i32_17] : memref<1x16x16x256xbf16, #tpu.memory_space<vmem>> -> memref<1x16x16x256xbf16, #tpu.memory_space<vmem>>
    %28 = tpu.memref_squeeze %27 : memref<1x16x16x256xbf16, #tpu.memory_space<vmem>> -> memref<16x16x256xbf16, #tpu.memory_space<vmem>>
    %29 = arith.index_cast %26 : i32 to index
    %c0_18 = arith.constant 0 : index
    %c0_19 = arith.constant 0 : index
    %30 = vector.load %28[%29, %c0_18, %c0_19] : memref<16x16x256xbf16, #tpu.memory_space<vmem>>, vector<1x16x256xbf16>
    %31 = arith.extf %30 : vector<1x16x256xbf16> to vector<1x16x256xf32>
    %32 = vector.broadcast %1 : vector<1x1x256xf32> to vector<1x16x256xf32>
    %33 = arith.mulf %31, %32 : vector<1x16x256xf32>
    %34 = vector.broadcast %3 : vector<1x1x256xf32> to vector<1x16x256xf32>
    %35 = arith.addf %33, %34 : vector<1x16x256xf32>
    %cst_20 = arith.constant 0.000000e+00 : f32
    %36 = vector.broadcast %cst_20 : f32 to vector<1x16x256xf32>
    %37 = arith.maximumf %35, %36 : vector<1x16x256xf32>
    %38 = arith.truncf %37 : vector<1x16x256xf32> to vector<1x16x256xbf16>
    %c0_i32_21 = arith.constant 0 : i32
    %39 = arith.cmpi slt, %arg1, %c0_i32_21 : i32
    %cst_22 = arith.constant 0.000000e+00 : bf16
    %40 = vector.broadcast %cst_22 : bf16 to vector<1x16x256xbf16>
    %41 = arith.select %39, %38, %40 : vector<1x16x256xbf16>
    %c0_23 = arith.constant 0 : index
    %c0_24 = arith.constant 0 : index
    %c256 = arith.constant 256 : index
    %42 = vector.load %arg9[%c0_23, %c0_24, %c256] : memref<18x16x768xbf16, #tpu.memory_space<vmem>>, vector<1x16x256xbf16>
    tpu.vector_store %arg9[%c0_23, %c0_24, %c256], %23 {strides = array<i32>} : memref<18x16x768xbf16, #tpu.memory_space<vmem>>, vector<1x16x256xbf16>,
    %c0_i32_25 = arith.constant 0 : i32
    %c0_i32_26 = arith.constant 0 : i32
    %c0_i32_27 = arith.constant 0 : i32
    %c0_i32_28 = arith.constant 0 : i32
    %43 = tpu.memref_slice %arg2[%c0_i32_25, %c0_i32_26, %c0_i32_27, %c0_i32_28] : memref<1x16x16x256xbf16, #tpu.memory_space<vmem>> -> memref<1x16x16x256xbf16, #tpu.memory_space<vmem>>
    %44 = tpu.memref_squeeze %43 : memref<1x16x16x256xbf16, #tpu.memory_space<vmem>> -> memref<16x16x256xbf16, #tpu.memory_space<vmem>>
    %45 = arith.index_cast %5 : i32 to index
    %c0_29 = arith.constant 0 : index
    %c0_30 = arith.constant 0 : index
    %46 = vector.load %44[%45, %c0_29, %c0_30] : memref<16x16x256xbf16, #tpu.memory_space<vmem>>, vector<16x16x256xbf16>
    %47 = arith.extf %46 : vector<16x16x256xbf16> to vector<16x16x256xf32>
    %48 = vector.broadcast %1 : vector<1x1x256xf32> to vector<16x16x256xf32>
    %49 = arith.mulf %47, %48 : vector<16x16x256xf32>
    %50 = vector.broadcast %3 : vector<1x1x256xf32> to vector<16x16x256xf32>
    %51 = arith.addf %49, %50 : vector<16x16x256xf32>
    %cst_31 = arith.constant 0.000000e+00 : f32
    %52 = vector.broadcast %cst_31 : f32 to vector<16x16x256xf32>
    %53 = arith.maximumf %51, %52 : vector<16x16x256xf32>
    %54 = arith.truncf %53 : vector<16x16x256xf32> to vector<16x16x256xbf16>
    %c1 = arith.constant 1 : index
    %c0_32 = arith.constant 0 : index
    %c256_33 = arith.constant 256 : index
    %55 = vector.load %arg9[%c1, %c0_32, %c256_33] : memref<18x16x768xbf16, #tpu.memory_space<vmem>>, vector<16x16x256xbf16>
    tpu.vector_store %arg9[%c1, %c0_32, %c256_33], %54 {strides = array<i32>} : memref<18x16x768xbf16, #tpu.memory_space<vmem>>, vector<16x16x256xbf16>,
    %c17 = arith.constant 17 : index
    %c0_34 = arith.constant 0 : index
    %c256_35 = arith.constant 256 : index
    %56 = vector.load %arg9[%c17, %c0_34, %c256_35] : memref<18x16x768xbf16, #tpu.memory_space<vmem>>, vector<1x16x256xbf16>
    tpu.vector_store %arg9[%c17, %c0_34, %c256_35], %41 {strides = array<i32>} : memref<18x16x768xbf16, #tpu.memory_space<vmem>>, vector<1x16x256xbf16>,
    %c0_36 = arith.constant 0 : index
    %c0_37 = arith.constant 0 : index
    %c256_38 = arith.constant 256 : index
    %57 = vector.load %arg9[%c0_36, %c0_37, %c256_38] : memref<18x16x768xbf16, #tpu.memory_space<vmem>>, vector<18x16x256xbf16>
    %cst_39 = arith.constant 0.000000e+00 : bf16
    %58 = vector.broadcast %cst_39 : bf16 to vector<18x1x256xbf16>
    %59 = vector.extract_strided_slice %57 {offsets = [0, 0, 0], sizes = [18, 15, 256], strides = [1, 1, 1]} : vector<18x16x256xbf16> to vector<18x15x256xbf16>
    %60 = tpu.concatenate %58, %59 in 1 : vector<18x1x256xbf16>, vector<18x15x256xbf16> -> vector<18x16x256xbf16>
    %c0_40 = arith.constant 0 : index
    %c0_41 = arith.constant 0 : index
    %c0_42 = arith.constant 0 : index
    %61 = vector.load %arg9[%c0_40, %c0_41, %c0_42] : memref<18x16x768xbf16, #tpu.memory_space<vmem>>, vector<18x16x256xbf16>
    tpu.vector_store %arg9[%c0_40, %c0_41, %c0_42], %60 {strides = array<i32>} : memref<18x16x768xbf16, #tpu.memory_space<vmem>>, vector<18x16x256xbf16>,
    %62 = vector.extract_strided_slice %57 {offsets = [0, 1, 0], sizes = [18, 15, 256], strides = [1, 1, 1]} : vector<18x16x256xbf16> to vector<18x15x256xbf16>
    %63 = tpu.concatenate %62, %58 in 1 : vector<18x15x256xbf16>, vector<18x1x256xbf16> -> vector<18x16x256xbf16>
    %c0_43 = arith.constant 0 : index
    %c0_44 = arith.constant 0 : index
    %c512 = arith.constant 512 : index
    %64 = vector.load %arg9[%c0_43, %c0_44, %c512] : memref<18x16x768xbf16, #tpu.memory_space<vmem>>, vector<18x16x256xbf16>
    tpu.vector_store %arg9[%c0_43, %c0_44, %c512], %63 {strides = array<i32>} : memref<18x16x768xbf16, #tpu.memory_space<vmem>>, vector<18x16x256xbf16>,
    %c0_45 = arith.constant 0 : index
    %c0_46 = arith.constant 0 : index
    %c0_47 = arith.constant 0 : index
    %65 = vector.load %arg9[%c0_45, %c0_46, %c0_47] : memref<18x16x768xbf16, #tpu.memory_space<vmem>>, vector<16x16x768xbf16>
    %66 = vector.shape_cast %65 : vector<16x16x768xbf16> to vector<256x768xbf16>
    %c0_48 = arith.constant 0 : index
    %c0_49 = arith.constant 0 : index
    %c0_50 = arith.constant 0 : index
    %67 = vector.load %arg5[%c0_48, %c0_49, %c0_50] : memref<3x768x256xbf16, #tpu.memory_space<vmem>>, vector<1x768x256xbf16>
    %68 = vector.shape_cast %67 : vector<1x768x256xbf16> to vector<768x256xbf16>
    %cst_51 = arith.constant dense<0.000000e+00> : vector<256x256xf32>
    %69 = tpu.matmul %66, %68, %cst_51 {dimension_numbers = #tpu.dot_dimension_numbers<[1], [0], [0], [1], [0, 0, 1, 1], [], []>} : vector<256x768xbf16>, vector<768x256xbf16>, vector<256x256xf32> -> vector<256x256xf32>
    %c1_52 = arith.constant 1 : index
    %c0_53 = arith.constant 0 : index
    %c0_54 = arith.constant 0 : index
    %70 = vector.load %arg9[%c1_52, %c0_53, %c0_54] : memref<18x16x768xbf16, #tpu.memory_space<vmem>>, vector<16x16x768xbf16>
    %71 = vector.shape_cast %70 : vector<16x16x768xbf16> to vector<256x768xbf16>
    %c1_55 = arith.constant 1 : index
    %c0_56 = arith.constant 0 : index
    %c0_57 = arith.constant 0 : index
    %72 = vector.load %arg5[%c1_55, %c0_56, %c0_57] : memref<3x768x256xbf16, #tpu.memory_space<vmem>>, vector<1x768x256xbf16>
    %73 = vector.shape_cast %72 : vector<1x768x256xbf16> to vector<768x256xbf16>
    %cst_58 = arith.constant dense<0.000000e+00> : vector<256x256xf32>
    %74 = tpu.matmul %71, %73, %cst_58 {dimension_numbers = #tpu.dot_dimension_numbers<[1], [0], [0], [1], [0, 0, 1, 1], [], []>} : vector<256x768xbf16>, vector<768x256xbf16>, vector<256x256xf32> -> vector<256x256xf32>
    %75 = arith.addf %69, %74 : vector<256x256xf32>
    %c2 = arith.constant 2 : index
    %c0_59 = arith.constant 0 : index
    %c0_60 = arith.constant 0 : index
    %76 = vector.load %arg9[%c2, %c0_59, %c0_60] : memref<18x16x768xbf16, #tpu.memory_space<vmem>>, vector<16x16x768xbf16>
    %77 = vector.shape_cast %76 : vector<16x16x768xbf16> to vector<256x768xbf16>
    %c2_61 = arith.constant 2 : index
    %c0_62 = arith.constant 0 : index
    %c0_63 = arith.constant 0 : index
    %78 = vector.load %arg5[%c2_61, %c0_62, %c0_63] : memref<3x768x256xbf16, #tpu.memory_space<vmem>>, vector<1x768x256xbf16>
    %79 = vector.shape_cast %78 : vector<1x768x256xbf16> to vector<768x256xbf16>
    %cst_64 = arith.constant dense<0.000000e+00> : vector<256x256xf32>
    %80 = tpu.matmul %77, %79, %cst_64 {dimension_numbers = #tpu.dot_dimension_numbers<[1], [0], [0], [1], [0, 0, 1, 1], [], []>} : vector<256x768xbf16>, vector<768x256xbf16>, vector<256x256xf32> -> vector<256x256xf32>
    %81 = arith.addf %75, %80 : vector<256x256xf32>
    %82 = vector.shape_cast %81 : vector<256x256xf32> to vector<1x16x16x256xf32>
    %83 = arith.truncf %82 : vector<1x16x16x256xf32> to vector<1x16x16x256xbf16>
    %c0_65 = arith.constant 0 : index
    %c0_66 = arith.constant 0 : index
    %c0_67 = arith.constant 0 : index
    %c0_68 = arith.constant 0 : index
    %84 = vector.load %arg6[%c0_65, %c0_66, %c0_67, %c0_68] : memref<1x16x16x256xbf16, #tpu.memory_space<vmem>>, vector<1x16x16x256xbf16>
    tpu.vector_store %arg6[%c0_65, %c0_66, %c0_67, %c0_68], %83 {strides = array<i32>} : memref<1x16x16x256xbf16, #tpu.memory_space<vmem>>, vector<1x16x16x256xbf16>,
    %85 = vector.shape_cast %81 : vector<256x256xf32> to vector<32x8x256xf32>
    %cst_69 = arith.constant dense<0.000000e+00> : vector<8x256xf32>
    %86 = vector.multi_reduction <add>, %85, %cst_69 [0] : vector<32x8x256xf32> to vector<8x256xf32>
    %87 = vector.shape_cast %86 : vector<8x256xf32> to vector<1x1x8x256xf32>
    %c0_70 = arith.constant 0 : index
    %c0_71 = arith.constant 0 : index
    %c0_72 = arith.constant 0 : index
    %c0_73 = arith.constant 0 : index
    %88 = vector.load %arg7[%c0_70, %c0_71, %c0_72, %c0_73] : memref<1x1x8x256xf32, #tpu.memory_space<vmem>>, vector<1x1x8x256xf32>
    tpu.vector_store %arg7[%c0_70, %c0_71, %c0_72, %c0_73], %87 {strides = array<i32>} : memref<1x1x8x256xf32, #tpu.memory_space<vmem>>, vector<1x1x8x256xf32>,
    %89 = arith.mulf %85, %85 : vector<32x8x256xf32>
    %cst_74 = arith.constant dense<0.000000e+00> : vector<8x256xf32>
    %90 = vector.multi_reduction <add>, %89, %cst_74 [0] : vector<32x8x256xf32> to vector<8x256xf32>
    %91 = vector.shape_cast %90 : vector<8x256xf32> to vector<1x1x8x256xf32>
    %c0_75 = arith.constant 0 : index
    %c0_76 = arith.constant 0 : index
    %c0_77 = arith.constant 0 : index
    %c0_78 = arith.constant 0 : index
    %92 = vector.load %arg8[%c0_75, %c0_76, %c0_77, %c0_78] : memref<1x1x8x256xf32, #tpu.memory_space<vmem>>, vector<1x1x8x256xf32>
    tpu.vector_store %arg8[%c0_75, %c0_76, %c0_77, %c0_78], %91 {strides = array<i32>} : memref<1x1x8x256xf32, #tpu.memory_space<vmem>>, vector<1x1x8x256xf32>,
    return
  }
  func.func @transform_0(%arg0: i32, %arg1: i32) -> (i32, i32, i32, i32) {
    %c0_i32 = arith.constant 0 : i32
    %c0_i32_0 = arith.constant 0 : i32
    %c0_i32_1 = arith.constant 0 : i32
    %c0_i32_2 = arith.constant 0 : i32
    return %arg0, %c0_i32, %c0_i32_0, %c0_i32_1 : i32, i32, i32, i32
  }
  func.func @transform_1(%arg0: i32, %arg1: i32) -> (i32, i32) {
    %c0_i32 = arith.constant 0 : i32
    %c0_i32_0 = arith.constant 0 : i32
    %c0_i32_1 = arith.constant 0 : i32
    return %c0_i32, %c0_i32_0 : i32, i32
  }
  func.func @transform_2(%arg0: i32, %arg1: i32) -> (i32, i32) {
    %c0_i32 = arith.constant 0 : i32
    %c0_i32_0 = arith.constant 0 : i32
    %c0_i32_1 = arith.constant 0 : i32
    return %c0_i32, %c0_i32_0 : i32, i32
  }
  func.func @transform_3(%arg0: i32, %arg1: i32) -> (i32, i32, i32) {
    %c0_i32 = arith.constant 0 : i32
    %c0_i32_0 = arith.constant 0 : i32
    %c0_i32_1 = arith.constant 0 : i32
    %c0_i32_2 = arith.constant 0 : i32
    return %c0_i32, %c0_i32_0, %c0_i32_1 : i32, i32, i32
  }
  func.func @transform_4(%arg0: i32, %arg1: i32) -> (i32, i32, i32, i32) {
    %c0_i32 = arith.constant 0 : i32
    %c0_i32_0 = arith.constant 0 : i32
    %c0_i32_1 = arith.constant 0 : i32
    return %arg0, %arg1, %c0_i32, %c0_i32_0 : i32, i32, i32, i32
  }
  func.func @transform_5(%arg0: i32, %arg1: i32) -> (i32, i32, i32, i32) {
    %c0_i32 = arith.constant 0 : i32
    %c0_i32_0 = arith.constant 0 : i32
    %c0_i32_1 = arith.constant 0 : i32
    return %arg0, %arg1, %c0_i32, %c0_i32_0 : i32, i32, i32, i32
  }
  func.func @transform_6(%arg0: i32, %arg1: i32) -> (i32, i32, i32, i32) {
    %c0_i32 = arith.constant 0 : i32
    %c0_i32_0 = arith.constant 0 : i32
    %c0_i32_1 = arith.constant 0 : i32
    return %arg0, %arg1, %c0_i32, %c0_i32_0 : i32, i32, i32, i32
  }
}

module attributes {stable_mosaic.version = 11 : i64} {
  func.func @bnrelu_pw_conv_kernel(%arg0: i32, %arg1: memref<1x256x256xbf16, #tpu.memory_space<vmem>>, %arg2: memref<1x256xf32, #tpu.memory_space<vmem>>, %arg3: memref<1x256xf32, #tpu.memory_space<vmem>>, %arg4: memref<256x256xbf16, #tpu.memory_space<vmem>>, %arg5: memref<1x256x256xf32, #tpu.memory_space<vmem>>) attributes {dimension_semantics = [#tpu.dimension_semantics<parallel>], iteration_bounds = array<i64: 2>, scalar_prefetch = 0 : i64, scratch_operands = 0 : i64, tpu.core_type = #tpu.core_type<tc>, window_params = [{transform_indices = @transform_0, window_bounds = array<i64: 1, 256, 256>}, {pipeline_mode = #tpu.pipeline_mode<synchronous>, transform_indices = @transform_1, window_bounds = array<i64: 1, 256>}, {pipeline_mode = #tpu.pipeline_mode<synchronous>, transform_indices = @transform_2, window_bounds = array<i64: 1, 256>}, {pipeline_mode = #tpu.pipeline_mode<synchronous>, transform_indices = @transform_3, window_bounds = array<i64: 256, 256>}, {transform_indices = @transform_4, window_bounds = array<i64: 1, 256, 256>}]} {
    %c0 = arith.constant 0 : index
    %c0_0 = arith.constant 0 : index
    %c0_1 = arith.constant 0 : index
    %0 = vector.load %arg1[%c0, %c0_0, %c0_1] : memref<1x256x256xbf16, #tpu.memory_space<vmem>>, vector<1x256x256xbf16>
    %1 = vector.shape_cast %0 : vector<1x256x256xbf16> to vector<256x256xbf16>
    %2 = arith.extf %1 : vector<256x256xbf16> to vector<256x256xf32>
    %c0_2 = arith.constant 0 : index
    %c0_3 = arith.constant 0 : index
    %3 = vector.load %arg2[%c0_2, %c0_3] : memref<1x256xf32, #tpu.memory_space<vmem>>, vector<1x256xf32>
    %4 = vector.broadcast %3 : vector<1x256xf32> to vector<256x256xf32>
    %5 = arith.mulf %2, %4 : vector<256x256xf32>
    %c0_4 = arith.constant 0 : index
    %c0_5 = arith.constant 0 : index
    %6 = vector.load %arg3[%c0_4, %c0_5] : memref<1x256xf32, #tpu.memory_space<vmem>>, vector<1x256xf32>
    %7 = vector.broadcast %6 : vector<1x256xf32> to vector<256x256xf32>
    %8 = arith.addf %5, %7 : vector<256x256xf32>
    %cst = arith.constant 0.000000e+00 : f32
    %9 = vector.broadcast %cst : f32 to vector<256x256xf32>
    %10 = arith.maximumf %8, %9 : vector<256x256xf32>
    %c0_6 = arith.constant 0 : index
    %c0_7 = arith.constant 0 : index
    %11 = vector.load %arg4[%c0_6, %c0_7] : memref<256x256xbf16, #tpu.memory_space<vmem>>, vector<256x256xbf16>
    %12 = arith.truncf %10 : vector<256x256xf32> to vector<256x256xbf16>
    %cst_8 = arith.constant dense<0.000000e+00> : vector<256x256xf32>
    %13 = tpu.matmul %11, %12, %cst_8 {dimension_numbers = #tpu.dot_dimension_numbers<[1], [1], [0], [0], [0, 0, 1, 0], [], []>} : vector<256x256xbf16>, vector<256x256xbf16>, vector<256x256xf32> -> vector<256x256xf32>
    %c0_9 = arith.constant 0 : index
    %c0_10 = arith.constant 0 : index
    %c0_11 = arith.constant 0 : index
    %14 = vector.load %arg5[%c0_9, %c0_10, %c0_11] : memref<1x256x256xf32, #tpu.memory_space<vmem>>, vector<1x256x256xf32>
    %15 = vector.shape_cast %14 : vector<1x256x256xf32> to vector<256x256xf32>
    %16 = vector.shape_cast %13 : vector<256x256xf32> to vector<1x256x256xf32>
    tpu.vector_store %arg5[%c0_9, %c0_10, %c0_11], %16 {strides = array<i32>} : memref<1x256x256xf32, #tpu.memory_space<vmem>>, vector<1x256x256xf32>,
    return
  }
  func.func @transform_0(%arg0: i32) -> (i32, i32, i32) {
    %c0_i32 = arith.constant 0 : i32
    %c0_i32_0 = arith.constant 0 : i32
    %c0_i32_1 = arith.constant 0 : i32
    return %arg0, %c0_i32, %c0_i32_0 : i32, i32, i32
  }
  func.func @transform_1(%arg0: i32) -> (i32, i32) {
    %c0_i32 = arith.constant 0 : i32
    %c0_i32_0 = arith.constant 0 : i32
    %c0_i32_1 = arith.constant 0 : i32
    return %c0_i32, %c0_i32_0 : i32, i32
  }
  func.func @transform_2(%arg0: i32) -> (i32, i32) {
    %c0_i32 = arith.constant 0 : i32
    %c0_i32_0 = arith.constant 0 : i32
    %c0_i32_1 = arith.constant 0 : i32
    return %c0_i32, %c0_i32_0 : i32, i32
  }
  func.func @transform_3(%arg0: i32) -> (i32, i32) {
    %c0_i32 = arith.constant 0 : i32
    %c0_i32_0 = arith.constant 0 : i32
    %c0_i32_1 = arith.constant 0 : i32
    return %c0_i32, %c0_i32_0 : i32, i32
  }
  func.func @transform_4(%arg0: i32) -> (i32, i32, i32) {
    %c0_i32 = arith.constant 0 : i32
    %c0_i32_0 = arith.constant 0 : i32
    %c0_i32_1 = arith.constant 0 : i32
    return %arg0, %c0_i32, %c0_i32_0 : i32, i32, i32
  }
}

</mosaic_0001>

<bundles_post_ra>
// kernel: resnext_block.3
= control target key start
LH: loop header
LB: loop body
LE: loop exit
PB: predicated region body
PF: predicated region fallthrough
CT: control target
= control target key end

     0   :  { %s1541_s15 = smov 0   ;;  %s1861_s0 = inlined_call_operand.vmem [shape: f32[2,256,256], index: 0, kind: input, shape index: {}]   ;;  %s1862_s1 = inlined_call_operand.vmem [shape: bf16[256,256], index: 1, kind: input, shape index: {}]   ;;  %s1863_s2 = inlined_call_operand.vmem [shape: bf16[2,256,256], index: 2, kind: output, shape index: {0}]   ;;  %s1864_s3 = inlined_call_operand.vmem [shape: f32[2,8,256], index: 3, kind: output, shape index: {1}]   ;;  %s1865_s4 = inlined_call_operand.vmem [shape: f32[2,8,256], index: 4, kind: output, shape index: {2}]  }
   0x1 LB: > { %s1305_s16 = sadd.s32 4294967295, %s1514_s15   ;;  %p1309_p0 = scmp.ge.s32.totalorder %s1514_s15, 1  ;;  %s1514_s15 = sphi %s1541_s15, %s15_s15  }
   0x2   : > { %p167_p1 = scmp.lt.s32.totalorder %s1514_s15, 3 }
   0x4   : > { %p168_p2 = pnand %p1309_p0, %p167_p1 }
   0x5   : > { %p203_p3 = scmp.lt.s32.totalorder (!%p168_p2), %s1305_s16, 1  ;;  %v1460_v0 = vld [vmem:[%s1862_s1 + $0x4] ss:$8 sps:$4 sm:$0xff] (!%p168_p2)   ;;  %v1462_v1 = vld [vmem:[%s1862_s1] ss:$8 sps:$4 sm:$0xff] (!%p168_p2)  }
   0x6   : > { %171 = sbr.rel (%p168_p2) target bundleno = 432 (0x1b0), region = 28  ;;  %575 = vmatprep.subr.bf16.mxu0 (!%p168_p2), %v1460_v0  ;;  %v1463_v2 = vld [vmem:[%s1862_s1 + $0x14] ss:$8 sps:$4 sm:$0xff] (!%p168_p2)   ;;  %1420 = vmatprep.subr.bf16.mxu1 (!%p168_p2), %v1460_v0  ;;  %v1465_v3 = vld [vmem:[%s1862_s1 + $0x10] ss:$8 sps:$4 sm:$0xff] (!%p168_p2)  }
   0x7   : > { %576 = vmatpush1.bf16.msra.mxu0 (!%p168_p2), %v1462_v1  ;;  %1436 = vmatpush1.bf16.msra.mxu1 (!%p168_p2), %v1462_v1  ;;  %v1466_v4 = vld [vmem:[%s1862_s1 + $0x24] ss:$8 sps:$4 sm:$0xff] (!%p168_p2)   ;;  %v1468_v5 = vld [vmem:[%s1862_s1 + $0x20] ss:$8 sps:$4 sm:$0xff] (!%p168_p2)   ;;  %v1469_v16 = vld [vmem:[%s1862_s1 + $0x34] ss:$8 sps:$4 sm:$0xff] (!%p168_p2)  }
   0x8   : > { %577 = vmatprep.subr.bf16.mxu0 (!%p168_p2), %v1463_v2  ;;  %1421 = vmatprep.subr.bf16.mxu1 (!%p168_p2), %v1463_v2  ;;  %v1471_v23 = vld [vmem:[%s1862_s1 + $0x30] ss:$8 sps:$4 sm:$0xff] (!%p168_p2)   ;;  %v1472_v42 = vld [vmem:[%s1862_s1 + $0x44] ss:$8 sps:$4 sm:$0xff] (!%p168_p2)   ;;  %v1474_v45 = vld [vmem:[%s1862_s1 + $0x40] ss:$8 sps:$4 sm:$0xff] (!%p168_p2)  }
   0x9   : > { %v1475_v50 = vld [vmem:[%s1862_s1 + $0x54] ss:$8 sps:$4 sm:$0xff] (!%p168_p2)   ;;  %v1477_v52 = vld [vmem:[%s1862_s1 + $0x50] ss:$8 sps:$4 sm:$0xff] (!%p168_p2)   ;;  %v1478_v57 = vld [vmem:[%s1862_s1 + $0x64] ss:$8 sps:$4 sm:$0xff] (!%p168_p2)  }
   0xa   : > { %v1480_v59 = vld [vmem:[%s1862_s1 + $0x60] ss:$8 sps:$4 sm:$0xff] (!%p168_p2)   ;;  %v1481_v60 = vld [vmem:[%s1862_s1 + $0x74] ss:$8 sps:$4 sm:$0xff] (!%p168_p2)  }
   0xb   : > { %578 = vmatpush1.bf16.msra.mxu0 (!%p168_p2), %v1465_v3  ;;  %1437 = vmatpush1.bf16.msra.mxu1 (!%p168_p2), %v1465_v3  ;;  %v1483_v3 = vld [vmem:[%s1862_s1 + $0x70] ss:$8 sps:$4 sm:$0xff] (!%p168_p2)  }
   0xc   : > { %579 = vmatprep.subr.bf16.mxu0 (!%p168_p2), %v1466_v4  ;;  %1422 = vmatprep.subr.bf16.mxu1 (!%p168_p2), %v1466_v4  ;;  %v1484_v4 = vld [vmem:[%s1862_s1 + $0x84] ss:$8 sps:$4 sm:$0xff] (!%p168_p2)  }
   0xd   : > { %s1867_s16 = smov (!%p203_p3, %s1305_s16), 1 }
   0xe   : > { %s1384_s25 = sshll.u32 %s1867_s16, 9  ;;  %s1386_s18 = sshll.u32 %s1867_s16, 4 }
   0xf   : > { %s1570_s30 = scalar_lea.vmem %s1861_s0, %s1384_s25  ;;  %580 = vmatpush1.bf16.msra.mxu0 %v1468_v5  ;;  %1438 = vmatpush1.bf16.msra.mxu1 %v1468_v5  ;;  %s217_s21 = scalar_lea.vmem %s1864_s3, %s1386_s18 }
  0x10   : > { %v255_v6 = vld [vmem:[%s1570_s30 + $0x100] sm:$0xff]  ;;  %v257_v7 = vld [vmem:[%s1570_s30 + $0x110] sm:$0xff]  ;;  %581 = vmatprep.subr.bf16.mxu0 %v1469_v16  ;;  %1423 = vmatprep.subr.bf16.mxu1 %v1469_v16  ;;  %v256_v62 = vld [vmem:[%s1570_s30 + $0x108] sm:$0xff]  ;;  %s222_s23 = scalar_lea.vmem %s1865_s4, %s1386_s18 }
  0x11   : > { %v223_v8 = vld [vmem:[%s1570_s30] sm:$0xff]  ;;  %v303_v9 = vpack.c.bf16 %v257_v7, %v255_v6  ;;  %v225_v10 = vld [vmem:[%s1570_s30 + $0x10] sm:$0xff]  ;;  %v258_v0 = vld [vmem:[%s1570_s30 + $0x118] sm:$0xff] }
  0x12   : > { %v259_v11 = vld [vmem:[%s1570_s30 + $0x120] sm:$0xff]  ;;  %v261_v12 = vld [vmem:[%s1570_s30 + $0x130] sm:$0xff]  ;;  %v287_v13 = vpack.c.bf16 %v225_v10, %v223_v8  ;;  %v224_v1 = vld [vmem:[%s1570_s30 + $0x8] sm:$0xff]  ;;  %v304_v5 = vpack.c.bf16 %v258_v0, %v256_v62 }
  0x13   : > { %v227_v14 = vld [vmem:[%s1570_s30 + $0x20] sm:$0xff]  ;;  %v229_v15 = vld [vmem:[%s1570_s30 + $0x30] sm:$0xff]  ;;  %351 = vxpose.xlu0.c.b16.start [1/8] %v303_v9, 128  ;;  %v305_v17 = vpack.c.bf16 %v261_v12, %v259_v11  ;;  %582 = vmatpush1.bf16.msra.mxu0 %v1471_v23  ;;  %v226_v2 = vld [vmem:[%s1570_s30 + $0x18] sm:$0xff] }
  0x14   : > { %319 = vxpose.xlu1.c.b16.start [1/8] %v287_v13, 128  ;;  %v289_v18 = vpack.c.bf16 %v229_v15, %v227_v14  ;;  %v263_v19 = vld [vmem:[%s1570_s30 + $0x140] sm:$0xff]  ;;  %v265_v20 = vld [vmem:[%s1570_s30 + $0x150] sm:$0xff]  ;;  %1439 = vmatpush1.bf16.msra.mxu1 %v1471_v23  ;;  %v260_v6 = vld [vmem:[%s1570_s30 + $0x128] sm:$0xff]  ;;  %v288_v7 = vpack.c.bf16 %v226_v2, %v224_v1 }
  0x15   : > { %v231_v21 = vld [vmem:[%s1570_s30 + $0x40] sm:$0xff]  ;;  %v233_v22 = vld [vmem:[%s1570_s30 + $0x50] sm:$0xff]  ;;  %v307_v24 = vpack.c.bf16 %v265_v20, %v263_v19  ;;  %583 = vmatprep.subr.bf16.mxu0 %v1472_v42  ;;  %1424 = vmatprep.subr.bf16.mxu1 %v1472_v42  ;;  %v262_v8 = vld [vmem:[%s1570_s30 + $0x138] sm:$0xff] }
  0x16   : > { %v291_v25 = vpack.c.bf16 %v233_v22, %v231_v21  ;;  %v267_v26 = vld [vmem:[%s1570_s30 + $0x160] sm:$0xff]  ;;  %v269_v27 = vld [vmem:[%s1570_s30 + $0x170] sm:$0xff]  ;;  %v228_v9 = vld [vmem:[%s1570_s30 + $0x28] sm:$0xff]  ;;  %v306_v13 = vpack.c.bf16 %v262_v8, %v260_v6 }
  0x17   : > { %352 = vxpose.xlu0.c.b16.cont [2/8] %v305_v17, 128  ;;  %v235_v28 = vld [vmem:[%s1570_s30 + $0x60] sm:$0xff]  ;;  %v237_v29 = vld [vmem:[%s1570_s30 + $0x70] sm:$0xff]  ;;  %v309_v30 = vpack.c.bf16 %v269_v27, %v267_v26  ;;  %584 = vmatpush1.bf16.msra.mxu0 %v1474_v45  ;;  %v230_v10 = vld [vmem:[%s1570_s30 + $0x38] sm:$0xff] }
  0x18   : > { %320 = vxpose.xlu1.c.b16.cont [2/8] %v289_v18, 128  ;;  %v293_v31 = vpack.c.bf16 %v237_v29, %v235_v28  ;;  %v271_v32 = vld [vmem:[%s1570_s30 + $0x180] sm:$0xff]  ;;  %v273_v33 = vld [vmem:[%s1570_s30 + $0x190] sm:$0xff]  ;;  %1440 = vmatpush1.bf16.msra.mxu1 %v1474_v45  ;;  %v290_v14 = vpack.c.bf16 %v230_v10, %v228_v9  ;;  %v264_v15 = vld [vmem:[%s1570_s30 + $0x148] sm:$0xff] }
  0x19   : > { %v239_v34 = vld [vmem:[%s1570_s30 + $0x80] sm:$0xff]  ;;  %v241_v35 = vld [vmem:[%s1570_s30 + $0x90] sm:$0xff]  ;;  %v311_v36 = vpack.c.bf16 %v273_v33, %v271_v32  ;;  %585 = vmatprep.subr.bf16.mxu0 %v1475_v50  ;;  %1425 = vmatprep.subr.bf16.mxu1 %v1475_v50  ;;  %v266_v16 = vld [vmem:[%s1570_s30 + $0x158] sm:$0xff] }
  0x1a   : > { %v295_v37 = vpack.c.bf16 %v241_v35, %v239_v34  ;;  %v275_v38 = vld [vmem:[%s1570_s30 + $0x1a0] sm:$0xff]  ;;  %v277_v39 = vld [vmem:[%s1570_s30 + $0x1b0] sm:$0xff]  ;;  %v232_v17 = vld [vmem:[%s1570_s30 + $0x48] sm:$0xff]  ;;  %v308_v21 = vpack.c.bf16 %v266_v16, %v264_v15 }
  0x1b   : > { %353 = vxpose.xlu0.c.b16.cont [3/8] %v307_v24, 128  ;;  %v243_v40 = vld [vmem:[%s1570_s30 + $0xa0] sm:$0xff]  ;;  %v245_v41 = vld [vmem:[%s1570_s30 + $0xb0] sm:$0xff]  ;;  %v313_v43 = vpack.c.bf16 %v277_v39, %v275_v38  ;;  %586 = vmatpush1.bf16.msra.mxu0 %v1477_v52  ;;  %v234_v18 = vld [vmem:[%s1570_s30 + $0x58] sm:$0xff] }
  0x1c   : > { %321 = vxpose.xlu1.c.b16.cont [3/8] %v291_v25, 128  ;;  %v279_v44 = vld [vmem:[%s1570_s30 + $0x1c0] sm:$0xff]  ;;  %v297_v46 = vpack.c.bf16 %v245_v41, %v243_v40  ;;  %v281_v47 = vld [vmem:[%s1570_s30 + $0x1d0] sm:$0xff]  ;;  %587 = vmatprep.subr.bf16.mxu0 %v1478_v57  ;;  %v292_v22 = vpack.c.bf16 %v234_v18, %v232_v17  ;;  %v268_v23 = vld [vmem:[%s1570_s30 + $0x168] sm:$0xff] }
  0x1d   : > { %v247_v48 = vld [vmem:[%s1570_s30 + $0xc0] sm:$0xff]  ;;  %v249_v49 = vld [vmem:[%s1570_s30 + $0xd0] sm:$0xff]  ;;  %v315_v53 = vpack.c.bf16 %v281_v47, %v279_v44  ;;  %1441 = vmatpush1.bf16.msra.mxu1 %v1477_v52  ;;  %v270_v24 = vld [vmem:[%s1570_s30 + $0x178] sm:$0xff] }
  0x1e   : > { %v283_v51 = vld [vmem:[%s1570_s30 + $0x1e0] sm:$0xff]  ;;  %v285_v54 = vld [vmem:[%s1570_s30 + $0x1f0] sm:$0xff]  ;;  %v299_v55 = vpack.c.bf16 %v249_v49, %v247_v48  ;;  %1426 = vmatprep.subr.bf16.mxu1 %v1478_v57  ;;  %v236_v25 = vld [vmem:[%s1570_s30 + $0x68] sm:$0xff]  ;;  %v310_v29 = vpack.c.bf16 %v270_v24, %v268_v23 }
  0x1f   : > { %354 = vxpose.xlu0.c.b16.cont [4/8] %v309_v30, 128  ;;  %v251_v56 = vld [vmem:[%s1570_s30 + $0xe0] sm:$0xff]  ;;  %v253_v58 = vld [vmem:[%s1570_s30 + $0xf0] sm:$0xff]  ;;  %v317_v61 = vpack.c.bf16 %v285_v54, %v283_v51  ;;  %588 = vmatpush1.bf16.msra.mxu0 %v1480_v59  ;;  %v238_v26 = vld [vmem:[%s1570_s30 + $0x78] sm:$0xff] }
  0x20   : > { %322 = vxpose.xlu1.c.b16.cont [4/8] %v293_v31, 128  ;;  %v301_v63 = vpack.c.bf16 %v253_v58, %v251_v56  ;;  %589 = vmatprep.subr.bf16.mxu0 %v1481_v60  ;;  %v1486_v11 = vld [vmem:[%s1862_s1 + $0x80] ss:$8 sps:$4 sm:$0xff]   ;;  %v1487_v12 = vld [vmem:[%s1862_s1 + $0x94] ss:$8 sps:$4 sm:$0xff]   ;;  %v1489_v19 = vld [vmem:[%s1862_s1 + $0x90] ss:$8 sps:$4 sm:$0xff]   ;;  %v294_v30 = vpack.c.bf16 %v238_v26, %v236_v25 }
  0x21   : > { %1442 = vmatpush1.bf16.msra.mxu1 %v1480_v59  ;;  %v1490_v20 = vld [vmem:[%s1862_s1 + $0xa4] ss:$8 sps:$4 sm:$0xff]   ;;  %v1492_v27 = vld [vmem:[%s1862_s1 + $0xa0] ss:$8 sps:$4 sm:$0xff]   ;;  %v1493_v28 = vld [vmem:[%s1862_s1 + $0xb4] ss:$8 sps:$4 sm:$0xff]  }
  0x22   : > { %1427 = vmatprep.subr.bf16.mxu1 %v1481_v60  ;;  %v272_v31 = vld [vmem:[%s1570_s30 + $0x188] sm:$0xff]  ;;  %v274_v32 = vld [vmem:[%s1570_s30 + $0x198] sm:$0xff] }
  0x23   : > { %355 = vxpose.xlu0.c.b16.cont [5/8] %v311_v36, 128  ;;  %590 = vmatpush1.bf16.msra.mxu0 %v1483_v3  ;;  %v240_v33 = vld [vmem:[%s1570_s30 + $0x88] sm:$0xff]  ;;  %v242_v34 = vld [vmem:[%s1570_s30 + $0x98] sm:$0xff] }
  0x24   : > { %323 = vxpose.xlu1.c.b16.cont [5/8] %v295_v37, 128  ;;  %591 = vmatprep.subr.bf16.mxu0 %v1484_v4  ;;  %v1495_v35 = vld [vmem:[%s1862_s1 + $0xb0] ss:$8 sps:$4 sm:$0xff]   ;;  %v1496_v36 = vld [vmem:[%s1862_s1 + $0xc4] ss:$8 sps:$4 sm:$0xff]   ;;  %v312_v37 = vpack.c.bf16 %v274_v32, %v272_v31  ;;  %v296_v38 = vpack.c.bf16 %v242_v34, %v240_v33  ;;  %v1499_v44 = vld [vmem:[%s1862_s1 + $0xd4] ss:$8 sps:$4 sm:$0xff]  }
  0x25   : > { %1443 = vmatpush1.bf16.msra.mxu1 %v1483_v3  ;;  %v276_v39 = vld [vmem:[%s1570_s30 + $0x1a8] sm:$0xff]  ;;  %v278_v40 = vld [vmem:[%s1570_s30 + $0x1b8] sm:$0xff] }
  0x26   : > { %1428 = vmatprep.subr.bf16.mxu1 %v1484_v4  ;;  %v244_v41 = vld [vmem:[%s1570_s30 + $0xa8] sm:$0xff]  ;;  %v246_v42 = vld [vmem:[%s1570_s30 + $0xb8] sm:$0xff]  ;;  %v314_v45 = vpack.c.bf16 %v278_v40, %v276_v39 }
  0x27   : > { %356 = vxpose.xlu0.c.b16.cont [6/8] %v313_v43, 128  ;;  %592 = vmatpush1.bf16.msra.mxu0 %v1486_v11  ;;  %v1498_v43 = vld [vmem:[%s1862_s1 + $0xc0] ss:$8 sps:$4 sm:$0xff]   ;;  %v282_v48 = vld [vmem:[%s1570_s30 + $0x1d8] sm:$0xff]  ;;  %v1502_v52 = vld [vmem:[%s1862_s1 + $0xe4] ss:$8 sps:$4 sm:$0xff]  }
  0x28   : > { %324 = vxpose.xlu1.c.b16.cont [6/8] %v297_v46, 128  ;;  %593 = vmatprep.subr.bf16.mxu0 %v1487_v12  ;;  %v298_v46 = vpack.c.bf16 %v246_v42, %v244_v41  ;;  %v280_v47 = vld [vmem:[%s1570_s30 + $0x1c8] sm:$0xff]  ;;  %v250_v50 = vld [vmem:[%s1570_s30 + $0xd8] sm:$0xff] }
  0x29   : > { %1444 = vmatpush1.bf16.msra.mxu1 %v1486_v11  ;;  %v248_v49 = vld [vmem:[%s1570_s30 + $0xc8] sm:$0xff]  ;;  %v1501_v51 = vld [vmem:[%s1862_s1 + $0xd0] ss:$8 sps:$4 sm:$0xff]   ;;  %v1505_v60 = vld [vmem:[%s1862_s1 + $0xf4] ss:$8 sps:$4 sm:$0xff]  }
  0x2a   : > { %1429 = vmatprep.subr.bf16.mxu1 %v1487_v12  ;;  %v300_v54 = vpack.c.bf16 %v250_v50, %v248_v49  ;;  %v286_v56 = vld [vmem:[%s1570_s30 + $0x1f8] sm:$0xff]  ;;  %v252_v57 = vld [vmem:[%s1570_s30 + $0xe8] sm:$0xff] }
  0x2b   : > { %357 = vxpose.xlu0.c.b16.cont [7/8] %v315_v53, 128  ;;  %594 = vmatpush1.bf16.msra.mxu0 %v1489_v19  ;;  %v316_v53 = vpack.c.bf16 %v282_v48, %v280_v47  ;;  %v254_v58 = vld [vmem:[%s1570_s30 + $0xf8] sm:$0xff]  ;;  %v1504_v59 = vld [vmem:[%s1862_s1 + $0xe0] ss:$8 sps:$4 sm:$0xff]  }
  0x2c   : > { %325 = vxpose.xlu1.c.b16.cont [7/8] %v299_v55, 128  ;;  %595 = vmatprep.subr.bf16.mxu0 %v1490_v20  ;;  %v284_v55 = vld [vmem:[%s1570_s30 + $0x1e8] sm:$0xff]  ;;  %v302_v62 = vpack.c.bf16 %v254_v58, %v252_v57  ;;  %s1385_s30 = sshll.u32 %s1867_s16, 8 }
  0x2d   : > { %1445 = vmatpush1.bf16.msra.mxu1 %v1489_v19  ;;  %s1721_s17 = scalar_lea.vmem %s1863_s2, %s1385_s30 }
  0x2e   : > { %1430 = vmatprep.subr.bf16.mxu1 %v1490_v20 }
  0x2f   : > { %358 = vxpose.xlu0.c.b16.end [8/8] %v317_v61, 128  ;;  %596 = vmatpush1.bf16.msra.mxu0 %v1492_v27  ;;  %v318_v61 = vpack.c.bf16 %v286_v56, %v284_v55 }
  0x30   : > { %326 = vxpose.xlu1.c.b16.end [8/8] %v301_v63, 128  ;;  %597 = vmatprep.subr.bf16.mxu0 %v1493_v28  ;;  %v1507_v63 = vld [vmem:[%s1862_s1 + $0xf0] ss:$8 sps:$4 sm:$0xff]  }
  0x31   : > { %1446 = vmatpush1.bf16.msra.mxu1 %v1492_v27 }
  0x32   : > { %1431 = vmatprep.subr.bf16.mxu1 %v1493_v28 }
  0x33   : > { %367 = vxpose.xlu0.c.b16.start [1/8] %v304_v5, 128  ;;  %598 = vmatpush1.bf16.msra.mxu0 %v1495_v35 }
  0x34   : > { %335 = vxpose.xlu1.c.b16.start [1/8] %v288_v7, 128  ;;  %599 = vmatprep.subr.bf16.mxu0 %v1496_v36 }
  0x35   : > { %1447 = vmatpush1.bf16.msra.mxu1 %v1495_v35 }
  0x36   : > { %1432 = vmatprep.subr.bf16.mxu1 %v1496_v36 }
  0x37   : > { %368 = vxpose.xlu0.c.b16.cont [2/8] %v306_v13, 128  ;;  %600 = vmatpush1.bf16.msra.mxu0 %v1498_v43 }
  0x38   : > { %336 = vxpose.xlu1.c.b16.cont [2/8] %v290_v14, 128  ;;  %601 = vmatprep.subr.bf16.mxu0 %v1499_v44 }
  0x39   : > { %1448 = vmatpush1.bf16.msra.mxu1 %v1498_v43 }
  0x3a   : > { %1433 = vmatprep.subr.bf16.mxu1 %v1499_v44 }
  0x3b   : > { %369 = vxpose.xlu0.c.b16.cont [3/8] %v308_v21, 128  ;;  %602 = vmatpush1.bf16.msra.mxu0 %v1501_v51 }
  0x3c   : > { %337 = vxpose.xlu1.c.b16.cont [3/8] %v292_v22, 128  ;;  %603 = vmatprep.subr.bf16.mxu0 %v1502_v52 }
  0x3d   : > { %1449 = vmatpush1.bf16.msra.mxu1 %v1501_v51 }
  0x3e   : > { %1434 = vmatprep.subr.bf16.mxu1 %v1502_v52 }
  0x3f   : > { %370 = vxpose.xlu0.c.b16.cont [4/8] %v310_v29, 128  ;;  %604 = vmatpush1.bf16.msra.mxu0 %v1504_v59 }
  0x40   : > { %338 = vxpose.xlu1.c.b16.cont [4/8] %v294_v30, 128  ;;  %605 = vmatprep.subr.bf16.mxu0 %v1505_v60 }
  0x41   : > { %1450 = vmatpush1.bf16.msra.mxu1 %v1504_v59 }
  0x42   : > { %1435 = vmatprep.subr.bf16.mxu1 %v1505_v60 }
  0x43   : > { %371 = vxpose.xlu0.c.b16.cont [5/8] %v312_v37, 128  ;;  %606 = vmatpush1.bf16.msra.mxu0 %v1507_v63 }
  0x44   : > { %339 = vxpose.xlu1.c.b16.cont [5/8] %v296_v38, 128 }
  0x45   : > { %1451 = vmatpush1.bf16.msra.mxu1 %v1507_v63 }
  0x47   : > { %372 = vxpose.xlu0.c.b16.cont [6/8] %v314_v45, 128 }
  0x48   : > { %340 = vxpose.xlu1.c.b16.cont [6/8] %v298_v46, 128 }
  0x4b   : > { %373 = vxpose.xlu0.c.b16.cont [7/8] %v316_v53, 128 }
  0x4c   : > { %341 = vxpose.xlu1.c.b16.cont [7/8] %v300_v54, 128 }
  0x4f   : > { %374 = vxpose.xlu0.c.b16.end [8/8] %v318_v61, 128 }
  0x50   : > { %342 = vxpose.xlu1.c.b16.end [8/8] %v302_v62, 128 }
  0x79   : > { %v359_v0 = vpop.trf.xlu0 }
  0x7a   : > { %607 = vmatprep.mubr.bf16.mxu0 %v359_v0  ;;  %v327_v1 = vpop.trf.xlu1 }
  0x7b   : > { %608 = vmatmul.mubr.bf16.vlgmr.msra.gmra.mrb[0].mxu0 %v327_v1 }
  0x7d   : > { %v360_v2 = vpop.trf.xlu0 }
  0x7e   : > { %617 = vmatprep.mubr.bf16.mxu0 %v360_v2  ;;  %v328_v3 = vpop.trf.xlu1 }
  0x81   : > { %v361_v4 = vpop.trf.xlu0 }
  0x82   : > { %v329_v5 = vpop.trf.xlu1 }
  0x83   : > { %618 = vmatmul.mubr.bf16.gmra.mrb[4].mxu0 %v328_v3 }
  0x84   : > { %627 = vmatprep.mubr.bf16.mxu0 %v361_v4 }
  0x85   : > { %v362_v6 = vpop.trf.xlu0 }
  0x86   : > { %v330_v7 = vpop.trf.xlu1 }
  0x89   : > { %v363_v8 = vpop.trf.xlu0 }
  0x8a   : > { %v331_v9 = vpop.trf.xlu1 }
  0x8b   : > { %628 = vmatmul.mubr.bf16.gmra.mrb[8].mxu0 %v329_v5 }
  0x8c   : > { %637 = vmatprep.mubr.bf16.mxu0 %v362_v6 }
  0x8d   : > { %v364_v10 = vpop.trf.xlu0 }
  0x8e   : > { %v332_v11 = vpop.trf.xlu1 }
  0x91   : > { %v365_v12 = vpop.trf.xlu0 }
  0x92   : > { %v333_v13 = vpop.trf.xlu1 }
  0x93   : > { %638 = vmatmul.mubr.bf16.gmra.mrb[12].mxu0 %v330_v7 }
  0x94   : > { %647 = vmatprep.mubr.bf16.mxu0 %v363_v8 }
  0x95   : > { %v366_v14 = vpop.trf.xlu0 }
  0x96   : > { %v334_v15 = vpop.trf.xlu1 }
  0x99   : > { %v375_v16 = vpop.trf.xlu0 }
  0x9a   : > { %687 = vmatprep.mubr.bf16.mxu1 %v375_v16  ;;  %v343_v17 = vpop.trf.xlu1 }
  0x9b   : > { %648 = vmatmul.mubr.bf16.gmra.mrb[16].mxu0 %v331_v9  ;;  %688 = vmatmul.mubr.bf16.vlgmr.msra.gmra.mrb[0].mxu1 %v343_v17 }
  0x9c   : > { %657 = vmatprep.mubr.bf16.mxu0 %v364_v10 }
  0x9d   : > { %v376_v18 = vpop.trf.xlu0 }
  0x9e   : > { %697 = vmatprep.mubr.bf16.mxu1 %v376_v18  ;;  %v344_v19 = vpop.trf.xlu1 }
  0xa1   : > { %v377_v20 = vpop.trf.xlu0 }
  0xa2   : > { %v345_v21 = vpop.trf.xlu1 }
  0xa3   : > { %658 = vmatmul.mubr.bf16.gmra.mrb[20].mxu0 %v332_v11  ;;  %698 = vmatmul.mubr.bf16.gmra.mrb[4].mxu1 %v344_v19 }
  0xa4   : > { %667 = vmatprep.mubr.bf16.mxu0 %v365_v12  ;;  %707 = vmatprep.mubr.bf16.mxu1 %v377_v20 }
  0xa5   : > { %v378_v22 = vpop.trf.xlu0 }
  0xa6   : > { %v346_v23 = vpop.trf.xlu1 }
  0xa9   : > { %v379_v24 = vpop.trf.xlu0 }
  0xaa   : > { %v347_v25 = vpop.trf.xlu1 }
  0xab   : > { %668 = vmatmul.mubr.bf16.gmra.mrb[24].mxu0 %v333_v13  ;;  %708 = vmatmul.mubr.bf16.gmra.mrb[8].mxu1 %v345_v21 }
  0xac   : > { %677 = vmatprep.mubr.bf16.mxu0 %v366_v14  ;;  %717 = vmatprep.mubr.bf16.mxu1 %v378_v22 }
  0xad   : > { %v380_v26 = vpop.trf.xlu0 }
  0xae   : > { %v348_v27 = vpop.trf.xlu1 }
  0xb1   : > { %v381_v28 = vpop.trf.xlu0 }
  0xb2   : > { %v349_v29 = vpop.trf.xlu1 }
  0xb3   : > { %678 = vmatmul.mubr.bf16.gmra.mrb[28].mxu0 %v334_v15  ;;  %718 = vmatmul.mubr.bf16.gmra.mrb[12].mxu1 %v346_v23 }
  0xb4   : > { %727 = vmatprep.mubr.bf16.mxu1 %v379_v24 }
  0xb5   : > { %v382_v30 = vpop.trf.xlu0 }
  0xb6   : > { %v350_v31 = vpop.trf.xlu1 }
  0xbb   : > { %728 = vmatmul.mubr.bf16.gmra.mrb[16].mxu1 %v347_v25 }
  0xbc   : > { %737 = vmatprep.mubr.bf16.mxu1 %v380_v26 }
  0xc3   : > { %738 = vmatmul.mubr.bf16.gmra.mrb[20].mxu1 %v348_v27 }
  0xc4   : > { %747 = vmatprep.mubr.bf16.mxu1 %v381_v28 }
  0xcb   : > { %748 = vmatmul.mubr.bf16.gmra.mrb[24].mxu1 %v349_v29 }
  0xcc   : > { %757 = vmatprep.mubr.bf16.mxu1 %v382_v30 }
  0xd3   : > { %758 = vmatmul.mubr.bf16.gmra.mrb[28].mxu1 %v350_v31 }
 0x14e   : > { %v609_v32 = vpop.f32.mrb[0].mxu0 }
 0x14f   : > { %v611_v33 = vpop.f32.mrb[1].mxu0  ;;  %v1056_v36 = vmul.f32 %v609_v32, %v609_v32 }
 0x150   : > { %v1388_v34 = vpack.c.bf16 %v611_v33, %v609_v32  ;;  %v613_v35 = vpop.f32.mrb[2].mxu0  ;;  %v1057_v40 = vmul.f32 %v611_v33, %v611_v33 }
 0x151   : > { %v992_v37 = vadd.f32 %v613_v35, %v609_v32  ;;  %v1058_v38 = vmul.f32 %v613_v35, %v613_v35  ;;  %v615_v39 = vpop.f32.mrb[3].mxu0 }
 0x152   : > { %960 = vst [vmem:[%s1721_s17] sm:$0xff] %v1388_v34  ;;  %v1389_v41 = vpack.c.bf16 %v615_v39, %v613_v35  ;;  %v1023_v42 = vadd.f32 %v615_v39, %v611_v33  ;;  %v1059_v43 = vmul.f32 %v615_v39, %v615_v39 }
 0x153   : > { %v1120_v44 = vadd.f32 %v1058_v38, %v1056_v36 }
 0x154   : > { %961 = vst [vmem:[%s1721_s17 + $0x8] sm:$0xff] %v1389_v41  ;;  %v1151_v45 = vadd.f32 %v1059_v43, %v1057_v40 }
 0x156   : > { %v619_v46 = vpop.f32.mrb[4].mxu0 }
 0x157   : > { %v993_v47 = vadd.f32 %v992_v37, %v619_v46  ;;  %v1060_v48 = vmul.f32 %v619_v46, %v619_v46  ;;  %v621_v49 = vpop.f32.mrb[5].mxu0 }
 0x158   : > { %v1390_v50 = vpack.c.bf16 %v621_v49, %v619_v46  ;;  %v1024_v51 = vadd.f32 %v1023_v42, %v621_v49  ;;  %v1061_v52 = vmul.f32 %v621_v49, %v621_v49  ;;  %v623_v53 = vpop.f32.mrb[6].mxu0 }
 0x159   : > { %v1121_v54 = vadd.f32 %v1120_v44, %v1060_v48  ;;  %v994_v55 = vadd.f32 %v993_v47, %v623_v53  ;;  %v1062_v56 = vmul.f32 %v623_v53, %v623_v53  ;;  %v625_v57 = vpop.f32.mrb[7].mxu0 }
 0x15a   : > { %962 = vst [vmem:[%s1721_s17 + $0x10] sm:$0xff] %v1390_v50  ;;  %v1152_v58 = vadd.f32 %v1151_v45, %v1061_v52  ;;  %v1391_v59 = vpack.c.bf16 %v625_v57, %v623_v53  ;;  %v1025_v60 = vadd.f32 %v1024_v51, %v625_v57  ;;  %v1063_v61 = vmul.f32 %v625_v57, %v625_v57 }
 0x15b   : > { %v1122_v62 = vadd.f32 %v1121_v54, %v1062_v56 }
 0x15c   : > { %963 = vst [vmem:[%s1721_s17 + $0x18] sm:$0xff] %v1391_v59  ;;  %v1153_v63 = vadd.f32 %v1152_v58, %v1063_v61 }
 0x15e   : > { %v629_v0 = vpop.f32.mrb[8].mxu0 }
 0x15f   : > { %v995_v1 = vadd.f32 %v994_v55, %v629_v0  ;;  %v1064_v2 = vmul.f32 %v629_v0, %v629_v0  ;;  %v631_v3 = vpop.f32.mrb[9].mxu0 }
 0x160   : > { %v1392_v4 = vpack.c.bf16 %v631_v3, %v629_v0  ;;  %v1026_v5 = vadd.f32 %v1025_v60, %v631_v3  ;;  %v1065_v6 = vmul.f32 %v631_v3, %v631_v3  ;;  %v633_v7 = vpop.f32.mrb[10].mxu0 }
 0x161   : > { %v1123_v8 = vadd.f32 %v1122_v62, %v1064_v2  ;;  %v996_v9 = vadd.f32 %v995_v1, %v633_v7  ;;  %v1066_v10 = vmul.f32 %v633_v7, %v633_v7  ;;  %v635_v11 = vpop.f32.mrb[11].mxu0 }
 0x162   : > { %964 = vst [vmem:[%s1721_s17 + $0x20] sm:$0xff] %v1392_v4  ;;  %v1154_v12 = vadd.f32 %v1153_v63, %v1065_v6  ;;  %v1393_v13 = vpack.c.bf16 %v635_v11, %v633_v7  ;;  %v1027_v14 = vadd.f32 %v1026_v5, %v635_v11  ;;  %v1067_v15 = vmul.f32 %v635_v11, %v635_v11 }
 0x163   : > { %v1124_v16 = vadd.f32 %v1123_v8, %v1066_v10 }
 0x164   : > { %965 = vst [vmem:[%s1721_s17 + $0x28] sm:$0xff] %v1393_v13  ;;  %v1155_v17 = vadd.f32 %v1154_v12, %v1067_v15 }
 0x166   : > { %v639_v18 = vpop.f32.mrb[12].mxu0 }
 0x167   : > { %v997_v19 = vadd.f32 %v996_v9, %v639_v18  ;;  %v1068_v20 = vmul.f32 %v639_v18, %v639_v18  ;;  %v641_v21 = vpop.f32.mrb[13].mxu0 }
 0x168   : > { %v1394_v22 = vpack.c.bf16 %v641_v21, %v639_v18  ;;  %v1028_v23 = vadd.f32 %v1027_v14, %v641_v21  ;;  %v1069_v24 = vmul.f32 %v641_v21, %v641_v21  ;;  %v643_v25 = vpop.f32.mrb[14].mxu0 }
 0x169   : > { %v1125_v26 = vadd.f32 %v1124_v16, %v1068_v20  ;;  %v998_v27 = vadd.f32 %v997_v19, %v643_v25  ;;  %v1070_v28 = vmul.f32 %v643_v25, %v643_v25  ;;  %v645_v29 = vpop.f32.mrb[15].mxu0 }
 0x16a   : > { %966 = vst [vmem:[%s1721_s17 + $0x30] sm:$0xff] %v1394_v22  ;;  %v1156_v30 = vadd.f32 %v1155_v17, %v1069_v24  ;;  %v1395_v31 = vpack.c.bf16 %v645_v29, %v643_v25  ;;  %v1029_v32 = vadd.f32 %v1028_v23, %v645_v29  ;;  %v1071_v33 = vmul.f32 %v645_v29, %v645_v29 }
 0x16b   : > { %v1126_v34 = vadd.f32 %v1125_v26, %v1070_v28 }
 0x16c   : > { %967 = vst [vmem:[%s1721_s17 + $0x38] sm:$0xff] %v1395_v31  ;;  %v1157_v35 = vadd.f32 %v1156_v30, %v1071_v33 }
 0x16e   : > { %v649_v36 = vpop.f32.mrb[16].mxu0  ;;  %v1731_v37 = vpop.f32.mrb[0].mxu1 }
 0x16f   : > { %v999_v38 = vadd.f32 %v998_v27, %v649_v36  ;;  %v1072_v39 = vmul.f32 %v649_v36, %v649_v36  ;;  %v651_v40 = vpop.f32.mrb[17].mxu0  ;;  %v1733_v41 = vpop.f32.mrb[1].mxu1 }
 0x170   : > { %v1396_v42 = vpack.c.bf16 %v651_v40, %v649_v36  ;;  %v1030_v43 = vadd.f32 %v1029_v32, %v651_v40  ;;  %v1073_v44 = vmul.f32 %v651_v40, %v651_v40  ;;  %v1404_v45 = vpack.c.bf16 %v1733_v41, %v1731_v37  ;;  %v653_v46 = vpop.f32.mrb[18].mxu0  ;;  %v1737_v47 = vpop.f32.mrb[2].mxu1 }
 0x171   : > { %v1127_v48 = vadd.f32 %v1126_v34, %v1072_v39  ;;  %v1000_v49 = vadd.f32 %v999_v38, %v653_v46  ;;  %v1074_v50 = vmul.f32 %v653_v46, %v653_v46  ;;  %v655_v51 = vpop.f32.mrb[19].mxu0  ;;  %v1739_v52 = vpop.f32.mrb[3].mxu1 }
 0x172   : > { %968 = vst [vmem:[%s1721_s17 + $0x40] sm:$0xff] %v1396_v42  ;;  %v1158_v53 = vadd.f32 %v1157_v35, %v1073_v44  ;;  %976 = vst [vmem:[%s1721_s17 + $0x80] sm:$0xff] %v1404_v45  ;;  %v1397_v54 = vpack.c.bf16 %v655_v51, %v653_v46  ;;  %v1031_v55 = vadd.f32 %v1030_v43, %v655_v51 }
 0x173   : > { %v1128_v56 = vadd.f32 %v1127_v48, %v1074_v50  ;;  %v1075_v57 = vmul.f32 %v655_v51, %v655_v51  ;;  %v1405_v58 = vpack.c.bf16 %v1739_v52, %v1737_v47 }
 0x174   : > { %969 = vst [vmem:[%s1721_s17 + $0x48] sm:$0xff] %v1397_v54 }
 0x175   : > { %v1159_v59 = vadd.f32 %v1158_v53, %v1075_v57  ;;  %977 = vst [vmem:[%s1721_s17 + $0x88] sm:$0xff] %v1405_v58 }
 0x176   : > { %v659_v60 = vpop.f32.mrb[20].mxu0  ;;  %v1747_v61 = vpop.f32.mrb[4].mxu1 }
 0x177   : > { %v1001_v62 = vadd.f32 %v1000_v49, %v659_v60  ;;  %v1076_v63 = vmul.f32 %v659_v60, %v659_v60  ;;  %v661_v0 = vpop.f32.mrb[21].mxu0  ;;  %v1749_v1 = vpop.f32.mrb[5].mxu1 }
 0x178   : > { %v1398_v2 = vpack.c.bf16 %v661_v0, %v659_v60  ;;  %v1032_v3 = vadd.f32 %v1031_v55, %v661_v0  ;;  %v1077_v4 = vmul.f32 %v661_v0, %v661_v0  ;;  %v1406_v5 = vpack.c.bf16 %v1749_v1, %v1747_v61  ;;  %v663_v6 = vpop.f32.mrb[22].mxu0  ;;  %v1753_v7 = vpop.f32.mrb[6].mxu1 }
 0x179   : > { %v1129_v8 = vadd.f32 %v1128_v56, %v1076_v63  ;;  %v1002_v9 = vadd.f32 %v1001_v62, %v663_v6  ;;  %v1078_v10 = vmul.f32 %v663_v6, %v663_v6  ;;  %v665_v11 = vpop.f32.mrb[23].mxu0  ;;  %v1755_v12 = vpop.f32.mrb[7].mxu1 }
 0x17a   : > { %970 = vst [vmem:[%s1721_s17 + $0x50] sm:$0xff] %v1398_v2  ;;  %v1160_v13 = vadd.f32 %v1159_v59, %v1077_v4  ;;  %978 = vst [vmem:[%s1721_s17 + $0x90] sm:$0xff] %v1406_v5  ;;  %v1399_v14 = vpack.c.bf16 %v665_v11, %v663_v6  ;;  %v1033_v15 = vadd.f32 %v1032_v3, %v665_v11 }
 0x17b   : > { %v1130_v16 = vadd.f32 %v1129_v8, %v1078_v10  ;;  %v1079_v17 = vmul.f32 %v665_v11, %v665_v11  ;;  %v1407_v18 = vpack.c.bf16 %v1755_v12, %v1753_v7  ;;  %v1088_v3 = vmul.f32 %v1731_v37, %v1731_v37 }
 0x17c   : > { %971 = vst [vmem:[%s1721_s17 + $0x58] sm:$0xff] %v1399_v14 }
 0x17d   : > { %v1161_v19 = vadd.f32 %v1160_v13, %v1079_v17  ;;  %979 = vst [vmem:[%s1721_s17 + $0x98] sm:$0xff] %v1407_v18  ;;  %v1089_v13 = vmul.f32 %v1733_v41, %v1733_v41 }
 0x17e   : > { %v669_v20 = vpop.f32.mrb[24].mxu0  ;;  %v1763_v21 = vpop.f32.mrb[8].mxu1 }
 0x17f   : > { %v1003_v22 = vadd.f32 %v1002_v9, %v669_v20  ;;  %v1080_v23 = vmul.f32 %v669_v20, %v669_v20  ;;  %v671_v24 = vpop.f32.mrb[25].mxu0  ;;  %v1765_v25 = vpop.f32.mrb[9].mxu1 }
 0x180   : > { %v1400_v26 = vpack.c.bf16 %v671_v24, %v669_v20  ;;  %v1034_v27 = vadd.f32 %v1033_v15, %v671_v24  ;;  %v1081_v28 = vmul.f32 %v671_v24, %v671_v24  ;;  %v1408_v29 = vpack.c.bf16 %v1765_v25, %v1763_v21  ;;  %v673_v30 = vpop.f32.mrb[26].mxu0  ;;  %v1769_v31 = vpop.f32.mrb[10].mxu1 }
 0x181   : > { %v1131_v32 = vadd.f32 %v1130_v16, %v1080_v23  ;;  %v1004_v33 = vadd.f32 %v1003_v22, %v673_v30  ;;  %v1082_v34 = vmul.f32 %v673_v30, %v673_v30  ;;  %v675_v35 = vpop.f32.mrb[27].mxu0  ;;  %v1771_v36 = vpop.f32.mrb[11].mxu1  ;;  %v1090_v15 = vmul.f32 %v1737_v47, %v1737_v47 }
 0x182   : > { %972 = vst [vmem:[%s1721_s17 + $0x60] sm:$0xff] %v1400_v26  ;;  %v1162_v38 = vadd.f32 %v1161_v19, %v1081_v28  ;;  %980 = vst [vmem:[%s1721_s17 + $0xa0] sm:$0xff] %v1408_v29  ;;  %v1401_v39 = vpack.c.bf16 %v675_v35, %v673_v30  ;;  %v1035_v40 = vadd.f32 %v1034_v27, %v675_v35 }
 0x183   : > { %v1132_v42 = vadd.f32 %v1131_v32, %v1082_v34  ;;  %v1083_v43 = vmul.f32 %v675_v35, %v675_v35  ;;  %v1409_v44 = vpack.c.bf16 %v1771_v36, %v1769_v31  ;;  %v1092_v22 = vmul.f32 %v1747_v61, %v1747_v61 }
 0x184   : > { %973 = vst [vmem:[%s1721_s17 + $0x68] sm:$0xff] %v1401_v39 }
 0x185   : > { %v1163_v45 = vadd.f32 %v1162_v38, %v1083_v43  ;;  %981 = vst [vmem:[%s1721_s17 + $0xa8] sm:$0xff] %v1409_v44  ;;  %v1097_v43 = vmul.f32 %v1765_v25, %v1765_v25  ;;  %v1098_v44 = vmul.f32 %v1769_v31, %v1769_v31 }
 0x186   : > { %v679_v46 = vpop.f32.mrb[28].mxu0  ;;  %v1779_v48 = vpop.f32.mrb[12].mxu1 }
 0x187   : > { %v1005_v49 = vadd.f32 %v1004_v33, %v679_v46  ;;  %v1084_v50 = vmul.f32 %v679_v46, %v679_v46  ;;  %v681_v51 = vpop.f32.mrb[29].mxu0  ;;  %v1781_v53 = vpop.f32.mrb[13].mxu1 }
 0x188   : > { %v1402_v54 = vpack.c.bf16 %v681_v51, %v679_v46  ;;  %v1036_v55 = vadd.f32 %v1035_v40, %v681_v51  ;;  %v1085_v56 = vmul.f32 %v681_v51, %v681_v51  ;;  %v1410_v57 = vpack.c.bf16 %v1781_v53, %v1779_v48  ;;  %v683_v58 = vpop.f32.mrb[30].mxu0  ;;  %v1785_v59 = vpop.f32.mrb[14].mxu1 }
 0x189   : > { %v1133_v60 = vadd.f32 %v1132_v42, %v1084_v50  ;;  %v1006_v62 = vadd.f32 %v1005_v49, %v683_v58  ;;  %v1086_v63 = vmul.f32 %v683_v58, %v683_v58  ;;  %v685_v0 = vpop.f32.mrb[31].mxu0  ;;  %v1787_v2 = vpop.f32.mrb[15].mxu1  ;;  %v1099_v49 = vmul.f32 %v1771_v36, %v1771_v36 }
 0x18a   : > { %974 = vst [vmem:[%s1721_s17 + $0x70] sm:$0xff] %v1402_v54  ;;  %v1164_v4 = vadd.f32 %v1163_v45, %v1085_v56  ;;  %982 = vst [vmem:[%s1721_s17 + $0xb0] sm:$0xff] %v1410_v57  ;;  %v1403_v5 = vpack.c.bf16 %v685_v0, %v683_v58  ;;  %v1037_v6 = vadd.f32 %v1036_v55, %v685_v0 }
 0x18b   : > { %v1007_v8 = vadd.f32 %v1006_v62, %v1731_v37  ;;  %v1134_v9 = vadd.f32 %v1133_v60, %v1086_v63  ;;  %v1087_v10 = vmul.f32 %v685_v0, %v685_v0  ;;  %v1411_v11 = vpack.c.bf16 %v1787_v2, %v1785_v59 }
 0x18c   : > { %975 = vst [vmem:[%s1721_s17 + $0x78] sm:$0xff] %v1403_v5  ;;  %v1038_v14 = vadd.f32 %v1037_v6, %v1733_v41  ;;  %v1091_v37 = vmul.f32 %v1739_v52, %v1739_v52  ;;  %v1100_v51 = vmul.f32 %v1779_v48, %v1779_v48  ;;  %v1102_v62 = vmul.f32 %v1785_v59, %v1785_v59 }
 0x18d   : > { %v1008_v16 = vadd.f32 %v1007_v8, %v1737_v47  ;;  %v1135_v17 = vadd.f32 %v1134_v9, %v1088_v3  ;;  %v1165_v18 = vadd.f32 %v1164_v4, %v1087_v10  ;;  %983 = vst [vmem:[%s1721_s17 + $0xb8] sm:$0xff] %v1411_v11  ;;  %v1093_v47 = vmul.f32 %v1749_v1, %v1749_v1 }
 0x18e   : > { %v1039_v19 = vadd.f32 %v1038_v14, %v1739_v52  ;;  %v729_v20 = vpop.f32.mrb[16].mxu1  ;;  %v1094_v52 = vmul.f32 %v1753_v7, %v1753_v7  ;;  %v1103_v4 = vmul.f32 %v1787_v2, %v1787_v2 }
 0x18f   : > { %v1009_v41 = vadd.f32 %v1008_v16, %v1747_v61  ;;  %v1136_v23 = vadd.f32 %v1135_v17, %v1090_v15  ;;  %v1166_v24 = vadd.f32 %v1165_v18, %v1089_v13  ;;  %v731_v26 = vpop.f32.mrb[17].mxu1  ;;  %v1095_v61 = vmul.f32 %v1755_v12, %v1755_v12 }
 0x190   : > { %v1040_v27 = vadd.f32 %v1039_v19, %v1749_v1  ;;  %v1412_v28 = vpack.c.bf16 %v731_v26, %v729_v20  ;;  %v733_v29 = vpop.f32.mrb[18].mxu1  ;;  %v1096_v1 = vmul.f32 %v1763_v21, %v1763_v21  ;;  %v1104_v9 = vmul.f32 %v729_v20, %v729_v20 }
 0x191   : > { %v1137_v30 = vadd.f32 %v1136_v23, %v1092_v22  ;;  %v1010_v32 = vadd.f32 %v1009_v41, %v1753_v7  ;;  %v1167_v33 = vadd.f32 %v1166_v24, %v1091_v37  ;;  %v735_v34 = vpop.f32.mrb[19].mxu1  ;;  %v1105_v11 = vmul.f32 %v731_v26, %v731_v26 }
 0x192   : > { %v1041_v35 = vadd.f32 %v1040_v27, %v1755_v12  ;;  %984 = vst [vmem:[%s1721_s17 + $0xc0] sm:$0xff] %v1412_v28  ;;  %v1413_v38 = vpack.c.bf16 %v735_v34, %v733_v29  ;;  %v1106_v15 = vmul.f32 %v733_v29, %v733_v29  ;;  %v1107_v17 = vmul.f32 %v735_v34, %v735_v34 }
 0x193   : > { %v1011_v39 = vadd.f32 %v1010_v32, %v1763_v21  ;;  %v1138_v40 = vadd.f32 %v1137_v30, %v1094_v52  ;;  %v1168_v42 = vadd.f32 %v1167_v33, %v1093_v47 }
 0x194   : > { %v1042_v7 = vadd.f32 %v1041_v35, %v1765_v25  ;;  %985 = vst [vmem:[%s1721_s17 + $0xc8] sm:$0xff] %v1413_v38 }
 0x195   : > { %v1012_v12 = vadd.f32 %v1011_v39, %v1769_v31  ;;  %v1139_v45 = vadd.f32 %v1138_v40, %v1096_v1  ;;  %v1169_v46 = vadd.f32 %v1168_v42, %v1095_v61  ;;  %v1101_v31 = vmul.f32 %v1781_v53, %v1781_v53 }
 0x196   : > { %v1043_v21 = vadd.f32 %v1042_v7, %v1771_v36  ;;  %v739_v50 = vpop.f32.mrb[20].mxu1 }
 0x197   : > { %v1013_v25 = vadd.f32 %v1012_v12, %v1779_v48  ;;  %v1140_v54 = vadd.f32 %v1139_v45, %v1098_v44  ;;  %v1170_v55 = vadd.f32 %v1169_v46, %v1097_v43  ;;  %v741_v56 = vpop.f32.mrb[21].mxu1  ;;  %v1108_v22 = vmul.f32 %v739_v50, %v739_v50 }
 0x198   : > { %v1044_v57 = vadd.f32 %v1043_v21, %v1781_v53  ;;  %v1414_v58 = vpack.c.bf16 %v741_v56, %v739_v50  ;;  %v743_v60 = vpop.f32.mrb[22].mxu1  ;;  %v1109_v24 = vmul.f32 %v741_v56, %v741_v56 }
 0x199   : > { %v1014_v36 = vadd.f32 %v1013_v25, %v1785_v59  ;;  %v1141_v63 = vadd.f32 %v1140_v54, %v1100_v51  ;;  %v1171_v0 = vadd.f32 %v1170_v55, %v1099_v49  ;;  %v745_v3 = vpop.f32.mrb[23].mxu1  ;;  %v1110_v52 = vmul.f32 %v743_v60, %v743_v60 }
 0x19a   : > { %v1045_v48 = vadd.f32 %v1044_v57, %v1787_v2  ;;  %986 = vst [vmem:[%s1721_s17 + $0xd0] sm:$0xff] %v1414_v58  ;;  %v1415_v5 = vpack.c.bf16 %v745_v3, %v743_v60  ;;  %v1111_v32 = vmul.f32 %v745_v3, %v745_v3 }
 0x19b   : > { %v1142_v6 = vadd.f32 %v1141_v63, %v1102_v62  ;;  %v1172_v53 = vadd.f32 %v1171_v0, %v1101_v31  ;;  %v1015_v8 = vadd.f32 %v1014_v36, %v729_v20 }
 0x19c   : > { %v1046_v10 = vadd.f32 %v1045_v48, %v731_v26  ;;  %987 = vst [vmem:[%s1721_s17 + $0xd8] sm:$0xff] %v1415_v5 }
 0x19d   : > { %v1173_v13 = vadd.f32 %v1172_v53, %v1103_v4  ;;  %v1143_v14 = vadd.f32 %v1142_v6, %v1104_v9  ;;  %v1016_v59 = vadd.f32 %v1015_v8, %v733_v29 }
 0x19e   : > { %v1047_v16 = vadd.f32 %v1046_v10, %v735_v34  ;;  %v749_v18 = vpop.f32.mrb[24].mxu1 }
 0x19f   : > { %v1174_v37 = vadd.f32 %v1173_v13, %v1105_v11  ;;  %v1144_v19 = vadd.f32 %v1143_v14, %v1106_v15  ;;  %v1017_v2 = vadd.f32 %v1016_v59, %v739_v50  ;;  %v751_v41 = vpop.f32.mrb[25].mxu1  ;;  %v1112_v38 = vmul.f32 %v749_v18, %v749_v18 }
 0x1a0   : > { %v1048_v23 = vadd.f32 %v1047_v16, %v741_v56  ;;  %v1416_v47 = vpack.c.bf16 %v751_v41, %v749_v18  ;;  %v753_v20 = vpop.f32.mrb[26].mxu1  ;;  %v1113_v39 = vmul.f32 %v751_v41, %v751_v41 }
 0x1a1   : > { %v1175_v26 = vadd.f32 %v1174_v37, %v1107_v17  ;;  %v1145_v27 = vadd.f32 %v1144_v19, %v1108_v22  ;;  %v1018_v28 = vadd.f32 %v1017_v2, %v743_v60  ;;  %v755_v30 = vpop.f32.mrb[27].mxu1  ;;  %v1114_v7 = vmul.f32 %v753_v20, %v753_v20 }
 0x1a2   : > { %v1049_v29 = vadd.f32 %v1048_v23, %v745_v3  ;;  %988 = vst [vmem:[%s1721_s17 + $0xe0] sm:$0xff] %v1416_v47  ;;  %v1417_v33 = vpack.c.bf16 %v755_v30, %v753_v20  ;;  %v1115_v12 = vmul.f32 %v755_v30, %v755_v30 }
 0x1a3   : > { %v1176_v34 = vadd.f32 %v1175_v26, %v1109_v24  ;;  %v1146_v61 = vadd.f32 %v1145_v27, %v1110_v52  ;;  %v1019_v35 = vadd.f32 %v1018_v28, %v749_v18 }
 0x1a4   : > { %v1050_v1 = vadd.f32 %v1049_v29, %v751_v41  ;;  %989 = vst [vmem:[%s1721_s17 + $0xe8] sm:$0xff] %v1417_v33 }
 0x1a5   : > { %v1177_v40 = vadd.f32 %v1176_v34, %v1111_v32  ;;  %v1147_v42 = vadd.f32 %v1146_v61, %v1112_v38  ;;  %v1020_v43 = vadd.f32 %v1019_v35, %v753_v20 }
 0x1a6   : > { %v1051_v44 = vadd.f32 %v1050_v1, %v755_v30  ;;  %v759_v45 = vpop.f32.mrb[28].mxu1 }
 0x1a7   : > { %v1178_v46 = vadd.f32 %v1177_v40, %v1113_v39  ;;  %v1148_v49 = vadd.f32 %v1147_v42, %v1114_v7  ;;  %v1021_v21 = vadd.f32 %v1020_v43, %v759_v45  ;;  %v1116_v50 = vmul.f32 %v759_v45, %v759_v45  ;;  %v761_v51 = vpop.f32.mrb[29].mxu1 }
 0x1a8   : > { %v1418_v25 = vpack.c.bf16 %v761_v51, %v759_v45  ;;  %v1052_v54 = vadd.f32 %v1051_v44, %v761_v51  ;;  %v1117_v55 = vmul.f32 %v761_v51, %v761_v51  ;;  %v763_v56 = vpop.f32.mrb[30].mxu1 }
 0x1a9   : > { %v1179_v31 = vadd.f32 %v1178_v46, %v1115_v12  ;;  %v1149_v57 = vadd.f32 %v1148_v49, %v1116_v50  ;;  %v1022_v58 = vadd.f32 %v1021_v21, %v763_v56  ;;  %v1118_v60 = vmul.f32 %v763_v56, %v763_v56  ;;  %v765_v36 = vpop.f32.mrb[31].mxu1 }
 0x1aa   : > { %990 = vst [vmem:[%s1721_s17 + $0xf0] sm:$0xff] %v1418_v25  ;;  %v1419_v62 = vpack.c.bf16 %v765_v36, %v763_v56  ;;  %v1053_v63 = vadd.f32 %v1052_v54, %v765_v36  ;;  %v1119_v0 = vmul.f32 %v765_v36, %v765_v36 }
 0x1ab   : > { %v1180_v3 = vadd.f32 %v1179_v31, %v1117_v55  ;;  %v1150_v48 = vadd.f32 %v1149_v57, %v1118_v60  ;;  %1054 = vst [vmem:[%s217_s21] sm:$0xff] %v1022_v58 }
 0x1ac   : > { %991 = vst [vmem:[%s1721_s17 + $0xf8] sm:$0xff] %v1419_v62  ;;  %1055 = vst [vmem:[%s217_s21 + $0x8] sm:$0xff] %v1053_v63 }
 0x1ad   : > { %v1181_v4 = vadd.f32 %v1180_v3, %v1119_v0  ;;  %1182 = vst [vmem:[%s222_s23] sm:$0xff] %v1150_v48 }
 0x1af   : > { %1183 = vst [vmem:[%s222_s23 + $0x8] sm:$0xff] %v1181_v4 }
 0x1b0 PF: > { %s15_s15 = sadd.s32 1, %s1514_s15  }
 0x1b1   : > { %p12_p4 = scmp.ge.s32.totalorder %s15_s15, 4  }
 0x1b3   :  { %14 = sbr.rel (!%p12_p4) target bundleno = 1 (0x1), region = 82 }

// kernel: resnext_block.4
= control target key start
LH: loop header
LB: loop body
LE: loop exit
PB: predicated region body
PF: predicated region fallthrough
CT: control target
= control target key end

     0   :  { %s7448_s21 = smov 0   ;;  %s7450_s22 = smov 0   ;;  %s9828_s0 = inlined_call_operand.vmem [shape: bf16[2,16,16,256], index: 0, kind: input, shape index: {}]   ;;  %s9829_s1 = inlined_call_operand.vmem [shape: f32[1,256], index: 1, kind: input, shape index: {}]   ;;  %s9830_s2 = inlined_call_operand.vmem [shape: f32[1,256], index: 2, kind: input, shape index: {}]   ;;  %s9831_s3 = inlined_call_operand.vmem [shape: bf16[3,768,256], index: 3, kind: input, shape index: {}]   ;;  %s9832_s4 = inlined_call_operand.vmem [shape: bf16[2,16,16,256], index: 4, kind: output, shape index: {0}]   ;;  %s9833_s5 = inlined_call_operand.vmem [shape: f32[2,1,8,256], index: 5, kind: output, shape index: {1}]   ;;  %s9834_s6 = inlined_call_operand.vmem [shape: f32[2,1,8,256], index: 6, kind: output, shape index: {2}]  }
   0x1   :  { %s7452_s23 = smov 0  }
   0x2 LB: > { %s29_s24 = sadd.s32 1, %s7406_s22  ;;  %p5794_p0 = scmp.ge.s32.totalorder %s7410_s23, 1  ;;  %s7410_s23 = sphi %s7452_s23, %s17_s23   ;;  %s7406_s22 = sphi %s7450_s22, %s10189_s22   ;;  %s7402_s21 = sphi %s7448_s21, %s10188_s21  }
   0x3   : > { %p31_p1 = scmp.ge.s32.totalorder %s29_s24, 2  ;;  %p235_p2 = scmp.lt.s32.totalorder %s7410_s23, 3 }
   0x5   : > { %s10191_s24 = smov (%p31_p1, %s29_s24), 0  ;;  %p236_p3 = pnand %p5794_p0, %p235_p2 }
   0x7   : > { %239 = sbr.rel (%p236_p3) target bundleno = 874 (0x36a), region = 36 }
   0xe   : > { %v6924_v0 = vld [vmem:[%s9831_s3 + $0x304] ss:$8 sps:$4 sm:$0xff]   ;;  %v6928_v2 = vld [vmem:[%s9831_s3 + $0x300] ss:$8 sps:$4 sm:$0xff]   ;;  %v6930_v4 = vld [vmem:[%s9831_s3 + $0x314] ss:$8 sps:$4 sm:$0xff]   ;;  %v339_v37 = vlaneseq }
   0xf   : > { %v6926_v1 = vld [vmem:[%s9831_s3 + $0x104] ss:$8 sps:$4 sm:$0xff]   ;;  %2220 = vmatprep.subr.bf16.mxu1 %v6924_v0  ;;  %v6929_v3 = vld [vmem:[%s9831_s3 + $0x100] ss:$8 sps:$4 sm:$0xff]   ;;  %v6932_v5 = vld [vmem:[%s9831_s3 + $0x114] ss:$8 sps:$4 sm:$0xff]  }
  0x10   : > { %3472 = vmatprep.subr.bf16.mxu0 %v6926_v1  ;;  %2221 = vmatpush1.bf16.msra.mxu1 %v6928_v2  ;;  %v6934_v6 = vld [vmem:[%s9831_s3 + $0x310] ss:$8 sps:$4 sm:$0xff]   ;;  %v9835_v8 = vmov 0   ;;  %v6936_v9 = vld [vmem:[%s9831_s3 + $0x324] ss:$8 sps:$4 sm:$0xff]   ;;  %p288_p4 = scmp.lt.s32.totalorder %s7402_s21, 1 }
  0x11   : > { %3473 = vmatpush1.bf16.msra.mxu0 %v6929_v3  ;;  %2222 = vmatprep.subr.bf16.mxu1 %v6930_v4  ;;  %v6935_v7 = vld [vmem:[%s9831_s3 + $0x110] ss:$8 sps:$4 sm:$0xff]   ;;  %v6938_v10 = vld [vmem:[%s9831_s3 + $0x124] ss:$8 sps:$4 sm:$0xff]   ;;  %v6940_v11 = vld [vmem:[%s9831_s3 + $0x320] ss:$8 sps:$4 sm:$0xff]  }
  0x12   : > { %3504 = vmatprep.mubr.bf16.mxu0 %v9835_v8  ;;  %3474 = vmatprep.subr.bf16.mxu0 %v6932_v5  ;;  %v6941_v12 = vld [vmem:[%s9831_s3 + $0x120] ss:$8 sps:$4 sm:$0xff]   ;;  %v6942_v13 = vld [vmem:[%s9831_s3 + $0x334] ss:$8 sps:$4 sm:$0xff]   ;;  %v6946_v15 = vld [vmem:[%s9831_s3 + $0x330] ss:$8 sps:$4 sm:$0xff]  }
  0x13   : > { %v6944_v14 = vld [vmem:[%s9831_s3 + $0x134] ss:$8 sps:$4 sm:$0xff]   ;;  %v6947_v16 = vld [vmem:[%s9831_s3 + $0x130] ss:$8 sps:$4 sm:$0xff]   ;;  %v6948_v17 = vld [vmem:[%s9831_s3 + $0x344] ss:$8 sps:$4 sm:$0xff]  }
  0x14   : > { %2223 = vmatpush1.bf16.msra.mxu1 %v6934_v6  ;;  %v6950_v18 = vld [vmem:[%s9831_s3 + $0x144] ss:$8 sps:$4 sm:$0xff]   ;;  %v6952_v19 = vld [vmem:[%s9831_s3 + $0x340] ss:$8 sps:$4 sm:$0xff]   ;;  %v6954_v21 = vld [vmem:[%s9831_s3 + $0x354] ss:$8 sps:$4 sm:$0xff]  }
  0x15   : > { %3475 = vmatpush1.bf16.msra.mxu0 %v6935_v7  ;;  %2224 = vmatprep.subr.bf16.mxu1 %v6936_v9  ;;  %v6953_v20 = vld [vmem:[%s9831_s3 + $0x140] ss:$8 sps:$4 sm:$0xff]   ;;  %v6956_v22 = vld [vmem:[%s9831_s3 + $0x154] ss:$8 sps:$4 sm:$0xff]   ;;  %v6958_v23 = vld [vmem:[%s9831_s3 + $0x350] ss:$8 sps:$4 sm:$0xff]  }
  0x16   : > { %3476 = vmatprep.subr.bf16.mxu0 %v6938_v10  ;;  %v6959_v24 = vld [vmem:[%s9831_s3 + $0x150] ss:$8 sps:$4 sm:$0xff]   ;;  %v6960_v25 = vld [vmem:[%s9831_s3 + $0x364] ss:$8 sps:$4 sm:$0xff]   ;;  %v6964_v27 = vld [vmem:[%s9831_s3 + $0x360] ss:$8 sps:$4 sm:$0xff]  }
  0x17   : > { %v6962_v26 = vld [vmem:[%s9831_s3 + $0x164] ss:$8 sps:$4 sm:$0xff]   ;;  %v6965_v28 = vld [vmem:[%s9831_s3 + $0x160] ss:$8 sps:$4 sm:$0xff]   ;;  %v6966_v29 = vld [vmem:[%s9831_s3 + $0x374] ss:$8 sps:$4 sm:$0xff]  }
  0x18   : > { %2225 = vmatpush1.bf16.msra.mxu1 %v6940_v11  ;;  %v6968_v30 = vld [vmem:[%s9831_s3 + $0x174] ss:$8 sps:$4 sm:$0xff]   ;;  %v6970_v31 = vld [vmem:[%s9831_s3 + $0x370] ss:$8 sps:$4 sm:$0xff]   ;;  %v6972_v33 = vld [vmem:[%s9831_s3 + $0x384] ss:$8 sps:$4 sm:$0xff]  }
  0x19   : > { %3477 = vmatpush1.bf16.msra.mxu0 %v6941_v12  ;;  %2226 = vmatprep.subr.bf16.mxu1 %v6942_v13  ;;  %v6971_v32 = vld [vmem:[%s9831_s3 + $0x170] ss:$8 sps:$4 sm:$0xff]   ;;  %v6974_v34 = vld [vmem:[%s9831_s3 + $0x184] ss:$8 sps:$4 sm:$0xff]   ;;  %v6976_v35 = vld [vmem:[%s9831_s3 + $0x380] ss:$8 sps:$4 sm:$0xff]  }
  0x1a   : > { %3478 = vmatprep.subr.bf16.mxu0 %v6944_v14  ;;  %v6977_v36 = vld [vmem:[%s9831_s3 + $0x180] ss:$8 sps:$4 sm:$0xff]   ;;  %v6978_v38 = vld [vmem:[%s9831_s3 + $0x394] ss:$8 sps:$4 sm:$0xff]   ;;  %s10193_s21 = smov (!%p288_p4, %s7402_s21), 1  ;;  %v340_v41 = vshrl.u32 %v339_v37, 7 }
  0x1b   : > { %v6980_v39 = vld [vmem:[%s9831_s3 + $0x194] ss:$8 sps:$4 sm:$0xff]   ;;  %v6982_v40 = vld [vmem:[%s9831_s3 + $0x390] ss:$8 sps:$4 sm:$0xff]   ;;  %v6984_v43 = vld [vmem:[%s9831_s3 + $0x3a4] ss:$8 sps:$4 sm:$0xff]  }
  0x1c   : > { %2227 = vmatpush1.bf16.msra.mxu1 %v6946_v15  ;;  %v6983_v42 = vld [vmem:[%s9831_s3 + $0x190] ss:$8 sps:$4 sm:$0xff]   ;;  %v6986_v44 = vld [vmem:[%s9831_s3 + $0x1a4] ss:$8 sps:$4 sm:$0xff]   ;;  %s6319_s29 = sshll.u32 %s10193_s21, 8  ;;  %v345_v47 = vsub.s32 1, %v340_v41 }
  0x1d   : > { %3479 = vmatpush1.bf16.msra.mxu0 %v6947_v16  ;;  %2228 = vmatprep.subr.bf16.mxu1 %v6948_v17  ;;  %v6988_v45 = vld [vmem:[%s9831_s3 + $0x3a0] ss:$8 sps:$4 sm:$0xff]   ;;  %v341_v48 = vsub.s32 0, %v340_v41  ;;  %v6990_v49 = vld [vmem:[%s9831_s3 + $0x3b4] ss:$8 sps:$4 sm:$0xff]   ;;  %s7614_s14 = scalar_lea.vmem %s9828_s0, %s6319_s29  ;;  %vm1097_vm0 = vcmask 1040384   ;;  %s9754_s11 = scalar_lea.vmem %s9832_s4, %s6319_s29 }
  0x1e   : > { %3480 = vmatprep.subr.bf16.mxu0 %v6950_v18  ;;  %v6989_v46 = vld [vmem:[%s9831_s3 + $0x1a0] ss:$8 sps:$4 sm:$0xff]   ;;  %v6992_v50 = vld [vmem:[%s9831_s3 + $0x1b4] ss:$8 sps:$4 sm:$0xff]   ;;  %v6994_v51 = vld [vmem:[%s9831_s3 + $0x3b0] ss:$8 sps:$4 sm:$0xff]  }
  0x1f   : > { %v323_v52 = vld [vmem:[%s9829_s1] sm:$0x3]  ;;  %v418_v56 = vld [vmem:[%s7614_s14 + $0x8] sm:$0xff]  ;;  %v6995_v58 = vld [vmem:[%s9831_s3 + $0x1b0] ss:$8 sps:$4 sm:$0xff]   ;;  %vm1280_vm4 = vcmask 1047552  }
  0x20   : > { %2229 = vmatpush1.bf16.msra.mxu1 %v6952_v19  ;;  %v324_v53 = vld [vmem:[%s9830_s2] sm:$0x3]  ;;  %v7628_v54 = vrot.slane %v323_v52, %v345_v47  ;;  %v7632_v57 = vrot.slane %v323_v52, %v341_v48  ;;  %v452_v61 = vunpack.c.h.bf16 %v418_v56  ;;  %v6996_v62 = vld [vmem:[%s9831_s3 + $0x3c4] ss:$8 sps:$4 sm:$0xff]   ;;  %v451_v2 = vunpack.c.l.bf16 %v418_v56  ;;  %v7002_v10 = vld [vmem:[%s9831_s3 + $0x3d4] ss:$8 sps:$4 sm:$0xff]  }
  0x21   : > { %3481 = vmatpush1.bf16.msra.mxu0 %v6953_v20  ;;  %2230 = vmatprep.subr.bf16.mxu1 %v6954_v21  ;;  %v417_v55 = vld [vmem:[%s7614_s14] sm:$0xff]  ;;  %v7637_v59 = vrot.slane %v324_v53, %v345_v47  ;;  %v7645_v0 = vrot.slane %v324_v53, %v341_v48  ;;  %v419_v13 = vld [vmem:[%s7614_s14 + $0x10] sm:$0xff]  ;;  %v420_v14 = vld [vmem:[%s7614_s14 + $0x18] sm:$0xff]  ;;  %vm1098_vm1 = vsmask.f32 256  ;;  %s6321_s29 = sshll.u32 %s10193_s21, 4 }
  0x22   : > { %3482 = vmatprep.subr.bf16.mxu0 %v6956_v22  ;;  %v450_v60 = vunpack.c.h.bf16 %v417_v55  ;;  %v6998_v63 = vld [vmem:[%s9831_s3 + $0x1c4] ss:$8 sps:$4 sm:$0xff]   ;;  %v449_v1 = vunpack.c.l.bf16 %v417_v55  ;;  %v7000_v3 = vld [vmem:[%s9831_s3 + $0x3c0] ss:$8 sps:$4 sm:$0xff]   ;;  %v516_v5 = vmul.f32 %v452_v61, %v7628_v54  ;;  %v515_v9 = vmul.f32 %v451_v2, %v7632_v57  ;;  %v7004_v15 = vld [vmem:[%s9831_s3 + $0x1d4] ss:$8 sps:$4 sm:$0xff]   ;;  %s312_s15 = scalar_lea.vmem %s9833_s5, %s6321_s29  ;;  %s321_s17 = scalar_lea.vmem %s9834_s6, %s6321_s29 }
  0x23   : > { %v7001_v6 = vld [vmem:[%s9831_s3 + $0x1c0] ss:$8 sps:$4 sm:$0xff]   ;;  %v454_v18 = vunpack.c.h.bf16 %v419_v13  ;;  %v456_v19 = vunpack.c.h.bf16 %v420_v14  ;;  %v453_v22 = vunpack.c.l.bf16 %v419_v13  ;;  %v7014_v47 = vld [vmem:[%s9831_s3 + $0x3f4] ss:$8 sps:$4 sm:$0xff]   ;;  %vm7718_vm2 = vmand %vm1097_vm0, %vm1098_vm1  ;;  %vm1281_vm3 = vsmask.f32 7424 }
  0x24   : > { %2231 = vmatpush1.bf16.msra.mxu1 %v6958_v23  ;;  %v514_v4 = vmul.f32 %v450_v60, %v7628_v54  ;;  %v513_v7 = vmul.f32 %v449_v1, %v7632_v57  ;;  %v580_v12 = vadd.f32 %v516_v5, %v7637_v59  ;;  %v579_v17 = vadd.f32 %v515_v9, %v7645_v0  ;;  %v7013_v41 = vld [vmem:[%s9831_s3 + $0x1e0] ss:$8 sps:$4 sm:$0xff]   ;;  %v7018_v2 = vld [vmem:[%s9831_s3 + $0x3f0] ss:$8 sps:$4 sm:$0xff]   ;;  %vm8038_vm5 = vmand %vm1280_vm4, %vm1281_vm3 }
  0x25   : > { %3483 = vmatpush1.bf16.msra.mxu0 %v6959_v24  ;;  %2232 = vmatprep.subr.bf16.mxu1 %v6960_v25  ;;  %v455_v23 = vunpack.c.l.bf16 %v420_v14  ;;  %v7006_v24 = vld [vmem:[%s9831_s3 + $0x3d0] ss:$8 sps:$4 sm:$0xff]  }
  0x26   : > { %3484 = vmatprep.subr.bf16.mxu0 %v6962_v26  ;;  %v578_v11 = vadd.f32 %v514_v4, %v7637_v59  ;;  %v577_v16 = vadd.f32 %v513_v7, %v7645_v0  ;;  %v644_v21 = vmax.f32 %v580_v12, 0.0  ;;  %v643_v26 = vmax.f32 %v579_v17, 0.0  ;;  %v423_v14 = vld [vmem:[%s7614_s14 + $0x30] sm:$0xff] }
  0x27   : > { %v7314_v60 = vld [vmem:[%s9831_s3 + $0xd0] ss:$8 sps:$4 sm:$0xff]  }
  0x28   : > { %2233 = vmatpush1.bf16.msra.mxu1 %v6964_v27  ;;  %v642_v20 = vmax.f32 %v578_v11, 0.0  ;;  %v641_v25 = vmax.f32 %v577_v16, 0.0  ;;  %v518_v27 = vmul.f32 %v454_v18, %v7628_v54 }
  0x29   : > { %3485 = vmatpush1.bf16.msra.mxu0 %v6965_v28  ;;  %2234 = vmatprep.subr.bf16.mxu1 %v6966_v29  ;;  %v520_v28 = vmul.f32 %v456_v19, %v7628_v54  ;;  %v7007_v29 = vld [vmem:[%s9831_s3 + $0x1d0] ss:$8 sps:$4 sm:$0xff]  }
  0x2a   : > { %3486 = vmatprep.subr.bf16.mxu0 %v6968_v30  ;;  %v7677_v30 = vpack.c.bf16 %v644_v21, %v642_v20  ;;  %v424_v19 = vld [vmem:[%s7614_s14 + $0x38] sm:$0xff]  ;;  %v7025_v21 = vld [vmem:[%s9831_s3 + $0x204] ss:$8 sps:$4 sm:$0xff]  }
  0x2b   : > { %v584_v37 = vadd.f32 %v520_v28, %v7637_v59  ;;  %v462_v28 = vunpack.c.h.bf16 %v423_v14 }
  0x2c   : > { %2235 = vmatpush1.bf16.msra.mxu1 %v6970_v31  ;;  %v517_v31 = vmul.f32 %v453_v22, %v7632_v57 }
  0x2d   : > { %3487 = vmatpush1.bf16.msra.mxu0 %v6971_v32  ;;  %2236 = vmatprep.subr.bf16.mxu1 %v6972_v33  ;;  %v519_v32 = vmul.f32 %v455_v23, %v7632_v57  ;;  %v7008_v33 = vld [vmem:[%s9831_s3 + $0x3e4] ss:$8 sps:$4 sm:$0xff]  }
  0x2e   : > { %3488 = vmatprep.subr.bf16.mxu0 %v6974_v34  ;;  %v7010_v34 = vld [vmem:[%s9831_s3 + $0x1e4] ss:$8 sps:$4 sm:$0xff]  }
  0x30   : > { %2237 = vmatpush1.bf16.msra.mxu1 %v6976_v35  ;;  %v7687_v35 = vpack.c.bf16 %v643_v26, %v641_v25 }
  0x31   : > { %3489 = vmatpush1.bf16.msra.mxu0 %v6977_v36  ;;  %2238 = vmatprep.subr.bf16.mxu1 %v6978_v38  ;;  %v582_v36 = vadd.f32 %v518_v27, %v7637_v59  ;;  %v421_v38 = vld [vmem:[%s7614_s14 + $0x20] sm:$0xff] }
  0x32   : > { %3490 = vmatprep.subr.bf16.mxu0 %v6980_v39  ;;  %v7693_v39 = vrot.slane %v9835_v8, 1  ;;  %v9864_v48 = vshrl.u32 %v7687_v35, 16  ;;  %v458_v56 = vunpack.c.h.bf16 %v421_v38  ;;  %v457_v1 = vunpack.c.l.bf16 %v421_v38 }
  0x34   : > { %2239 = vmatpush1.bf16.msra.mxu1 %v6982_v40  ;;  %v7012_v40 = vld [vmem:[%s9831_s3 + $0x3e0] ss:$8 sps:$4 sm:$0xff]   ;;  %v826_v61 = vrot.slane %v9864_v48, 7  ;;  %v7098_v48 = vld [vmem:[%s9831_s3 + $0x490] ss:$8 sps:$4 sm:$0xff]  }
  0x35   : > { %3491 = vmatpush1.bf16.msra.mxu0 %v6983_v42  ;;  %2240 = vmatprep.subr.bf16.mxu1 %v6984_v43  ;;  %v831_v42 = vshrl.u32 %v7677_v30, 16  ;;  %v834_v43 = vshll.u32 %v7677_v30, 16 }
  0x36   : > { %3492 = vmatprep.subr.bf16.mxu0 %v6986_v44  ;;  %v581_v44 = vadd.f32 %v517_v31, %v7645_v0  ;;  %v7023_v31 = vld [vmem:[%s9831_s3 + $0x200] ss:$8 sps:$4 sm:$0xff]  }
  0x37   : > { %v833_v52 = vrot.slane %v831_v42, 7 }
  0x38   : > { %2241 = vmatpush1.bf16.msra.mxu1 %v6988_v45  ;;  %v583_v45 = vadd.f32 %v519_v32, %v7645_v0  ;;  %v645_v53 = vmax.f32 %v581_v44, 0.0  ;;  %v526_v44 = vmul.f32 %v462_v28, %v7628_v54  ;;  %v7032_v28 = vld [vmem:[%s9831_s3 + $0x220] ss:$8 sps:$4 sm:$0xff]  }
  0x39   : > { %3493 = vmatpush1.bf16.msra.mxu0 %v6989_v46  ;;  %2242 = vmatprep.subr.bf16.mxu1 %v6990_v49  ;;  %v422_v46 = vld [vmem:[%s7614_s14 + $0x28] sm:$0xff]  ;;  %v9865_v49 = vshll.u32 %v7687_v35, 16  ;;  %v836_v4 = vor.u32 %v834_v43, %v833_v52  ;;  %v7796_v52 = vld [vmem:[%s7614_s14 + $0x40] sm:$0xff] }
  0x3a   : > { %3494 = vmatprep.subr.bf16.mxu0 %v6992_v50  ;;  %v646_v50 = vmax.f32 %v582_v36, 0.0  ;;  %v647_v55 = vmax.f32 %v583_v45, 0.0  ;;  %v459_v7 = vunpack.c.l.bf16 %v422_v46  ;;  %v464_v36 = vunpack.c.h.bf16 %v424_v19 }
  0x3b   : > { %v829_v9 = vor.u32 %v9865_v49, %v826_v61  ;;  %v461_v45 = vunpack.c.l.bf16 %v423_v14  ;;  %v7804_v61 = vld [vmem:[%s7614_s14 + $0x48] sm:$0xff]  ;;  %v466_v14 = vunpack.c.h.bf16 %v7796_v52 }
  0x3c   : > { %2243 = vmatpush1.bf16.msra.mxu1 %v6994_v51  ;;  %v648_v51 = vmax.f32 %v584_v37, 0.0  ;;  %v7734_v5 = vpack.c.bf16 %v647_v55, %v645_v53  ;;  %v523_v27 = vmul.f32 %v459_v7, %v7632_v57  ;;  %v7028_v37 = vld [vmem:[%s9831_s3 + $0x214] ss:$8 sps:$4 sm:$0xff]   ;;  %v7034_v7 = vld [vmem:[%s9831_s3 + $0x224] ss:$8 sps:$4 sm:$0xff]  }
  0x3d   : > { %3495 = vmatpush1.bf16.msra.mxu0 %v6995_v58  ;;  %2244 = vmatprep.subr.bf16.mxu1 %v6996_v62  ;;  %v7016_v58 = vld [vmem:[%s9831_s3 + $0x1f4] ss:$8 sps:$4 sm:$0xff]   ;;  %v7756_v20 = vsel %vm7718_vm2, 0, %v829_v9 }
  0x3e   : > { %3496 = vmatprep.subr.bf16.mxu0 %v6998_v63  ;;  %v7724_v62 = vpack.c.bf16 %v648_v51, %v646_v50  ;;  %v460_v63 = vunpack.c.h.bf16 %v422_v46  ;;  %v9855_v16 = vshrl.u32 %v7734_v5, 16  ;;  %v9857_v17 = vshll.u32 %v7734_v5, 16  ;;  %9982 = vst [vmem:[#allocation4_spill] sm:$0xff] %v7756_v20 }
  0x3f   : > { %v528_v51 = vmul.f32 %v464_v36, %v7628_v54 }
  0x40   : > { %2245 = vmatpush1.bf16.msra.mxu1 %v7000_v3  ;;  %v7019_v3 = vld [vmem:[%s9831_s3 + $0x1f0] ss:$8 sps:$4 sm:$0xff]   ;;  %v9858_v11 = vshrl.u32 %v7724_v62, 16  ;;  %v9859_v12 = vshll.u32 %v7724_v62, 16  ;;  %v524_v13 = vmul.f32 %v460_v63, %v7628_v54  ;;  %v840_v25 = vrot.slane %v9855_v16, 7 }
  0x41   : > { %3497 = vmatpush1.bf16.msra.mxu0 %v7001_v6  ;;  %2246 = vmatprep.subr.bf16.mxu1 %v7002_v10  ;;  %v522_v6 = vmul.f32 %v458_v56, %v7628_v54  ;;  %v7022_v10 = vld [vmem:[%s9831_s3 + $0x404] ss:$8 sps:$4 sm:$0xff]   ;;  %v590_v56 = vadd.f32 %v526_v44, %v7637_v59  ;;  %v7026_v63 = vld [vmem:[%s9831_s3 + $0x210] ss:$8 sps:$4 sm:$0xff]  }
  0x42   : > { %3498 = vmatprep.subr.bf16.mxu0 %v7004_v15  ;;  %v7748_v15 = vsel %vm7718_vm2, 0, %v836_v4  ;;  %v847_v22 = vrot.slane %v9858_v11, 7  ;;  %v588_v23 = vadd.f32 %v524_v13, %v7637_v59  ;;  %v843_v38 = vor.u32 %v9857_v17, %v840_v25 }
  0x43   : > { %9981 = vst [vmem:[#allocation3_spill] sm:$0xff] %v7748_v15  ;;  %v586_v18 = vadd.f32 %v522_v6, %v7637_v59  ;;  %2252 = vmatprep.mubr.bf16.mxu1 %v7748_v15  ;;  %v525_v4 = vmul.f32 %v461_v45, %v7632_v57  ;;  %v7029_v6 = vld [vmem:[%s9831_s3 + $0x410] ss:$8 sps:$4 sm:$0xff]  }
  0x44   : > { %2247 = vmatpush1.bf16.msra.mxu1 %v7006_v24  ;;  %v521_v24 = vmul.f32 %v457_v1, %v7632_v57  ;;  %v850_v32 = vor.u32 %v9859_v12, %v847_v22  ;;  %v7800_v53 = vsel %vm7718_vm2, 0, %v843_v38  ;;  %v465_v38 = vunpack.c.l.bf16 %v7796_v52 }
  0x45   : > { %3499 = vmatpush1.bf16.msra.mxu0 %v7007_v29  ;;  %2248 = vmatprep.subr.bf16.mxu1 %v7008_v33  ;;  %v650_v26 = vmax.f32 %v586_v18, 0.0  ;;  %v7020_v29 = vld [vmem:[%s9831_s3 + $0x400] ss:$8 sps:$4 sm:$0xff]   ;;  %v652_v33 = vmax.f32 %v588_v23, 0.0  ;;  %9983 = vst [vmem:[#allocation5_spill] sm:$0xff] %v7800_v53  ;;  %v589_v22 = vadd.f32 %v525_v4, %v7645_v0  ;;  %v468_v23 = vunpack.c.h.bf16 %v7804_v61 }
  0x46   : > { %3500 = vmatprep.subr.bf16.mxu0 %v7010_v34  ;;  %v585_v34 = vadd.f32 %v521_v24, %v7645_v0  ;;  %v7790_v46 = vsel %vm7718_vm2, 0, %v850_v32 }
  0x47   : > { %v653_v32 = vmax.f32 %v589_v22, 0.0  ;;  %v7043_v22 = vld [vmem:[%s9831_s3 + $0x244] ss:$8 sps:$4 sm:$0xff]  }
  0x48   : > { %2249 = vmatpush1.bf16.msra.mxu1 %v7012_v40  ;;  %v7031_v40 = vld [vmem:[%s9831_s3 + $0x414] ss:$8 sps:$4 sm:$0xff]   ;;  %v649_v50 = vmax.f32 %v585_v34, 0.0 }
  0x49   : > { %3501 = vmatpush1.bf16.msra.mxu0 %v7013_v41  ;;  %2250 = vmatprep.subr.bf16.mxu1 %v7014_v47  ;;  %v587_v41 = vadd.f32 %v523_v27, %v7645_v0  ;;  %v7792_v47 = vpack.c.bf16 %v652_v33, %v650_v26  ;;  %v530_v27 = vmul.f32 %v466_v14, %v7628_v54 }
  0x4a   : > { %3502 = vmatprep.subr.bf16.mxu0 %v7016_v58  ;;  %v463_v58 = vunpack.c.l.bf16 %v424_v19  ;;  %v7040_v19 = vld [vmem:[%s9831_s3 + $0x424] ss:$8 sps:$4 sm:$0xff]   ;;  %v532_v33 = vmul.f32 %v468_v23, %v7628_v54 }
  0x4b   : > { %v651_v55 = vmax.f32 %v587_v41, 0.0  ;;  %v9850_v1 = vshrl.u32 %v7792_v47, 16  ;;  %v7037_v41 = vld [vmem:[%s9831_s3 + $0x234] ss:$8 sps:$4 sm:$0xff]  }
  0x4c   : > { %2251 = vmatpush1.bf16.msra.mxu1 %v7018_v2  ;;  %v9854_v2 = vshll.u32 %v7792_v47, 16  ;;  %v527_v13 = vmul.f32 %v463_v58, %v7632_v57 }
  0x4d   : > { %3503 = vmatpush1.bf16.msra.mxu0 %v7019_v3  ;;  %2413 = vmatprep.subr.bf16.mxu1 %v7022_v10  ;;  %v592_v3 = vadd.f32 %v528_v51, %v7637_v59  ;;  %v7821_v9 = vpack.c.bf16 %v651_v55, %v649_v50  ;;  %v654_v10 = vmax.f32 %v590_v56, 0.0  ;;  %v861_v18 = vrot.slane %v9850_v1, 7  ;;  %v7038_v55 = vld [vmem:[%s9831_s3 + $0x420] ss:$8 sps:$4 sm:$0xff]  }
  0x4e   : > { %3665 = vmatprep.subr.bf16.mxu0 %v7025_v21  ;;  %v591_v26 = vadd.f32 %v527_v13, %v7645_v0  ;;  %v596_v51 = vadd.f32 %v532_v33, %v7637_v59 }
  0x4f   : > { %2253 = vmatmul.mubr.bf16.vlgmr.msra.gmra.mrb[0].mxu1 %v7756_v20  ;;  %v656_v21 = vmax.f32 %v592_v3, 0.0  ;;  %v9848_v24 = vshrl.u32 %v7821_v9, 16  ;;  %v9849_v25 = vshll.u32 %v7821_v9, 16  ;;  %v428_v3 = vld [vmem:[%s7614_s14 + $0x58] sm:$0xff] }
  0x50   : > { %3505 = vmatmul.mubr.bf16.vlgmr.msra.gmra.mrb[0].mxu0 %v9835_v8  ;;  %2414 = vmatpush1.bf16.msra.mxu1 %v7020_v29  ;;  %v864_v29 = vor.u32 %v9854_v2, %v861_v18  ;;  %v655_v36 = vmax.f32 %v591_v26, 0.0  ;;  %v7959_v8 = vld [vmem:[%s7614_s14 + $0x70] sm:$0xff] }
  0x51   : > { %3666 = vmatpush1.bf16.msra.mxu0 %v7023_v31  ;;  %2262 = vmatprep.mubr.bf16.mxu1 %v7790_v46  ;;  %v7843_v31 = vpack.c.bf16 %v656_v21, %v654_v10  ;;  %v854_v34 = vrot.slane %v9848_v24, 7  ;;  %v529_v10 = vmul.f32 %v465_v38, %v7632_v57  ;;  %v7041_v38 = vld [vmem:[%s9831_s3 + $0x240] ss:$8 sps:$4 sm:$0xff]  }
  0x52   : > { %3667 = vmatprep.subr.bf16.mxu0 %v7028_v37  ;;  %3514 = vmatprep.mubr.bf16.mxu0 %v7677_v30  ;;  %v594_v37 = vadd.f32 %v530_v27, %v7637_v59  ;;  %v7856_v44 = vsel %vm7718_vm2, 0, %v864_v29  ;;  %v7866_v56 = vpack.c.bf16 %v655_v36, %v653_v32  ;;  %v7047_v32 = vld [vmem:[%s9831_s3 + $0x430] ss:$8 sps:$4 sm:$0xff]  }
  0x53   : > { %2415 = vmatprep.subr.bf16.mxu1 %v7031_v40  ;;  %v427_v40 = vld [vmem:[%s7614_s14 + $0x50] sm:$0xff]  ;;  %9984 = vst [vmem:[#allocation6_spill] sm:$0xff] %v7856_v44  ;;  %v9841_v45 = vshrl.u32 %v7843_v31, 16  ;;  %v9842_v50 = vshll.u32 %v7843_v31, 16  ;;  %v857_v52 = vor.u32 %v9849_v25, %v854_v34  ;;  %v593_v27 = vadd.f32 %v529_v10, %v7645_v0  ;;  %v7059_v25 = vld [vmem:[%s9831_s3 + $0x280] ss:$8 sps:$4 sm:$0xff]  }
  0x54   : > { %2416 = vmatpush1.bf16.msra.mxu1 %v7029_v6  ;;  %v658_v58 = vmax.f32 %v594_v37, 0.0  ;;  %v7049_v6 = vld [vmem:[%s9831_s3 + $0x434] ss:$8 sps:$4 sm:$0xff]   ;;  %v470_v13 = vunpack.c.h.bf16 %v427_v40  ;;  %v9839_v18 = vshrl.u32 %v7866_v56, 16  ;;  %v469_v36 = vunpack.c.l.bf16 %v427_v40  ;;  %v7906_v37 = vld [vmem:[%s7614_s14 + $0x60] sm:$0xff] }
  0x55   : > { %3668 = vmatpush1.bf16.msra.mxu0 %v7026_v63  ;;  %2417 = vmatprep.subr.bf16.mxu1 %v7040_v19  ;;  %v467_v63 = vunpack.c.l.bf16 %v7804_v61  ;;  %v875_v4 = vrot.slane %v9841_v45, 7  ;;  %v7035_v61 = vld [vmem:[%s9831_s3 + $0x230] ss:$8 sps:$4 sm:$0xff]   ;;  %v7884_v14 = vsel %vm7718_vm2, 0, %v857_v52  ;;  %v9840_v19 = vshll.u32 %v7866_v56, 16 }
  0x56   : > { %3669 = vmatprep.subr.bf16.mxu0 %v7034_v7  ;;  %v660_v7 = vmax.f32 %v596_v51, 0.0  ;;  %9985 = vst [vmem:[#allocation7_spill] sm:$0xff] %v7884_v14  ;;  %v868_v29 = vrot.slane %v9839_v18, 7  ;;  %v534_v34 = vmul.f32 %v470_v13, %v7628_v54  ;;  %v471_v13 = vunpack.c.l.bf16 %v428_v3 }
  0x57   : > { %2263 = vmatmul.mubr.bf16.gmra.mrb[4].mxu1 %v7800_v53  ;;  %v531_v21 = vmul.f32 %v467_v63, %v7632_v57  ;;  %v878_v23 = vor.u32 %v9842_v50, %v875_v4  ;;  %v473_v18 = vunpack.c.l.bf16 %v7906_v37  ;;  %v7979_v50 = vld [vmem:[%s7614_s14 + $0x78] sm:$0xff] }
  0x58   : > { %3515 = vmatmul.mubr.bf16.gmra.mrb[4].mxu0 %v7687_v35  ;;  %2272 = vmatprep.mubr.bf16.mxu1 %v7856_v44  ;;  %v7895_v26 = vpack.c.bf16 %v660_v7, %v658_v58  ;;  %v871_v40 = vor.u32 %v9840_v19, %v868_v29  ;;  %v598_v4 = vadd.f32 %v534_v34, %v7637_v59  ;;  %v430_v7 = vld [vmem:[%s7614_s14 + $0x68] sm:$0xff] }
  0x59   : > { %3670 = vmatpush1.bf16.msra.mxu0 %v7032_v28  ;;  %3524 = vmatprep.mubr.bf16.mxu0 %v7724_v62  ;;  %v472_v28 = vunpack.c.h.bf16 %v428_v3  ;;  %v595_v33 = vadd.f32 %v531_v21, %v7645_v0  ;;  %v474_v21 = vunpack.c.h.bf16 %v7906_v37  ;;  %v535_v34 = vmul.f32 %v471_v13, %v7632_v57 }
  0x5a   : > { %3671 = vmatprep.subr.bf16.mxu0 %v7037_v41  ;;  %2418 = vmatpush1.bf16.msra.mxu1 %v7038_v55  ;;  %v7913_v41 = vsel %vm7718_vm2, 0, %v878_v23  ;;  %v9837_v51 = vshrl.u32 %v7895_v26, 16  ;;  %v9838_v52 = vshll.u32 %v7895_v26, 16  ;;  %v657_v55 = vmax.f32 %v593_v27, 0.0  ;;  %v7044_v23 = vld [vmem:[%s9831_s3 + $0x250] ss:$8 sps:$4 sm:$0xff]  }
  0x5b   : > { %9986 = vst [vmem:[#allocation8_spill] sm:$0xff] %v7913_v41  ;;  %2419 = vmatprep.subr.bf16.mxu1 %v7049_v6  ;;  %v659_v58 = vmax.f32 %v595_v33, 0.0  ;;  %v536_v63 = vmul.f32 %v472_v28, %v7628_v54  ;;  %v7046_v6 = vld [vmem:[%s9831_s3 + $0x254] ss:$8 sps:$4 sm:$0xff]   ;;  %v7934_v27 = vsel %vm7718_vm2, 0, %v871_v40  ;;  %v662_v29 = vmax.f32 %v598_v4, 0.0 }
  0x5c   : > { %v889_v10 = vrot.slane %v9837_v51, 7  ;;  %9987 = vst [vmem:[#allocation9_spill] sm:$0xff] %v7934_v27  ;;  %v7058_v28 = vld [vmem:[%s9831_s3 + $0x444] ss:$8 sps:$4 sm:$0xff]   ;;  %v7067_v4 = vld [vmem:[%s9831_s3 + $0x454] ss:$8 sps:$4 sm:$0xff]   ;;  %v475_v45 = vunpack.c.l.bf16 %v430_v7 }
  0x5d   : > { %3672 = vmatpush1.bf16.msra.mxu0 %v7035_v61  ;;  %v533_v61 = vmul.f32 %v469_v36, %v7632_v57  ;;  %v600_v3 = vadd.f32 %v536_v63, %v7637_v59 }
  0x5e   : > { %3673 = vmatprep.subr.bf16.mxu0 %v7043_v22  ;;  %2420 = vmatpush1.bf16.msra.mxu1 %v7047_v32  ;;  %v7936_v22 = vpack.c.bf16 %v659_v58, %v657_v55  ;;  %v892_v33 = vor.u32 %v9838_v52, %v889_v10  ;;  %v7056_v32 = vld [vmem:[%s9831_s3 + $0x440] ss:$8 sps:$4 sm:$0xff]   ;;  %v476_v55 = vunpack.c.h.bf16 %v430_v7  ;;  %v538_v10 = vmul.f32 %v474_v21, %v7628_v54 }
  0x5f   : > { %2273 = vmatmul.mubr.bf16.gmra.mrb[8].mxu1 %v7884_v14  ;;  %v597_v36 = vadd.f32 %v533_v61, %v7645_v0  ;;  %v664_v63 = vmax.f32 %v600_v3, 0.0  ;;  %v599_v61 = vadd.f32 %v535_v34, %v7645_v0  ;;  %2421 = vmatprep.subr.bf16.mxu1 %v7058_v28  ;;  %v478_v34 = vunpack.c.h.bf16 %v7959_v8  ;;  %v7050_v28 = vld [vmem:[%s9831_s3 + $0x260] ss:$8 sps:$4 sm:$0xff]  }
  0x60   : > { %3525 = vmatmul.mubr.bf16.gmra.mrb[8].mxu0 %v7734_v5  ;;  %2282 = vmatprep.mubr.bf16.mxu1 %v7913_v41  ;;  %v9844_v40 = vshrl.u32 %v7936_v22, 16  ;;  %v9847_v58 = vshll.u32 %v7936_v22, 16  ;;  %v7967_v13 = vsel %vm7718_vm2, 0, %v892_v33  ;;  %v540_v51 = vmul.f32 %v476_v55, %v7628_v54 }
  0x61   : > { %3674 = vmatpush1.bf16.msra.mxu0 %v7041_v38  ;;  %3534 = vmatprep.mubr.bf16.mxu0 %v7792_v47  ;;  %v7052_v38 = vld [vmem:[%s9831_s3 + $0x264] ss:$8 sps:$4 sm:$0xff]   ;;  %9988 = vst [vmem:[#allocation10_spill] sm:$0xff] %v7967_v13  ;;  %v661_v3 = vmax.f32 %v597_v36, 0.0  ;;  %v602_v52 = vadd.f32 %v538_v10, %v7637_v59  ;;  %v663_v19 = vmax.f32 %v599_v61, 0.0  ;;  %v537_v55 = vmul.f32 %v473_v18, %v7632_v57 }
  0x62   : > { %3675 = vmatprep.subr.bf16.mxu0 %v7046_v6  ;;  %v882_v21 = vrot.slane %v9844_v40, 7  ;;  %v7973_v6 = vpack.c.bf16 %v664_v63, %v662_v29  ;;  %2422 = vmatpush1.bf16.msra.mxu1 %v7056_v32  ;;  %v604_v33 = vadd.f32 %v540_v51, %v7637_v59  ;;  %v7055_v51 = vld [vmem:[%s9831_s3 + $0x274] ss:$8 sps:$4 sm:$0xff]   ;;  %v539_v63 = vmul.f32 %v475_v45, %v7632_v57 }
  0x63   : > { %2423 = vmatprep.subr.bf16.mxu1 %v7067_v4  ;;  %v666_v32 = vmax.f32 %v602_v52, 0.0  ;;  %v7992_v7 = vpack.c.bf16 %v663_v19, %v661_v3  ;;  %v7065_v4 = vld [vmem:[%s9831_s3 + $0x450] ss:$8 sps:$4 sm:$0xff]   ;;  %v480_v52 = vunpack.c.h.bf16 %v7979_v50  ;;  %v601_v61 = vadd.f32 %v537_v55, %v7645_v0  ;;  %v7076_v3 = vld [vmem:[%s9831_s3 + $0x464] ss:$8 sps:$4 sm:$0xff]  }
  0x64   : > { %v885_v29 = vor.u32 %v9847_v58, %v882_v21  ;;  %v9843_v36 = vshrl.u32 %v7973_v6, 16  ;;  %v9846_v37 = vshll.u32 %v7973_v6, 16  ;;  %v7053_v21 = vld [vmem:[%s9831_s3 + $0x270] ss:$8 sps:$4 sm:$0xff]  }
  0x65   : > { %3676 = vmatpush1.bf16.msra.mxu0 %v7044_v23  ;;  %v668_v23 = vmax.f32 %v604_v33, 0.0  ;;  %v9845_v18 = vshrl.u32 %v7992_v7, 16  ;;  %v9852_v45 = vshll.u32 %v7992_v7, 16 }
  0x66   : > { %3677 = vmatprep.subr.bf16.mxu0 %v7052_v38  ;;  %v903_v10 = vrot.slane %v9843_v36, 7  ;;  %v542_v38 = vmul.f32 %v478_v34, %v7628_v54  ;;  %v8019_v33 = vsel %vm7718_vm2, 0, %v885_v29  ;;  %v603_v34 = vadd.f32 %v539_v63, %v7645_v0  ;;  %2424 = vmatpush1.bf16.msra.mxu1 %v7065_v4 }
  0x67   : > { %2283 = vmatmul.mubr.bf16.gmra.mrb[12].mxu1 %v7934_v27  ;;  %v8007_v19 = vpack.c.bf16 %v668_v23, %v666_v32  ;;  %9989 = vst [vmem:[#allocation11_spill] sm:$0xff] %v8019_v33  ;;  %v544_v32 = vmul.f32 %v480_v52, %v7628_v54  ;;  %v477_v23 = vunpack.c.l.bf16 %v7959_v8  ;;  %v896_v29 = vrot.slane %v9845_v18, 7  ;;  %v8034_v52 = vld [vmem:[%s7614_s14 + $0x80] sm:$0xff]  ;;  %2425 = vmatprep.subr.bf16.mxu1 %v7076_v3  ;;  %v7064_v3 = vld [vmem:[%s9831_s3 + $0x294] ss:$8 sps:$4 sm:$0xff]  }
  0x68   : > { %3535 = vmatmul.mubr.bf16.gmra.mrb[12].mxu0 %v7821_v9  ;;  %2292 = vmatprep.mubr.bf16.mxu1 %v7967_v13  ;;  %v906_v55 = vor.u32 %v9846_v37, %v903_v10  ;;  %v665_v36 = vmax.f32 %v601_v61, 0.0  ;;  %v667_v40 = vmax.f32 %v603_v34, 0.0  ;;  %v7074_v10 = vld [vmem:[%s9831_s3 + $0x460] ss:$8 sps:$4 sm:$0xff]   ;;  %v606_v18 = vadd.f32 %v542_v38, %v7637_v59  ;;  %v7353_v8 = vld [vmem:[%s9831_s3 + $0x8f0] ss:$8 sps:$4 sm:$0xff]  }
  0x69   : > { %3678 = vmatpush1.bf16.msra.mxu0 %v7050_v28  ;;  %3544 = vmatprep.mubr.bf16.mxu0 %v7843_v31  ;;  %v7061_v28 = vld [vmem:[%s9831_s3 + $0x284] ss:$8 sps:$4 sm:$0xff]   ;;  %v9851_v63 = vshrl.u32 %v8007_v19, 16  ;;  %v608_v61 = vadd.f32 %v544_v32, %v7637_v59  ;;  %v899_v37 = vor.u32 %v9852_v45, %v896_v29  ;;  %v479_v4 = vunpack.c.l.bf16 %v7979_v50 }
  0x6a   : > { %3679 = vmatprep.subr.bf16.mxu0 %v7055_v51  ;;  %v9853_v51 = vshll.u32 %v8007_v19, 16  ;;  %v541_v24 = vmul.f32 %v477_v23, %v7632_v57  ;;  %v434_v34 = vld [vmem:[%s7614_s14 + $0x88] sm:$0xff]  ;;  %v8058_v38 = vpack.c.bf16 %v667_v40, %v665_v36  ;;  %v670_v32 = vmax.f32 %v606_v18, 0.0  ;;  %v7062_v36 = vld [vmem:[%s9831_s3 + $0x290] ss:$8 sps:$4 sm:$0xff]   ;;  %2426 = vmatpush1.bf16.msra.mxu1 %v7074_v10 }
  0x6b   : > { %v917_v58 = vrot.slane %v9851_v63, 7  ;;  %v672_v1 = vmax.f32 %v608_v61, 0.0  ;;  %v482_v29 = vunpack.c.h.bf16 %v8034_v52  ;;  %v8066_v50 = vsel %vm7718_vm2, 0, %v906_v55  ;;  %v7070_v61 = vld [vmem:[%s9831_s3 + $0x2a4] ss:$8 sps:$4 sm:$0xff]   ;;  %v8101_v63 = vld [vmem:[%s7614_s14 + $0x90] sm:$0xff] }
  0x6c   : > { %9992 = vst [vmem:[#allocation12_spill] sm:$0xff] %v8066_v50  ;;  %v605_v23 = vadd.f32 %v541_v24, %v7645_v0  ;;  %v8073_v40 = vsel %vm8038_vm5, %v7693_v39, 0  ;;  %v8080_v18 = vsel %vm7718_vm2, 0, %v899_v37  ;;  %v7085_v24 = vld [vmem:[%s9831_s3 + $0x474] ss:$8 sps:$4 sm:$0xff]   ;;  %v484_v39 = vunpack.c.h.bf16 %v434_v34 }
  0x6d   : > { %3680 = vmatpush1.bf16.msra.mxu0 %v7053_v21  ;;  %v543_v21 = vmul.f32 %v479_v4, %v7632_v57  ;;  %9993 = vst [vmem:[#allocation13_spill] sm:$0xff] %v8073_v40  ;;  %9994 = vst [vmem:[#allocation14_spill] sm:$0xff] %v8080_v18  ;;  %v8083_v55 = vpack.c.bf16 %v672_v1, %v670_v32  ;;  %v920_v37 = vor.u32 %v9853_v51, %v917_v58  ;;  %v7083_v4 = vld [vmem:[%s9831_s3 + $0x470] ss:$8 sps:$4 sm:$0xff]   ;;  %v7094_v51 = vld [vmem:[%s9831_s3 + $0x484] ss:$8 sps:$4 sm:$0xff]  }
  0x6e   : > { %3681 = vmatprep.subr.bf16.mxu0 %v7061_v28  ;;  %v9856_v28 = vshrl.u32 %v8058_v38, 16  ;;  %v669_v1 = vmax.f32 %v605_v23, 0.0  ;;  %v546_v32 = vmul.f32 %v482_v29, %v7628_v54  ;;  %v9863_v58 = vshll.u32 %v8058_v38, 16  ;;  %2427 = vmatprep.subr.bf16.mxu1 %v7085_v24 }
  0x6f   : > { %2293 = vmatmul.mubr.bf16.gmra.mrb[16].mxu1 %v8019_v33  ;;  %v607_v10 = vadd.f32 %v543_v21, %v7645_v0  ;;  %v9860_v21 = vshrl.u32 %v8083_v55, 16  ;;  %v548_v23 = vmul.f32 %v484_v39, %v7628_v54  ;;  %v481_v2 = vunpack.c.l.bf16 %v8034_v52 }
  0x70   : > { %3545 = vmatmul.mubr.bf16.gmra.mrb[16].mxu0 %v7866_v56  ;;  %2302 = vmatprep.mubr.bf16.mxu1 %v8066_v50  ;;  %v910_v45 = vrot.slane %v9856_v28, 7  ;;  %v483_v16 = vunpack.c.l.bf16 %v434_v34  ;;  %v8116_v28 = vld [vmem:[%s7614_s14 + $0x98] sm:$0xff]  ;;  %v9861_v39 = vshll.u32 %v8083_v55, 16  ;;  %v7068_v34 = vld [vmem:[%s9831_s3 + $0x2a0] ss:$8 sps:$4 sm:$0xff]   ;;  %v8132_v24 = vsel %vm7718_vm2, 0, %v920_v37 }
  0x71   : > { %3682 = vmatpush1.bf16.msra.mxu0 %v7059_v25  ;;  %3554 = vmatprep.mubr.bf16.mxu0 %v7895_v26  ;;  %v671_v29 = vmax.f32 %v607_v10, 0.0  ;;  %v610_v25 = vadd.f32 %v546_v32, %v7637_v59  ;;  %v931_v17 = vrot.slane %v9860_v21, 7  ;;  %v612_v11 = vadd.f32 %v548_v23, %v7637_v59  ;;  %9995 = vst [vmem:[#allocation15_spill] sm:$0xff] %v8132_v24  ;;  %v7100_v21 = vld [vmem:[%s9831_s3 + $0x494] ss:$8 sps:$4 sm:$0xff]  }
  0x72   : > { %3683 = vmatprep.subr.bf16.mxu0 %v7064_v3  ;;  %v486_v3 = vunpack.c.h.bf16 %v8101_v63  ;;  %2428 = vmatpush1.bf16.msra.mxu1 %v7083_v4  ;;  %v545_v32 = vmul.f32 %v481_v2, %v7632_v57  ;;  %v547_v52 = vmul.f32 %v483_v16, %v7632_v57  ;;  %v913_v23 = vor.u32 %v9863_v58, %v910_v45  ;;  %v7073_v16 = vld [vmem:[%s9831_s3 + $0x2b4] ss:$8 sps:$4 sm:$0xff]  }
  0x73   : > { %v8123_v12 = vpack.c.bf16 %v671_v29, %v669_v1  ;;  %v674_v10 = vmax.f32 %v610_v25, 0.0  ;;  %v676_v1 = vmax.f32 %v612_v11, 0.0  ;;  %2429 = vmatprep.subr.bf16.mxu1 %v7094_v51  ;;  %v488_v4 = vunpack.c.h.bf16 %v8116_v28  ;;  %v7092_v51 = vld [vmem:[%s9831_s3 + $0x480] ss:$8 sps:$4 sm:$0xff]  }
  0x74   : > { %v609_v29 = vadd.f32 %v545_v32, %v7645_v0  ;;  %v611_v37 = vadd.f32 %v547_v52, %v7645_v0  ;;  %v934_v45 = vor.u32 %v9861_v39, %v931_v17  ;;  %v1178_v52 = vrot.slane %v834_v43, 1 }
  0x75   : > { %3684 = vmatpush1.bf16.msra.mxu0 %v7062_v36  ;;  %v9862_v2 = vshrl.u32 %v8123_v12, 16  ;;  %v9867_v36 = vshll.u32 %v8123_v12, 16  ;;  %v8146_v11 = vpack.c.bf16 %v676_v1, %v674_v10  ;;  %v552_v25 = vmul.f32 %v488_v4, %v7628_v54  ;;  %v7079_v1 = vld [vmem:[%s9831_s3 + $0x2c4] ss:$8 sps:$4 sm:$0xff]  }
  0x76   : > { %3685 = vmatprep.subr.bf16.mxu0 %v7070_v61  ;;  %v550_v61 = vmul.f32 %v486_v3, %v7628_v54  ;;  %v673_v10 = vmax.f32 %v609_v29, 0.0  ;;  %v675_v32 = vmax.f32 %v611_v37, 0.0  ;;  %v7071_v3 = vld [vmem:[%s9831_s3 + $0x2b0] ss:$8 sps:$4 sm:$0xff]   ;;  %v485_v58 = vunpack.c.l.bf16 %v8101_v63  ;;  %2430 = vmatpush1.bf16.msra.mxu1 %v7092_v51 }
  0x77   : > { %2303 = vmatmul.mubr.bf16.gmra.mrb[20].mxu1 %v8080_v18  ;;  %v924_v17 = vrot.slane %v9862_v2, 7  ;;  %v9866_v4 = vshrl.u32 %v8146_v11, 16  ;;  %v9869_v29 = vshll.u32 %v8146_v11, 16  ;;  %v616_v43 = vadd.f32 %v552_v25, %v7637_v59  ;;  %2431 = vmatprep.subr.bf16.mxu1 %v7100_v21 }
  0x78   : > { %3555 = vmatmul.mubr.bf16.gmra.mrb[20].mxu0 %v7936_v22  ;;  %2312 = vmatprep.mubr.bf16.mxu1 %v8132_v24  ;;  %v614_v37 = vadd.f32 %v550_v61, %v7637_v59  ;;  %v8176_v39 = vpack.c.bf16 %v675_v32, %v673_v10  ;;  %v1179_v2 = vor.u32 %v1178_v52, %v831_v42  ;;  %v487_v49 = vunpack.c.l.bf16 %v8116_v28  ;;  %v8191_v10 = vld [vmem:[%s7614_s14 + $0xa8] sm:$0xff] }
  0x79   : > { %3686 = vmatpush1.bf16.msra.mxu0 %v7068_v34  ;;  %3564 = vmatprep.mubr.bf16.mxu0 %v7973_v6  ;;  %v927_v34 = vor.u32 %v9867_v36, %v924_v17  ;;  %v945_v61 = vrot.slane %v9866_v4, 7  ;;  %v680_v25 = vmax.f32 %v616_v43, 0.0  ;;  %v8188_v17 = vld [vmem:[%s7614_s14 + $0xa0] sm:$0xff]  ;;  %v8195_v42 = vsel %vm7718_vm2, 0, %v913_v23  ;;  %v7082_v43 = vld [vmem:[%s9831_s3 + $0x2d4] ss:$8 sps:$4 sm:$0xff]  }
  0x7a   : > { %3687 = vmatprep.subr.bf16.mxu0 %v7073_v16  ;;  %v678_v16 = vmax.f32 %v614_v37, 0.0  ;;  %9996 = vst [vmem:[#allocation16_spill] sm:$0xff] %v8195_v42  ;;  %v8199_v63 = vsel %vm7718_vm2, 0, %v934_v45  ;;  %v9868_v32 = vshrl.u32 %v8176_v39, 16  ;;  %v7077_v28 = vld [vmem:[%s9831_s3 + $0x2c0] ss:$8 sps:$4 sm:$0xff]   ;;  %v549_v23 = vmul.f32 %v485_v58, %v7632_v57  ;;  %2432 = vmatpush1.bf16.msra.mxu1 %v7098_v48 }
  0x7b   : > { %9997 = vst [vmem:[#allocation17_spill] sm:$0xff] %v8199_v63  ;;  %v948_v52 = vor.u32 %v9869_v29, %v945_v61  ;;  %v551_v45 = vmul.f32 %v487_v49, %v7632_v57  ;;  %v490_v36 = vunpack.c.h.bf16 %v8188_v17  ;;  %v492_v61 = vunpack.c.h.bf16 %v8191_v10  ;;  %v7080_v58 = vld [vmem:[%s9831_s3 + $0x2d0] ss:$8 sps:$4 sm:$0xff]   ;;  %v7104_v48 = vld [vmem:[%s9831_s3 + $0x4a0] ss:$8 sps:$4 sm:$0xff]  }
  0x7c   : > { %v8208_v37 = vpack.c.bf16 %v680_v25, %v678_v16  ;;  %v938_v21 = vrot.slane %v9868_v32, 7  ;;  %v8226_v49 = vsel %vm7718_vm2, 0, %v927_v34  ;;  %v7106_v16 = vld [vmem:[%s9831_s3 + $0x4a4] ss:$8 sps:$4 sm:$0xff]   ;;  %v10000_v32 = vshrl.u32 %v7687_v35, 16 }
  0x7d   : > { %3688 = vmatpush1.bf16.msra.mxu0 %v7071_v3  ;;  %v9998_v3 = vshll.u32 %v7687_v35, 16  ;;  %9999 = vst [vmem:[#allocation18_spill] sm:$0xff] %v8226_v49  ;;  %v10001_v34 = vshll.u32 %v7724_v62, 16  ;;  %v556_v25 = vmul.f32 %v492_v61, %v7628_v54  ;;  %v10005_v61 = vshrl.u32 %v7724_v62, 16  ;;  %2433 = vmatprep.subr.bf16.mxu1 %v7106_v16 }
  0x7e   : > { %3689 = vmatprep.subr.bf16.mxu0 %v7079_v1  ;;  %v613_v1 = vadd.f32 %v549_v23, %v7645_v0  ;;  %v10002_v23 = vshll.u32 %v8176_v39, 16  ;;  %2434 = vmatpush1.bf16.msra.mxu1 %v7104_v48  ;;  %v10019_v13 = vshll.u32 %v7821_v9, 16  ;;  %v10022_v27 = vshll.u32 %v7843_v31, 16 }
  0x7f   : > { %v1176_v4 = vrot.slane %v9998_v3, 1  ;;  %2313 = vmatmul.mubr.bf16.gmra.mrb[24].mxu1 %v8195_v42  ;;  %v615_v3 = vadd.f32 %v551_v45, %v7645_v0  ;;  %v1182_v51 = vrot.slane %v10001_v34, 1  ;;  %v554_v45 = vmul.f32 %v490_v36, %v7628_v54  ;;  %v8270_v42 = vld [vmem:[%s7614_s14 + $0xb0] sm:$0xff] }
  0x80   : > { %3565 = vmatmul.mubr.bf16.gmra.mrb[24].mxu0 %v7992_v7  ;;  %2322 = vmatprep.mubr.bf16.mxu1 %v8199_v63  ;;  %v941_v20 = vor.u32 %v10002_v23, %v938_v21  ;;  %v677_v15 = vmax.f32 %v613_v1, 0.0  ;;  %v8261_v36 = vsel %vm8038_vm5, %v1179_v2, 0  ;;  %v620_v23 = vadd.f32 %v556_v25, %v7637_v59 }
  0x81   : > { %v1177_v29 = vor.u32 %v1176_v4, %v10000_v32  ;;  %3690 = vmatpush1.bf16.msra.mxu0 %v7077_v28  ;;  %v7112_v4 = vld [vmem:[%s9831_s3 + $0x4b4] ss:$8 sps:$4 sm:$0xff]   ;;  %3574 = vmatprep.mubr.bf16.mxu0 %v8007_v19  ;;  %v7088_v32 = vld [vmem:[%s9831_s3 + $0x2e4] ss:$8 sps:$4 sm:$0xff]   ;;  %v8257_v28 = vsel %vm7718_vm2, 0, %v948_v52  ;;  %10004 = vst [vmem:[#allocation20_spill] sm:$0xff] %v8261_v36  ;;  %v1183_v1 = vor.u32 %v1182_v51, %v10005_v61  ;;  %v489_v63 = vunpack.c.l.bf16 %v8188_v17 }
  0x82   : > { %3691 = vmatprep.subr.bf16.mxu0 %v7082_v43  ;;  %10003 = vst [vmem:[#allocation19_spill] sm:$0xff] %v8257_v28  ;;  %v679_v21 = vmax.f32 %v615_v3, 0.0  ;;  %v618_v34 = vadd.f32 %v554_v45, %v7637_v59  ;;  %v10006_v52 = vshrl.u32 %v8208_v37, 16  ;;  %v491_v3 = vunpack.c.l.bf16 %v8191_v10  ;;  %v440_v43 = vld [vmem:[%s7614_s14 + $0xb8] sm:$0xff]  ;;  %v7086_v17 = vld [vmem:[%s9831_s3 + $0x2e0] ss:$8 sps:$4 sm:$0xff]   ;;  %2435 = vmatprep.subr.bf16.mxu1 %v7112_v4 }
  0x83   : > { %v10007_v51 = vshll.u32 %v7734_v5, 16  ;;  %v8285_v16 = vsel %vm7718_vm2, 0, %v941_v20  ;;  %v684_v45 = vmax.f32 %v620_v23, 0.0  ;;  %v7091_v10 = vld [vmem:[%s9831_s3 + $0x2f4] ss:$8 sps:$4 sm:$0xff]   ;;  %v8294_v48 = vsel %vm8038_vm5, %v1177_v29, 0 }
  0x84   : > { %v959_v24 = vrot.slane %v10006_v52, 7  ;;  %v8274_v2 = vpack.c.bf16 %v679_v21, %v677_v15  ;;  %10008 = vst [vmem:[#allocation21_spill] sm:$0xff] %v8285_v16  ;;  %v682_v25 = vmax.f32 %v618_v34, 0.0  ;;  %v553_v15 = vmul.f32 %v489_v63, %v7632_v57  ;;  %10009 = vst [vmem:[#allocation22_spill] sm:$0xff] %v8294_v48  ;;  %v7110_v52 = vld [vmem:[%s9831_s3 + $0x4b0] ss:$8 sps:$4 sm:$0xff]  }
  0x85   : > { %v1180_v61 = vrot.slane %v10007_v51, 1  ;;  %3692 = vmatpush1.bf16.msra.mxu0 %v7080_v58  ;;  %v555_v21 = vmul.f32 %v491_v3, %v7632_v57  ;;  %v10010_v20 = vshrl.u32 %v7734_v5, 16  ;;  %v494_v4 = vunpack.c.h.bf16 %v8270_v42  ;;  %2436 = vmatpush1.bf16.msra.mxu1 %v7110_v52 }
  0x86   : > { %3693 = vmatprep.subr.bf16.mxu0 %v7088_v32  ;;  %v9882_v58 = vshrl.u32 %v8274_v2, 16  ;;  %v8301_v23 = vpack.c.bf16 %v684_v45, %v682_v25  ;;  %v617_v63 = vadd.f32 %v553_v15, %v7645_v0  ;;  %v496_v32 = vunpack.c.h.bf16 %v440_v43  ;;  %v7118_v15 = vld [vmem:[%s9831_s3 + $0x4c4] ss:$8 sps:$4 sm:$0xff]  }
  0x87   : > { %v8299_v34 = vor.u32 %v1180_v61, %v10010_v20  ;;  %2323 = vmatmul.mubr.bf16.gmra.mrb[28].mxu1 %v8226_v49  ;;  %v10011_v29 = vshll.u32 %v8208_v37, 16  ;;  %v619_v61 = vadd.f32 %v555_v21, %v7645_v0  ;;  %v10012_v25 = vshll.u32 %v7792_v47, 16  ;;  %v7089_v20 = vld [vmem:[%s9831_s3 + $0x2f0] ss:$8 sps:$4 sm:$0xff]   ;;  %2437 = vmatprep.subr.bf16.mxu1 %v7118_v15 }
  0x88   : > { %3575 = vmatmul.mubr.bf16.gmra.mrb[28].mxu0 %v8058_v38  ;;  %2332 = vmatprep.mubr.bf16.mxu1 %v8257_v28  ;;  %v681_v21 = vmax.f32 %v617_v63, 0.0  ;;  %v558_v51 = vmul.f32 %v494_v4, %v7628_v54  ;;  %v560_v28 = vmul.f32 %v496_v32, %v7628_v54  ;;  %v493_v4 = vunpack.c.l.bf16 %v8270_v42  ;;  %v8356_v42 = vld [vmem:[%s7614_s14 + $0xc0] sm:$0xff] }
  0x89   : > { %v962_v3 = vor.u32 %v10011_v29, %v959_v24  ;;  %v1186_v45 = vrot.slane %v10012_v25, 1  ;;  %3694 = vmatpush1.bf16.msra.mxu0 %v7086_v17  ;;  %v952_v24 = vrot.slane %v9882_v58, 7  ;;  %v9887_v29 = vshrl.u32 %v8301_v23, 16  ;;  %3697 = vmatprep.mubr.bf16.mxu0 %v8073_v40  ;;  %v7097_v17 = vld [vmem:[%s9831_s3 + $0x604] ss:$8 sps:$4 sm:$0xff]  }
  0x8a   : > { %3695 = vmatprep.subr.bf16.mxu0 %v7091_v10  ;;  %v683_v49 = vmax.f32 %v619_v61, 0.0  ;;  %v10013_v58 = vshrl.u32 %v7792_v47, 16  ;;  %v622_v10 = vadd.f32 %v558_v51, %v7637_v59  ;;  %v495_v50 = vunpack.c.l.bf16 %v440_v43  ;;  %v7116_v61 = vld [vmem:[%s9831_s3 + $0x4c0] ss:$8 sps:$4 sm:$0xff]  }
  0x8b   : > { %v973_v63 = vrot.slane %v9887_v29, 7  ;;  %v8346_v32 = vsel %vm7718_vm2, 0, %v962_v3  ;;  %v624_v51 = vadd.f32 %v560_v28, %v7637_v59  ;;  %v7095_v43 = vld [vmem:[%s9831_s3 + $0x600] ss:$8 sps:$4 sm:$0xff]   ;;  %v10017_v52 = vshll.u32 %v8274_v2, 16  ;;  %2438 = vmatpush1.bf16.msra.mxu1 %v7116_v61 }
  0x8c   : > { %v8335_v18 = vor.u32 %v1186_v45, %v10013_v58  ;;  %10014 = vst [vmem:[#allocation23_spill] sm:$0xff] %v8346_v32  ;;  %v8350_v58 = vsel %vm8038_vm5, %v1183_v1, 0  ;;  %v8352_v45 = vpack.c.bf16 %v683_v49, %v681_v21  ;;  %v686_v29 = vmax.f32 %v622_v10, 0.0  ;;  %v442_v49 = vld [vmem:[%s7614_s14 + $0xc8] sm:$0xff]  ;;  %v7103_v28 = vld [vmem:[%s9831_s3 + $0x614] ss:$8 sps:$4 sm:$0xff]  }
  0x8d   : > { %10015 = vst [vmem:[#allocation24_spill] sm:$0xff] %v8350_v58  ;;  %3696 = vmatpush1.bf16.msra.mxu0 %v7089_v20  ;;  %v955_v3 = vor.u32 %v10017_v52, %v952_v24  ;;  %v557_v25 = vmul.f32 %v493_v4, %v7632_v57  ;;  %v559_v1 = vmul.f32 %v495_v50, %v7632_v57  ;;  %v10018_v15 = vshll.u32 %v8301_v23, 16  ;;  %v7101_v10 = vld [vmem:[%s9831_s3 + $0x610] ss:$8 sps:$4 sm:$0xff]  }
  0x8e   : > { %10016 = vst [vmem:[#allocation25_spill] sm:$0xff] %v8352_v45  ;;  %4532 = vmatprep.subr.bf16.mxu0 %v7097_v17  ;;  %v9894_v21 = vshrl.u32 %v8352_v45, 16  ;;  %v688_v33 = vmax.f32 %v624_v51, 0.0  ;;  %v1184_v24 = vrot.slane %v10019_v13, 1  ;;  %v498_v52 = vunpack.c.h.bf16 %v8356_v42  ;;  %v7122_v50 = vld [vmem:[%s9831_s3 + $0x4d0] ss:$8 sps:$4 sm:$0xff]  }
  0x8f   : > { %v976_v20 = vor.u32 %v10018_v15, %v973_v63  ;;  %v621_v17 = vadd.f32 %v557_v25, %v7645_v0  ;;  %v623_v4 = vadd.f32 %v559_v1, %v7645_v0  ;;  %v7124_v63 = vld [vmem:[%s9831_s3 + $0x4d4] ss:$8 sps:$4 sm:$0xff]   ;;  %2333 = vmatmul.mubr.bf16.gmra.mrb[32].mxu1 %v8285_v16  ;;  %v7109_v25 = vld [vmem:[%s9831_s3 + $0x624] ss:$8 sps:$4 sm:$0xff]   ;;  %v10021_v1 = vshrl.u32 %v7821_v9, 16 }
  0x90   : > { %3698 = vmatmul.mubr.bf16.vlgmr.msra.gmra.mrb[0].mxu0 %v8073_v40  ;;  %v966_v13 = vrot.slane %v9894_v21, 7  ;;  %v8391_v51 = vpack.c.bf16 %v688_v33, %v686_v29  ;;  %v500_v15 = vunpack.c.h.bf16 %v442_v49  ;;  %2342 = vmatprep.mubr.bf16.mxu1 %v8346_v32  ;;  %v562_v16 = vmul.f32 %v498_v52, %v7628_v54  ;;  %v7130_v29 = vld [vmem:[%s9831_s3 + $0x4e4] ss:$8 sps:$4 sm:$0xff]  }
  0x91   : > { %v8395_v61 = vor.u32 %v1184_v24, %v10021_v1  ;;  %4533 = vmatpush1.bf16.msra.mxu0 %v7095_v43  ;;  %v685_v40 = vmax.f32 %v621_v17, 0.0  ;;  %v687_v21 = vmax.f32 %v623_v4, 0.0  ;;  %v1190_v33 = vrot.slane %v10022_v27, 1  ;;  %3707 = vmatprep.mubr.bf16.mxu0 %v8261_v36  ;;  %v8435_v27 = vld [vmem:[%s7614_s14 + $0xd0] sm:$0xff] }
  0x92   : > { %10020 = vst [vmem:[#allocation26_spill] sm:$0xff] %v8391_v51  ;;  %v8410_v24 = vsel %vm7718_vm2, 0, %v955_v3  ;;  %4534 = vmatprep.subr.bf16.mxu0 %v7103_v28  ;;  %v8415_v43 = vsel %vm8038_vm5, %v8299_v34, 0  ;;  %v9901_v17 = vshrl.u32 %v8391_v51, 16  ;;  %v564_v52 = vmul.f32 %v500_v15, %v7628_v54  ;;  %2439 = vmatprep.subr.bf16.mxu1 %v7124_v63  ;;  %v7107_v63 = vld [vmem:[%s9831_s3 + $0x620] ss:$8 sps:$4 sm:$0xff]  }
  0x93   : > { %10023 = vst [vmem:[#allocation27_spill] sm:$0xff] %v8410_v24  ;;  %10024 = vst [vmem:[#allocation28_spill] sm:$0xff] %v8415_v43  ;;  %v8419_v4 = vpack.c.bf16 %v687_v21, %v685_v40  ;;  %v626_v1 = vadd.f32 %v562_v16, %v7637_v59  ;;  %v10026_v3 = vshrl.u32 %v7843_v31, 16  ;;  %v8429_v34 = vsel %vm7718_vm2, 0, %v976_v20  ;;  %2440 = vmatpush1.bf16.msra.mxu1 %v7122_v50  ;;  %v7115_v50 = vld [vmem:[%s9831_s3 + $0x634] ss:$8 sps:$4 sm:$0xff]  }
  0x94   : > { %10027 = vst [vmem:[#allocation30_spill] sm:$0xff] %v8429_v34  ;;  %v987_v28 = vrot.slane %v9901_v17, 7  ;;  %v497_v40 = vunpack.c.l.bf16 %v8356_v42  ;;  %v499_v21 = vunpack.c.l.bf16 %v442_v49  ;;  %v10028_v16 = vshll.u32 %v8352_v45, 16  ;;  %v8445_v17 = vld [vmem:[%s7614_s14 + $0xd8] sm:$0xff]  ;;  %2441 = vmatprep.subr.bf16.mxu1 %v7130_v29 }
  0x95   : > { %10025 = vst [vmem:[#allocation29_spill] sm:$0xff] %v8419_v4  ;;  %v8425_v32 = vor.u32 %v1190_v33, %v10026_v3  ;;  %4535 = vmatpush1.bf16.msra.mxu0 %v7101_v10  ;;  %v9902_v20 = vshrl.u32 %v8419_v4, 16  ;;  %v628_v33 = vadd.f32 %v564_v52, %v7637_v59  ;;  %v690_v3 = vmax.f32 %v626_v1, 0.0  ;;  %v7128_v52 = vld [vmem:[%s9831_s3 + $0x4e0] ss:$8 sps:$4 sm:$0xff]  }
  0x96   : > { %v969_v15 = vor.u32 %v10028_v16, %v966_v13  ;;  %4536 = vmatprep.subr.bf16.mxu0 %v7109_v25  ;;  %v10029_v42 = vshll.u32 %v8391_v51, 16  ;;  %v561_v13 = vmul.f32 %v497_v40, %v7632_v57  ;;  %v563_v16 = vmul.f32 %v499_v21, %v7632_v57  ;;  %v7136_v10 = vld [vmem:[%s9831_s3 + $0x4f4] ss:$8 sps:$4 sm:$0xff]   ;;  %v7113_v21 = vld [vmem:[%s9831_s3 + $0x630] ss:$8 sps:$4 sm:$0xff]  }
  0x97   : > { %v980_v25 = vrot.slane %v9902_v20, 7  ;;  %v692_v29 = vmax.f32 %v628_v33, 0.0  ;;  %v10030_v1 = vshll.u32 %v7866_v56, 16  ;;  %2343 = vmatmul.mubr.bf16.gmra.mrb[36].mxu1 %v8410_v24  ;;  %v8471_v40 = vsel %vm8038_vm5, %v8335_v18, 0 }
  0x98   : > { %v990_v49 = vor.u32 %v10029_v42, %v987_v28  ;;  %v502_v42 = vunpack.c.h.bf16 %v8435_v27  ;;  %3708 = vmatmul.mubr.bf16.gmra.mrb[4].mxu0 %v8294_v48  ;;  %10031 = vst [vmem:[#allocation31_spill] sm:$0xff] %v8471_v40  ;;  %v625_v33 = vadd.f32 %v561_v13, %v7645_v0  ;;  %v504_v20 = vunpack.c.h.bf16 %v8445_v17  ;;  %2352 = vmatprep.mubr.bf16.mxu1 %v8429_v34  ;;  %v7121_v13 = vld [vmem:[%s9831_s3 + $0x644] ss:$8 sps:$4 sm:$0xff]  }
  0x99   : > { %v1188_v28 = vrot.slane %v10030_v1, 1  ;;  %v627_v1 = vadd.f32 %v563_v16, %v7645_v0  ;;  %3717 = vmatprep.mubr.bf16.mxu0 %v8350_v58  ;;  %v8483_v24 = vsel %vm7718_vm2, 0, %v969_v15  ;;  %v8485_v18 = vpack.c.bf16 %v692_v29, %v690_v3  ;;  %4537 = vmatpush1.bf16.msra.mxu0 %v7107_v63 }
  0x9a   : > { %10032 = vst [vmem:[#allocation32_spill] sm:$0xff] %v8483_v24  ;;  %v10033_v48 = vshrl.u32 %v7866_v56, 16  ;;  %v10034_v16 = vshll.u32 %v7895_v26, 16  ;;  %v689_v34 = vmax.f32 %v625_v33, 0.0  ;;  %v566_v14 = vmul.f32 %v502_v42, %v7628_v54  ;;  %2442 = vmatpush1.bf16.msra.mxu1 %v7128_v52  ;;  %4538 = vmatprep.subr.bf16.mxu0 %v7115_v50  ;;  %v445_v42 = vld [vmem:[%s7614_s14 + $0xe0] sm:$0xff] }
  0x9b   : > { %v691_v58 = vmax.f32 %v627_v1, 0.0  ;;  %v568_v15 = vmul.f32 %v504_v20, %v7628_v54  ;;  %v8503_v3 = vsel %vm7718_vm2, 0, %v990_v49  ;;  %v10036_v29 = vshll.u32 %v8419_v4, 16  ;;  %2443 = vmatprep.subr.bf16.mxu1 %v7136_v10  ;;  %v7142_v20 = vld [vmem:[%s9831_s3 + $0x504] ss:$8 sps:$4 sm:$0xff]  }
  0x9c   : > { %v8489_v36 = vor.u32 %v1188_v28, %v10033_v48  ;;  %v1194_v41 = vrot.slane %v10034_v16, 1  ;;  %v7134_v48 = vld [vmem:[%s9831_s3 + $0x4f0] ss:$8 sps:$4 sm:$0xff]   ;;  %10035 = vst [vmem:[#allocation33_spill] sm:$0xff] %v8503_v3  ;;  %v9917_v63 = vshrl.u32 %v8485_v18, 16  ;;  %v10037_v33 = vshrl.u32 %v7895_v26, 16 }
  0x9d   : > { %v983_v28 = vor.u32 %v10036_v29, %v980_v25  ;;  %v8512_v52 = vpack.c.bf16 %v691_v58, %v689_v34  ;;  %v7119_v49 = vld [vmem:[%s9831_s3 + $0x640] ss:$8 sps:$4 sm:$0xff]   ;;  %v630_v25 = vadd.f32 %v566_v14, %v7637_v59  ;;  %v632_v50 = vadd.f32 %v568_v15, %v7637_v59  ;;  %v7127_v14 = vld [vmem:[%s9831_s3 + $0x654] ss:$8 sps:$4 sm:$0xff]   ;;  %4539 = vmatpush1.bf16.msra.mxu0 %v7113_v21 }
  0x9e   : > { %v8521_v1 = vor.u32 %v1194_v41, %v10037_v33  ;;  %v1001_v10 = vrot.slane %v9917_v63, 7  ;;  %v501_v16 = vunpack.c.l.bf16 %v8435_v27  ;;  %v503_v58 = vunpack.c.l.bf16 %v8445_v17  ;;  %v446_v63 = vld [vmem:[%s7614_s14 + $0xe8] sm:$0xff]  ;;  %2444 = vmatpush1.bf16.msra.mxu1 %v7134_v48  ;;  %4540 = vmatprep.subr.bf16.mxu0 %v7121_v13 }
  0x9f   : > { %v10038_v34 = vshll.u32 %v7936_v22, 16  ;;  %v9918_v15 = vshrl.u32 %v8512_v52, 16  ;;  %v9927_v41 = vshll.u32 %v8512_v52, 16  ;;  %v694_v33 = vmax.f32 %v630_v25, 0.0  ;;  %2606 = vmatprep.subr.bf16.mxu1 %v7142_v20  ;;  %2353 = vmatmul.mubr.bf16.gmra.mrb[40].mxu1 %v8483_v24 }
  0xa0   : > { %v696_v44 = vmax.f32 %v632_v50, 0.0  ;;  %v8539_v17 = vsel %vm8038_vm5, %v8395_v61, 0  ;;  %v565_v27 = vmul.f32 %v501_v16, %v7632_v57  ;;  %3718 = vmatmul.mubr.bf16.gmra.mrb[8].mxu0 %v8415_v43  ;;  %v10041_v48 = vshrl.u32 %v7936_v22, 16  ;;  %2362 = vmatprep.mubr.bf16.mxu1 %v8503_v3 }
  0xa1   : > { %v1192_v29 = vrot.slane %v10038_v34, 1  ;;  %10039 = vst [vmem:[#allocation34_spill] sm:$0xff] %v8539_v17  ;;  %v567_v34 = vmul.f32 %v503_v58, %v7632_v57  ;;  %v994_v21 = vrot.slane %v9918_v15, 7  ;;  %v506_v61 = vunpack.c.h.bf16 %v445_v42  ;;  %3727 = vmatprep.mubr.bf16.mxu0 %v8471_v40  ;;  %4541 = vmatpush1.bf16.msra.mxu0 %v7119_v49  ;;  %v7131_v49 = vld [vmem:[%s9831_s3 + $0x660] ss:$8 sps:$4 sm:$0xff]  }
  0xa2   : > { %v8547_v25 = vpack.c.bf16 %v696_v44, %v694_v33  ;;  %v8558_v13 = vsel %vm8038_vm5, %v8425_v32, 0  ;;  %v629_v20 = vadd.f32 %v565_v27, %v7645_v0  ;;  %v7125_v44 = vld [vmem:[%s9831_s3 + $0x650] ss:$8 sps:$4 sm:$0xff]   ;;  %v508_v58 = vunpack.c.h.bf16 %v446_v63  ;;  %4542 = vmatprep.subr.bf16.mxu0 %v7127_v14 }
  0xa3   : > { %v8551_v50 = vor.u32 %v1192_v29, %v10041_v48  ;;  %10042 = vst [vmem:[#allocation36_spill] sm:$0xff] %v8558_v13  ;;  %v631_v16 = vadd.f32 %v567_v34, %v7645_v0  ;;  %v7133_v29 = vld [vmem:[%s9831_s3 + $0x664] ss:$8 sps:$4 sm:$0xff]   ;;  %v8570_v33 = vsel %vm7718_vm2, 0, %v983_v28  ;;  %v10044_v32 = vshll.u32 %v8485_v18, 16 }
  0xa4   : > { %10040 = vst [vmem:[#allocation35_spill] sm:$0xff] %v8547_v25  ;;  %10043 = vst [vmem:[#allocation37_spill] sm:$0xff] %v8570_v33  ;;  %v997_v27 = vor.u32 %v9927_v41, %v994_v21  ;;  %v9928_v34 = vshrl.u32 %v8547_v25, 16  ;;  %v693_v15 = vmax.f32 %v629_v20, 0.0  ;;  %v570_v40 = vmul.f32 %v506_v61, %v7628_v54  ;;  %v447_v20 = vld [vmem:[%s7614_s14 + $0xf0] sm:$0xff]  ;;  %v448_v41 = vld [vmem:[%s7614_s14 + $0xf8] sm:$0xff] }
  0xa5   : > { %v1004_v48 = vor.u32 %v10044_v32, %v1001_v10  ;;  %v695_v3 = vmax.f32 %v631_v16, 0.0  ;;  %v572_v24 = vmul.f32 %v508_v58, %v7628_v54  ;;  %v10045_v10 = vshll.u32 %v7973_v6, 16  ;;  %4543 = vmatpush1.bf16.msra.mxu0 %v7125_v44 }
  0xa6   : > { %v1015_v28 = vrot.slane %v9928_v34, 7  ;;  %v505_v21 = vunpack.c.l.bf16 %v445_v42  ;;  %v634_v14 = vadd.f32 %v570_v40, %v7637_v59  ;;  %v507_v58 = vunpack.c.l.bf16 %v446_v63  ;;  %v7139_v34 = vld [vmem:[%s9831_s3 + $0x674] ss:$8 sps:$4 sm:$0xff]   ;;  %4544 = vmatprep.subr.bf16.mxu0 %v7133_v29 }
  0xa7   : > { %v1198_v32 = vrot.slane %v10045_v10, 1  ;;  %v8588_v16 = vpack.c.bf16 %v695_v3, %v693_v15  ;;  %v636_v61 = vadd.f32 %v572_v24, %v7637_v59  ;;  %v8598_v42 = vsel %vm7718_vm2, 0, %v1004_v48  ;;  %2363 = vmatmul.mubr.bf16.gmra.mrb[44].mxu1 %v8570_v33 }
  0xa8   : > { %10047 = vst [vmem:[#allocation39_spill] sm:$0xff] %v8598_v42  ;;  %v10048_v10 = vshrl.u32 %v7973_v6, 16  ;;  %v569_v3 = vmul.f32 %v505_v21, %v7632_v57  ;;  %v10049_v40 = vshll.u32 %v7992_v7, 16  ;;  %v8610_v63 = vsel %vm8038_vm5, %v8489_v36, 0  ;;  %3728 = vmatmul.mubr.bf16.gmra.mrb[12].mxu0 %v8539_v17  ;;  %2372 = vmatprep.mubr.bf16.mxu1 %v8598_v42 }
  0xa9   : > { %10046 = vst [vmem:[#allocation38_spill] sm:$0xff] %v8588_v16  ;;  %10050 = vst [vmem:[#allocation40_spill] sm:$0xff] %v8610_v63  ;;  %v698_v53 = vmax.f32 %v634_v14, 0.0  ;;  %v700_v48 = vmax.f32 %v636_v61, 0.0  ;;  %v8617_v44 = vsel %vm7718_vm2, 0, %v997_v27  ;;  %v571_v36 = vmul.f32 %v507_v58, %v7632_v57  ;;  %3737 = vmatprep.mubr.bf16.mxu0 %v8558_v13  ;;  %4545 = vmatpush1.bf16.msra.mxu0 %v7131_v49 }
  0xaa   : > { %v8602_v43 = vor.u32 %v1198_v32, %v10048_v10  ;;  %v1196_v24 = vrot.slane %v10049_v40, 1  ;;  %10051 = vst [vmem:[#allocation41_spill] sm:$0xff] %v8617_v44  ;;  %v8622_v32 = vsel %vm8038_vm5, %v8521_v1, 0  ;;  %v633_v21 = vadd.f32 %v569_v3, %v7645_v0  ;;  %v7137_v1 = vld [vmem:[%s9831_s3 + $0x670] ss:$8 sps:$4 sm:$0xff]   ;;  %4546 = vmatprep.subr.bf16.mxu0 %v7139_v34 }
  0xab   : > { %10052 = vst [vmem:[#allocation42_spill] sm:$0xff] %v8622_v32  ;;  %v10053_v29 = vshll.u32 %v8547_v25, 16  ;;  %v8630_v61 = vpack.c.bf16 %v700_v48, %v698_v53  ;;  %v10055_v27 = vshrl.u32 %v7992_v7, 16  ;;  %v510_v40 = vunpack.c.h.bf16 %v447_v20  ;;  %v7145_v58 = vld [vmem:[%s9831_s3 + $0x684] ss:$8 sps:$4 sm:$0xff]  }
  0xac   : > { %v635_v3 = vadd.f32 %v571_v36, %v7645_v0  ;;  %v697_v15 = vmax.f32 %v633_v21, 0.0  ;;  %v10056_v53 = vshll.u32 %v8007_v19, 16  ;;  %v10058_v36 = vshrl.u32 %v8007_v19, 16  ;;  %v7143_v21 = vld [vmem:[%s9831_s3 + $0x680] ss:$8 sps:$4 sm:$0xff]  }
  0xad   : > { %v1018_v14 = vor.u32 %v10053_v29, %v1015_v28  ;;  %10054 = vst [vmem:[#allocation43_spill] sm:$0xff] %v8630_v61  ;;  %v8634_v10 = vor.u32 %v1196_v24, %v10055_v27  ;;  %v512_v28 = vunpack.c.h.bf16 %v448_v41  ;;  %v10057_v24 = vshrl.u32 %v8588_v16, 16  ;;  %4547 = vmatpush1.bf16.msra.mxu0 %v7137_v1 }
  0xae   : > { %v1202_v48 = vrot.slane %v10056_v53, 1  ;;  %v9941_v27 = vshll.u32 %v8588_v16, 16  ;;  %v9939_v42 = vshrl.u32 %v8630_v61, 16  ;;  %v699_v13 = vmax.f32 %v635_v3, 0.0  ;;  %4548 = vmatprep.subr.bf16.mxu0 %v7145_v58 }
  0xaf   : > { %v1008_v29 = vrot.slane %v10057_v24, 7  ;;  %v574_v33 = vmul.f32 %v510_v40, %v7628_v54  ;;  %v576_v17 = vmul.f32 %v512_v28, %v7628_v54  ;;  %v8660_v53 = vsel %vm7718_vm2, 0, %v1018_v14  ;;  %v7151_v54 = vld [vmem:[%s9831_s3 + $0x694] ss:$8 sps:$4 sm:$0xff]   ;;  %2373 = vmatmul.mubr.bf16.gmra.mrb[48].mxu1 %v8617_v44 }
  0xb0   : > { %v8653_v49 = vor.u32 %v1202_v48, %v10058_v36  ;;  %10059 = vst [vmem:[#allocation44_spill] sm:$0xff] %v8660_v53  ;;  %v509_v34 = vunpack.c.l.bf16 %v447_v20  ;;  %v511_v3 = vunpack.c.l.bf16 %v448_v41  ;;  %v1029_v40 = vrot.slane %v9939_v42, 7  ;;  %3738 = vmatmul.mubr.bf16.gmra.mrb[16].mxu0 %v8610_v63  ;;  %2382 = vmatprep.mubr.bf16.mxu1 %v8660_v53 }
  0xb1   : > { %v8668_v28 = vpack.c.bf16 %v699_v13, %v697_v15  ;;  %v638_v48 = vadd.f32 %v574_v33, %v7637_v59  ;;  %v640_v36 = vadd.f32 %v576_v17, %v7637_v59  ;;  %v10061_v41 = vshll.u32 %v8058_v38, 16  ;;  %3747 = vmatprep.mubr.bf16.mxu0 %v8622_v32  ;;  %4549 = vmatpush1.bf16.msra.mxu0 %v7143_v21 }
  0xb2   : > { %v573_v14 = vmul.f32 %v509_v34, %v7632_v57  ;;  %v575_v24 = vmul.f32 %v511_v3, %v7632_v57  ;;  %v1011_v13 = vor.u32 %v9941_v27, %v1008_v29  ;;  %v8686_v57 = vsel %vm8038_vm5, %v8551_v50, 0  ;;  %v7149_v34 = vld [vmem:[%s9831_s3 + $0x690] ss:$8 sps:$4 sm:$0xff]   ;;  %4550 = vmatprep.subr.bf16.mxu0 %v7151_v54 }
  0xb3   : > { %10060 = vst [vmem:[#allocation45_spill] sm:$0xff] %v8668_v28  ;;  %v1200_v20 = vrot.slane %v10061_v41, 1  ;;  %v9940_v33 = vshrl.u32 %v8668_v28, 16  ;;  %v702_v15 = vmax.f32 %v638_v48, 0.0  ;;  %v704_v59 = vmax.f32 %v640_v36, 0.0  ;;  %10062 = vst [vmem:[#allocation46_spill] sm:$0xff] %v8686_v57 }
  0xb4   : > { %v637_v17 = vadd.f32 %v573_v14, %v7645_v0  ;;  %v639_v1 = vadd.f32 %v575_v24, %v7645_v0  ;;  %v10063_v58 = vshrl.u32 %v8058_v38, 16  ;;  %v10064_v3 = vshll.u32 %v8630_v61, 16  ;;  %v7157_v0 = vld [vmem:[%s9831_s3 + $0x6a4] ss:$8 sps:$4 sm:$0xff]  }
  0xb5   : > { %v9943_v36 = vshll.u32 %v8668_v28, 16  ;;  %v8700_v41 = vpack.c.bf16 %v704_v59, %v702_v15  ;;  %v10066_v50 = vshll.u32 %v8123_v12, 16  ;;  %v1022_v24 = vrot.slane %v9940_v33, 7  ;;  %4551 = vmatpush1.bf16.msra.mxu0 %v7149_v34 }
  0xb6   : > { %v8692_v29 = vor.u32 %v1200_v20, %v10063_v58  ;;  %v1032_v48 = vor.u32 %v10064_v3, %v1029_v40  ;;  %v701_v20 = vmax.f32 %v637_v17, 0.0  ;;  %v703_v58 = vmax.f32 %v639_v1, 0.0  ;;  %v7155_v3 = vld [vmem:[%s9831_s3 + $0x6a0] ss:$8 sps:$4 sm:$0xff]   ;;  %4552 = vmatprep.subr.bf16.mxu0 %v7157_v0 }
  0xb7   : > { %10065 = vst [vmem:[#allocation47_spill] sm:$0xff] %v8700_v41  ;;  %v1204_v14 = vrot.slane %v10066_v50, 1  ;;  %v10067_v42 = vshll.u32 %v8146_v11, 16  ;;  %v8713_v15 = vsel %vm7718_vm2, 0, %v1011_v13  ;;  %v9942_v59 = vshrl.u32 %v8700_v41, 16 }
  0xb8   : > { %10068 = vst [vmem:[#allocation48_spill] sm:$0xff] %v8713_v15  ;;  %v9948_v21 = vshll.u32 %v8700_v41, 16  ;;  %v8720_v50 = vpack.c.bf16 %v703_v58, %v701_v20  ;;  %v10069_v17 = vshrl.u32 %v8123_v12, 16  ;;  %v10071_v13 = vshll.u32 %v8176_v39, 16  ;;  %2383 = vmatmul.mubr.bf16.gmra.mrb[52].mxu1 %v8713_v15  ;;  %3748 = vmatmul.mubr.bf16.gmra.mrb[20].mxu0 %v8686_v57 }
  0xb9   : > { %v1210_v40 = vrot.slane %v10067_v42, 1  ;;  %v10070_v42 = vshrl.u32 %v8146_v11, 16  ;;  %v8734_v27 = vsel %vm7718_vm2, 0, %v1032_v48  ;;  %v8739_v20 = vsel %vm8038_vm5, %v8602_v43, 0  ;;  %v7163_v48 = vld [vmem:[%s9831_s3 + $0x6b4] ss:$8 sps:$4 sm:$0xff]   ;;  %4553 = vmatpush1.bf16.msra.mxu0 %v7155_v3 }
  0xba   : > { %v8724_v1 = vor.u32 %v1204_v14, %v10069_v17  ;;  %v1208_v33 = vrot.slane %v10071_v13, 1  ;;  %10072 = vst [vmem:[#allocation49_spill] sm:$0xff] %v8734_v27  ;;  %10073 = vst [vmem:[#allocation50_spill] sm:$0xff] %v8739_v20  ;;  %v1043_v14 = vrot.slane %v9942_v59, 7  ;;  %v10074_v58 = vshll.u32 %v8208_v37, 16  ;;  %2392 = vmatprep.mubr.bf16.mxu1 %v8734_v27  ;;  %3757 = vmatprep.mubr.bf16.mxu0 %v8739_v20 }
  0xbb   : > { %v8728_v54 = vor.u32 %v1210_v40, %v10070_v42  ;;  %v1025_v17 = vor.u32 %v9943_v36, %v1022_v24  ;;  %v10075_v42 = vshrl.u32 %v8176_v39, 16  ;;  %v10076_v13 = vshrl.u32 %v8208_v37, 16  ;;  %4554 = vmatprep.subr.bf16.mxu0 %v7163_v48 }
  0xbc   : > { %v1214_v40 = vrot.slane %v10074_v58, 1  ;;  %v10077_v0 = vshll.u32 %v8274_v2, 16  ;;  %v1046_v59 = vor.u32 %v9948_v21, %v1043_v14  ;;  %v10078_v36 = vshll.u32 %v8301_v23, 16  ;;  %v7169_v14 = vld [vmem:[%s9831_s3 + $0x6c4] ss:$8 sps:$4 sm:$0xff]  }
  0xbd   : > { %v8755_v34 = vor.u32 %v1208_v33, %v10075_v42  ;;  %v10079_v33 = vshll.u32 %v8352_v45, 16  ;;  %v10080_v15 = vshll.u32 %v8391_v51, 16  ;;  %v10085_v3 = vshrl.u32 %v8391_v51, 16 }
  0xbe   : > { %v8759_v58 = vor.u32 %v1214_v40, %v10076_v13  ;;  %v1212_v24 = vrot.slane %v10077_v0, 1  ;;  %v1218_v43 = vrot.slane %v10078_v36, 1  ;;  %v8776_v13 = vsel %vm8038_vm5, %v8634_v10, 0  ;;  %v7161_v36 = vld [vmem:[%s9831_s3 + $0x6b0] ss:$8 sps:$4 sm:$0xff]  }
  0xbf   : > { %v1216_v42 = vrot.slane %v10079_v33, 1  ;;  %v1222_v40 = vrot.slane %v10080_v15, 1  ;;  %10081 = vst [vmem:[#allocation51_spill] sm:$0xff] %v8776_v13  ;;  %v10082_v0 = vshrl.u32 %v8274_v2, 16  ;;  %v10083_v33 = vshrl.u32 %v8301_v23, 16  ;;  %4555 = vmatpush1.bf16.msra.mxu0 %v7161_v36 }
  0xc0   : > { %v10084_v10 = vshrl.u32 %v8352_v45, 16  ;;  %v10087_v53 = vshll.u32 %v8419_v4, 16  ;;  %v10094_v63 = vshrl.u32 %v8512_v52, 16  ;;  %v10095_v41 = vshll.u32 %v8547_v25, 16  ;;  %4556 = vmatprep.subr.bf16.mxu0 %v7169_v14  ;;  %3758 = vmatmul.mubr.bf16.gmra.mrb[24].mxu0 %v8776_v13 }
  0xc1   : > { %v8780_v27 = vor.u32 %v1212_v24, %v10082_v0  ;;  %v8791_v21 = vor.u32 %v1218_v43, %v10083_v33  ;;  %v8799_v24 = vor.u32 %v1222_v40, %v10085_v3  ;;  %v10086_v0 = vshrl.u32 %v8720_v50, 16  ;;  %v7167_v43 = vld [vmem:[%s9831_s3 + $0x6c0] ss:$8 sps:$4 sm:$0xff]  }
  0xc2   : > { %v8795_v20 = vor.u32 %v1216_v42, %v10084_v10  ;;  %v1220_v32 = vrot.slane %v10087_v53, 1  ;;  %v10088_v33 = vshll.u32 %v8485_v18, 16  ;;  %v10089_v42 = vshll.u32 %v8512_v52, 16 }
  0xc3   : > { %v1036_v57 = vrot.slane %v10086_v0, 7  ;;  %v8814_v40 = vsel %vm7718_vm2, 0, %v1025_v17  ;;  %v8818_v10 = vsel %vm7718_vm2, 0, %v1046_v59  ;;  %v8823_v53 = vsel %vm8038_vm5, %v8653_v49, 0  ;;  %4557 = vmatpush1.bf16.msra.mxu0 %v7167_v43 }
  0xc4   : > { %v1226_v15 = vrot.slane %v10088_v33, 1  ;;  %v1224_v48 = vrot.slane %v10089_v42, 1  ;;  %10090 = vst [vmem:[#allocation52_spill] sm:$0xff] %v8818_v10  ;;  %v10091_v3 = vshll.u32 %v8083_v55, 16  ;;  %v7175_v33 = vld [vmem:[%s9831_s3 + $0x6d4] ss:$8 sps:$4 sm:$0xff]   ;;  %2393 = vmatmul.mubr.bf16.gmra.mrb[56].mxu1 %v8814_v40  ;;  %3767 = vmatprep.mubr.bf16.mxu0 %v8823_v53 }
  0xc5   : > { %v10092_v17 = vshrl.u32 %v8419_v4, 16  ;;  %v10093_v59 = vshrl.u32 %v8485_v18, 16  ;;  %v10096_v51 = vshll.u32 %v8588_v16, 16  ;;  %v10097_v36 = vshll.u32 %v8630_v61, 16  ;;  %2402 = vmatprep.mubr.bf16.mxu1 %v8818_v10  ;;  %4558 = vmatprep.subr.bf16.mxu0 %v7175_v33 }
  0xc6   : > { %v1206_v0 = vrot.slane %v10091_v3, 1  ;;  %v8840_v49 = vor.u32 %v1224_v48, %v10094_v63  ;;  %v1230_v3 = vrot.slane %v10095_v41, 1  ;;  %v10099_v63 = vshll.u32 %v8720_v50, 16 }
  0xc7   : > { %v8832_v42 = vor.u32 %v1220_v32, %v10092_v17  ;;  %v8836_v44 = vor.u32 %v1226_v15, %v10093_v59  ;;  %v1228_v45 = vrot.slane %v10096_v51, 1  ;;  %v1234_v4 = vrot.slane %v10097_v36, 1  ;;  %v7173_v51 = vld [vmem:[%s9831_s3 + $0x6d0] ss:$8 sps:$4 sm:$0xff]  }
  0xc8   : > { %v10098_v32 = vshll.u32 %v8668_v28, 16  ;;  %v1039_v15 = vor.u32 %v10099_v63, %v1036_v57  ;;  %v10100_v48 = vshrl.u32 %v8547_v25, 16  ;;  %v10101_v14 = vshrl.u32 %v8588_v16, 16  ;;  %v7181_v57 = vld [vmem:[%s9831_s3 + $0x6e4] ss:$8 sps:$4 sm:$0xff]   ;;  %4559 = vmatpush1.bf16.msra.mxu0 %v7173_v51 }
  0xc9   : > { %v10102_v36 = vshrl.u32 %v8630_v61, 16  ;;  %4560 = vmatprep.subr.bf16.mxu0 %v7181_v57  ;;  %v8915_v33 = vsel %vm8038_vm5, %v8724_v1, 0  ;;  %v7146_v1 = vld [vmem:[%s9831_s3 + $0x510] ss:$8 sps:$4 sm:$0xff]   ;;  %v8943_v51 = vsel %vm8038_vm5, %v8759_v58, 0 }
  0xca   : > { %v1232_v17 = vrot.slane %v10098_v32, 1  ;;  %v8856_v41 = vor.u32 %v1230_v3, %v10100_v48  ;;  %v8865_v59 = vor.u32 %v1228_v45, %v10101_v14  ;;  %v10103_v32 = vshrl.u32 %v8668_v28, 16  ;;  %v7179_v45 = vld [vmem:[%s9831_s3 + $0x6e0] ss:$8 sps:$4 sm:$0xff]   ;;  %v7166_v58 = vld [vmem:[%s9831_s3 + $0x544] ss:$8 sps:$4 sm:$0xff]  }
  0xcb   : > { %v8872_v3 = vor.u32 %v1234_v4, %v10102_v36  ;;  %v10104_v48 = vshrl.u32 %v8083_v55, 16  ;;  %v8885_v14 = vsel %vm7718_vm2, 0, %v1039_v15  ;;  %v8890_v4 = vsel %vm8038_vm5, %v8692_v29, 0  ;;  %v7193_v29 = vld [vmem:[%s9831_s3 + $0x704] ss:$8 sps:$4 sm:$0xff]  }
  0xcc   : > { %v8876_v63 = vor.u32 %v1232_v17, %v10103_v32  ;;  %v7187_v17 = vld [vmem:[%s9831_s3 + $0x6f4] ss:$8 sps:$4 sm:$0xff]   ;;  %2403 = vmatmul.mubr.bf16.gmra.mrb[60].mxu1 %v8885_v14  ;;  %3768 = vmatmul.mubr.bf16.gmra.mrb[28].mxu0 %v8890_v4  ;;  %v8923_v15 = vsel %vm8038_vm5, %v8728_v54, 0  ;;  %v7154_v54 = vld [vmem:[%s9831_s3 + $0x524] ss:$8 sps:$4 sm:$0xff]   ;;  %v8964_v32 = vsel %vm8038_vm5, %v8780_v27, 0 }
  0xcd   : > { %v1207_v10 = vor.u32 %v1206_v0, %v10104_v48  ;;  %v7185_v0 = vld [vmem:[%s9831_s3 + $0x6f0] ss:$8 sps:$4 sm:$0xff]   ;;  %2445 = vmatprep.mubr.bf16.mxu1 %v7677_v30  ;;  %4561 = vmatpush1.bf16.msra.mxu0 %v7179_v45  ;;  %v7148_v30 = vld [vmem:[%s9831_s3 + $0x514] ss:$8 sps:$4 sm:$0xff]   ;;  %v7152_v57 = vld [vmem:[%s9831_s3 + $0x520] ss:$8 sps:$4 sm:$0xff]  }
  0xce   : > { %4562 = vmatprep.subr.bf16.mxu0 %v7187_v17  ;;  %v7160_v36 = vld [vmem:[%s9831_s3 + $0x534] ss:$8 sps:$4 sm:$0xff]   ;;  %v8969_v48 = vsel %vm8038_vm5, %v8791_v21, 0  ;;  %v7164_v45 = vld [vmem:[%s9831_s3 + $0x540] ss:$8 sps:$4 sm:$0xff]  }
  0xcf   : > { %v8897_v43 = vsel %vm8038_vm5, %v1207_v10, 0  ;;  %v7140_v10 = vld [vmem:[%s9831_s3 + $0x500] ss:$8 sps:$4 sm:$0xff]   ;;  %v7172_v17 = vld [vmem:[%s9831_s3 + $0x554] ss:$8 sps:$4 sm:$0xff]  }
  0xd0   : > { %3777 = vmatprep.mubr.bf16.mxu0 %v8897_v43  ;;  %v7170_v27 = vld [vmem:[%s9831_s3 + $0x550] ss:$8 sps:$4 sm:$0xff]   ;;  %v7178_v21 = vld [vmem:[%s9831_s3 + $0x564] ss:$8 sps:$4 sm:$0xff]  }
  0xd1   : > { %4563 = vmatpush1.bf16.msra.mxu0 %v7185_v0  ;;  %v8990_v0 = vsel %vm8038_vm5, %v8795_v20, 0  ;;  %v7182_v20 = vld [vmem:[%s9831_s3 + $0x570] ss:$8 sps:$4 sm:$0xff]  }
  0xd2   : > { %4725 = vmatprep.subr.bf16.mxu0 %v7193_v29  ;;  %v8995_v29 = vsel %vm8038_vm5, %v8799_v24, 0  ;;  %v7190_v24 = vld [vmem:[%s9831_s3 + $0x584] ss:$8 sps:$4 sm:$0xff]  }
  0xd4   : > { %2446 = vmatmul.mubr.bf16.vlgmr.msra.gmra.mrb[0].mxu1 %v7687_v35  ;;  %3778 = vmatmul.mubr.bf16.gmra.mrb[32].mxu0 %v8915_v33  ;;  %v8938_v35 = vsel %vm8038_vm5, %v8755_v34, 0  ;;  %v7158_v34 = vld [vmem:[%s9831_s3 + $0x530] ss:$8 sps:$4 sm:$0xff]  }
  0xd5   : > { %2607 = vmatpush1.bf16.msra.mxu1 %v7140_v10  ;;  %2455 = vmatprep.mubr.bf16.mxu1 %v7724_v62  ;;  %v7176_v10 = vld [vmem:[%s9831_s3 + $0x560] ss:$8 sps:$4 sm:$0xff]  }
  0xd6   : > { %3787 = vmatprep.mubr.bf16.mxu0 %v8923_v15  ;;  %2608 = vmatprep.subr.bf16.mxu1 %v7148_v30  ;;  %v7184_v30 = vld [vmem:[%s9831_s3 + $0x574] ss:$8 sps:$4 sm:$0xff]  }
  0xd9   : > { %2609 = vmatpush1.bf16.msra.mxu1 %v7146_v1  ;;  %v9016_v1 = vsel %vm8038_vm5, %v8832_v42, 0  ;;  %v7202_v42 = vld [vmem:[%s9831_s3 + $0x5a4] ss:$8 sps:$4 sm:$0xff]  }
  0xda   : > { %2610 = vmatprep.subr.bf16.mxu1 %v7154_v54  ;;  %v9021_v54 = vsel %vm8038_vm5, %v8836_v44, 0  ;;  %v7194_v44 = vld [vmem:[%s9831_s3 + $0x590] ss:$8 sps:$4 sm:$0xff]  }
  0xdc   : > { %2456 = vmatmul.mubr.bf16.gmra.mrb[4].mxu1 %v7734_v5  ;;  %3788 = vmatmul.mubr.bf16.gmra.mrb[36].mxu0 %v8938_v35 }
  0xdd   : > { %2465 = vmatprep.mubr.bf16.mxu1 %v7792_v47  ;;  %3797 = vmatprep.mubr.bf16.mxu0 %v8943_v51 }
  0xde   : > { %2611 = vmatpush1.bf16.msra.mxu1 %v7152_v57  ;;  %v7188_v57 = vld [vmem:[%s9831_s3 + $0x580] ss:$8 sps:$4 sm:$0xff]  }
  0xdf   : > { %2612 = vmatprep.subr.bf16.mxu1 %v7160_v36  ;;  %v7196_v36 = vld [vmem:[%s9831_s3 + $0x594] ss:$8 sps:$4 sm:$0xff]  }
  0xe2   : > { %2613 = vmatpush1.bf16.msra.mxu1 %v7158_v34  ;;  %v9042_v34 = vsel %vm8038_vm5, %v8840_v49, 0  ;;  %v7206_v49 = vld [vmem:[%s9831_s3 + $0x5b0] ss:$8 sps:$4 sm:$0xff]  }
  0xe3   : > { %2614 = vmatprep.subr.bf16.mxu1 %v7166_v58  ;;  %v9047_v58 = vsel %vm8038_vm5, %v8856_v41, 0  ;;  %v7214_v41 = vld [vmem:[%s9831_s3 + $0x5c4] ss:$8 sps:$4 sm:$0xff]  }
  0xe4   : > { %2466 = vmatmul.mubr.bf16.gmra.mrb[8].mxu1 %v7821_v9  ;;  %3798 = vmatmul.mubr.bf16.gmra.mrb[40].mxu0 %v8964_v32 }
  0xe5   : > { %2475 = vmatprep.mubr.bf16.mxu1 %v7843_v31  ;;  %3807 = vmatprep.mubr.bf16.mxu0 %v8969_v48 }
  0xe6   : > { %2615 = vmatpush1.bf16.msra.mxu1 %v7164_v45  ;;  %v7200_v45 = vld [vmem:[%s9831_s3 + $0x5a0] ss:$8 sps:$4 sm:$0xff]  }
  0xe7   : > { %2616 = vmatprep.subr.bf16.mxu1 %v7172_v17  ;;  %v7208_v17 = vld [vmem:[%s9831_s3 + $0x5b4] ss:$8 sps:$4 sm:$0xff]  }
  0xea   : > { %2617 = vmatpush1.bf16.msra.mxu1 %v7170_v27  ;;  %v9068_v27 = vsel %vm8038_vm5, %v8865_v59, 0  ;;  %v7218_v59 = vld [vmem:[%s9831_s3 + $0x5d0] ss:$8 sps:$4 sm:$0xff]  }
  0xeb   : > { %2618 = vmatprep.subr.bf16.mxu1 %v7178_v21  ;;  %v9073_v21 = vsel %vm8038_vm5, %v8872_v3, 0  ;;  %v7226_v3 = vld [vmem:[%s9831_s3 + $0x5e4] ss:$8 sps:$4 sm:$0xff]  }
  0xec   : > { %2476 = vmatmul.mubr.bf16.gmra.mrb[12].mxu1 %v7866_v56  ;;  %3808 = vmatmul.mubr.bf16.gmra.mrb[44].mxu0 %v8990_v0 }
  0xed   : > { %2485 = vmatprep.mubr.bf16.mxu1 %v7895_v26  ;;  %3817 = vmatprep.mubr.bf16.mxu0 %v8995_v29 }
  0xee   : > { %2619 = vmatpush1.bf16.msra.mxu1 %v7176_v10  ;;  %v7212_v10 = vld [vmem:[%s9831_s3 + $0x5c0] ss:$8 sps:$4 sm:$0xff]  }
  0xef   : > { %2620 = vmatprep.subr.bf16.mxu1 %v7184_v30  ;;  %v7220_v30 = vld [vmem:[%s9831_s3 + $0x5d4] ss:$8 sps:$4 sm:$0xff]  }
  0xf2   : > { %2621 = vmatpush1.bf16.msra.mxu1 %v7182_v20  ;;  %v9094_v20 = vsel %vm8038_vm5, %v8876_v63, 0  ;;  %v7230_v63 = vld [vmem:[%s9831_s3 + $0x5f0] ss:$8 sps:$4 sm:$0xff]  }
  0xf3   : > { %2622 = vmatprep.subr.bf16.mxu1 %v7190_v24  ;;  %v7224_v24 = vld [vmem:[%s9831_s3 + $0x5e0] ss:$8 sps:$4 sm:$0xff]  }
  0xf4   : > { %2486 = vmatmul.mubr.bf16.gmra.mrb[16].mxu1 %v7936_v22  ;;  %3818 = vmatmul.mubr.bf16.gmra.mrb[48].mxu0 %v9016_v1 }
  0xf5   : > { %2495 = vmatprep.mubr.bf16.mxu1 %v7973_v6  ;;  %3827 = vmatprep.mubr.bf16.mxu0 %v9021_v54 }
  0xf6   : > { %2623 = vmatpush1.bf16.msra.mxu1 %v7188_v57  ;;  %v7232_v57 = vld [vmem:[%s9831_s3 + $0x5f4] ss:$8 sps:$4 sm:$0xff]  }
  0xf7   : > { %2624 = vmatprep.subr.bf16.mxu1 %v7196_v36  ;;  %v7238_v36 = vld [vmem:[%s9831_s3 + $0x4] ss:$8 sps:$4 sm:$0xff]  }
  0xfa   : > { %2625 = vmatpush1.bf16.msra.mxu1 %v7194_v44  ;;  %v7191_v44 = vld [vmem:[%s9831_s3 + $0x700] ss:$8 sps:$4 sm:$0xff]  }
  0xfb   : > { %2626 = vmatprep.subr.bf16.mxu1 %v7202_v42  ;;  %v7199_v42 = vld [vmem:[%s9831_s3 + $0x714] ss:$8 sps:$4 sm:$0xff]  }
  0xfc   : > { %2496 = vmatmul.mubr.bf16.gmra.mrb[20].mxu1 %v7992_v7  ;;  %3828 = vmatmul.mubr.bf16.gmra.mrb[52].mxu0 %v9042_v34 }
  0xfd   : > { %2505 = vmatprep.mubr.bf16.mxu1 %v8007_v19  ;;  %3837 = vmatprep.mubr.bf16.mxu0 %v9047_v58 }
  0xfe   : > { %2627 = vmatpush1.bf16.msra.mxu1 %v7200_v45  ;;  %v10105_v45 = vld [vmem:[#allocation5_spill] sm:$0xff] }
  0xff   : > { %2628 = vmatprep.subr.bf16.mxu1 %v7208_v17  ;;  %v7197_v17 = vld [vmem:[%s9831_s3 + $0x710] ss:$8 sps:$4 sm:$0xff]  }
 0x102   : > { %2629 = vmatpush1.bf16.msra.mxu1 %v7206_v49  ;;  %v10106_v49 = vld [vmem:[#allocation6_spill] sm:$0xff] }
 0x103   : > { %2630 = vmatprep.subr.bf16.mxu1 %v7214_v41  ;;  %v7205_v41 = vld [vmem:[%s9831_s3 + $0x724] ss:$8 sps:$4 sm:$0xff]  }
 0x104   : > { %2506 = vmatmul.mubr.bf16.gmra.mrb[24].mxu1 %v8058_v38  ;;  %3838 = vmatmul.mubr.bf16.gmra.mrb[56].mxu0 %v9068_v27 }
 0x105   : > { %2515 = vmatprep.mubr.bf16.mxu1 %v8083_v55  ;;  %3847 = vmatprep.mubr.bf16.mxu0 %v9073_v21 }
 0x106   : > { %2631 = vmatpush1.bf16.msra.mxu1 %v7212_v10  ;;  %v7203_v10 = vld [vmem:[%s9831_s3 + $0x720] ss:$8 sps:$4 sm:$0xff]  }
 0x107   : > { %2632 = vmatprep.subr.bf16.mxu1 %v7220_v30  ;;  %v7211_v30 = vld [vmem:[%s9831_s3 + $0x734] ss:$8 sps:$4 sm:$0xff]  }
 0x10a   : > { %2633 = vmatpush1.bf16.msra.mxu1 %v7218_v59  ;;  %v10107_v59 = vld [vmem:[#allocation7_spill] sm:$0xff] }
 0x10b   : > { %2634 = vmatprep.subr.bf16.mxu1 %v7226_v3  ;;  %v10108_v3 = vld [vmem:[#allocation8_spill] sm:$0xff] }
 0x10c   : > { %2516 = vmatmul.mubr.bf16.gmra.mrb[28].mxu1 %v8123_v12  ;;  %3848 = vmatmul.mubr.bf16.gmra.mrb[60].mxu0 %v9094_v20 }
 0x10d   : > { %2525 = vmatprep.mubr.bf16.mxu1 %v8146_v11  ;;  %4564 = vmatprep.mubr.bf16.mxu0 %v7790_v46 }
 0x10e   : > { %2635 = vmatpush1.bf16.msra.mxu1 %v7224_v24  ;;  %v7209_v24 = vld [vmem:[%s9831_s3 + $0x730] ss:$8 sps:$4 sm:$0xff]  }
 0x10f   : > { %2636 = vmatprep.subr.bf16.mxu1 %v7232_v57  ;;  %v7217_v57 = vld [vmem:[%s9831_s3 + $0x744] ss:$8 sps:$4 sm:$0xff]  }
 0x112   : > { %2637 = vmatpush1.bf16.msra.mxu1 %v7230_v63  ;;  %v7215_v63 = vld [vmem:[%s9831_s3 + $0x740] ss:$8 sps:$4 sm:$0xff]  }
 0x113   : > { %3279 = vmatprep.subr.bf16.mxu1 %v7238_v36  ;;  %v7223_v36 = vld [vmem:[%s9831_s3 + $0x754] ss:$8 sps:$4 sm:$0xff]  }
 0x114   : > { %2526 = vmatmul.mubr.bf16.gmra.mrb[32].mxu1 %v8176_v39  ;;  %4565 = vmatmul.mubr.bf16.vlgmr.msra.gmra.mrb[0].mxu0 %v10105_v45 }
 0x115   : > { %4726 = vmatpush1.bf16.msra.mxu0 %v7191_v44  ;;  %2535 = vmatprep.mubr.bf16.mxu1 %v8208_v37  ;;  %v10109_v44 = vld [vmem:[#allocation25_spill] sm:$0xff] }
 0x116   : > { %4574 = vmatprep.mubr.bf16.mxu0 %v10106_v49  ;;  %4727 = vmatprep.subr.bf16.mxu0 %v7199_v42  ;;  %v10110_v42 = vld [vmem:[#allocation9_spill] sm:$0xff] }
 0x119   : > { %4728 = vmatpush1.bf16.msra.mxu0 %v7197_v17  ;;  %v10111_v17 = vld [vmem:[#allocation26_spill] sm:$0xff] }
 0x11a   : > { %4729 = vmatprep.subr.bf16.mxu0 %v7205_v41  ;;  %v10112_v41 = vld [vmem:[#allocation10_spill] sm:$0xff] }
 0x11c   : > { %2536 = vmatmul.mubr.bf16.gmra.mrb[36].mxu1 %v8274_v2  ;;  %4575 = vmatmul.mubr.bf16.gmra.mrb[4].mxu0 %v10107_v59 }
 0x11d   : > { %2545 = vmatprep.mubr.bf16.mxu1 %v8301_v23  ;;  %4584 = vmatprep.mubr.bf16.mxu0 %v10108_v3 }
 0x11e   : > { %4730 = vmatpush1.bf16.msra.mxu0 %v7203_v10  ;;  %v7221_v10 = vld [vmem:[%s9831_s3 + $0x750] ss:$8 sps:$4 sm:$0xff]  }
 0x11f   : > { %4731 = vmatprep.subr.bf16.mxu0 %v7211_v30  ;;  %v7229_v30 = vld [vmem:[%s9831_s3 + $0x764] ss:$8 sps:$4 sm:$0xff]  }
 0x122   : > { %4732 = vmatpush1.bf16.msra.mxu0 %v7209_v24  ;;  %v7227_v24 = vld [vmem:[%s9831_s3 + $0x760] ss:$8 sps:$4 sm:$0xff]  }
 0x123   : > { %4733 = vmatprep.subr.bf16.mxu0 %v7217_v57  ;;  %v7235_v57 = vld [vmem:[%s9831_s3 + $0x774] ss:$8 sps:$4 sm:$0xff]  }
 0x124   : > { %2546 = vmatmul.mubr.bf16.gmra.mrb[40].mxu1 %v10109_v44  ;;  %4585 = vmatmul.mubr.bf16.gmra.mrb[8].mxu0 %v10110_v42  ;;  %v7239_v42 = vld [vmem:[%s9831_s3 + $0x780] ss:$8 sps:$4 sm:$0xff]  }
 0x125   : > { %2555 = vmatprep.mubr.bf16.mxu1 %v10111_v17  ;;  %4594 = vmatprep.mubr.bf16.mxu0 %v10112_v41  ;;  %v10114_v41 = vld [vmem:[#allocation11_spill] sm:$0xff] }
 0x126   : > { %4734 = vmatpush1.bf16.msra.mxu0 %v7215_v63  ;;  %v10113_v63 = vld [vmem:[#allocation29_spill] sm:$0xff] }
 0x127   : > { %4735 = vmatprep.subr.bf16.mxu0 %v7223_v36  ;;  %v10115_v36 = vld [vmem:[#allocation12_spill] sm:$0xff] }
 0x12a   : > { %4736 = vmatpush1.bf16.msra.mxu0 %v7221_v10  ;;  %v7233_v10 = vld [vmem:[%s9831_s3 + $0x770] ss:$8 sps:$4 sm:$0xff]  }
 0x12b   : > { %4737 = vmatprep.subr.bf16.mxu0 %v7229_v30  ;;  %v7241_v30 = vld [vmem:[%s9831_s3 + $0x784] ss:$8 sps:$4 sm:$0xff]  }
 0x12c   : > { %2556 = vmatmul.mubr.bf16.gmra.mrb[44].mxu1 %v10113_v63  ;;  %4595 = vmatmul.mubr.bf16.gmra.mrb[12].mxu0 %v10114_v41  ;;  %v7251_v41 = vld [vmem:[%s9831_s3 + $0x7a0] ss:$8 sps:$4 sm:$0xff]  }
 0x12d   : > { %2565 = vmatprep.mubr.bf16.mxu1 %v8485_v18  ;;  %4604 = vmatprep.mubr.bf16.mxu0 %v10115_v36  ;;  %v7247_v36 = vld [vmem:[%s9831_s3 + $0x794] ss:$8 sps:$4 sm:$0xff]  }
 0x12e   : > { %4738 = vmatpush1.bf16.msra.mxu0 %v7227_v24  ;;  %v10116_v24 = vld [vmem:[#allocation14_spill] sm:$0xff] }
 0x12f   : > { %4739 = vmatprep.subr.bf16.mxu0 %v7235_v57  ;;  %v10117_v57 = vld [vmem:[#allocation15_spill] sm:$0xff] }
 0x132   : > { %4740 = vmatpush1.bf16.msra.mxu0 %v7233_v10  ;;  %v7245_v10 = vld [vmem:[%s9831_s3 + $0x790] ss:$8 sps:$4 sm:$0xff]  }
 0x133   : > { %4741 = vmatprep.subr.bf16.mxu0 %v7241_v30  ;;  %v7253_v30 = vld [vmem:[%s9831_s3 + $0x7a4] ss:$8 sps:$4 sm:$0xff]  }
 0x134   : > { %2566 = vmatmul.mubr.bf16.gmra.mrb[48].mxu1 %v8512_v52  ;;  %4605 = vmatmul.mubr.bf16.gmra.mrb[16].mxu0 %v10116_v24  ;;  %v7263_v24 = vld [vmem:[%s9831_s3 + $0x7c0] ss:$8 sps:$4 sm:$0xff]  }
 0x135   : > { %2575 = vmatprep.mubr.bf16.mxu1 %v8547_v25  ;;  %4614 = vmatprep.mubr.bf16.mxu0 %v10117_v57  ;;  %v7259_v57 = vld [vmem:[%s9831_s3 + $0x7b4] ss:$8 sps:$4 sm:$0xff]   ;;  %v7250_v25 = vld [vmem:[%s9831_s3 + $0x24] ss:$8 sps:$4 sm:$0xff]  }
 0x136   : > { %4742 = vmatpush1.bf16.msra.mxu0 %v7239_v42  ;;  %v10118_v42 = vld [vmem:[#allocation16_spill] sm:$0xff] }
 0x137   : > { %4743 = vmatprep.subr.bf16.mxu0 %v7247_v36  ;;  %v10119_v36 = vld [vmem:[#allocation17_spill] sm:$0xff] }
 0x13a   : > { %4744 = vmatpush1.bf16.msra.mxu0 %v7245_v10  ;;  %v7257_v10 = vld [vmem:[%s9831_s3 + $0x7b0] ss:$8 sps:$4 sm:$0xff]  }
 0x13b   : > { %4745 = vmatprep.subr.bf16.mxu0 %v7253_v30  ;;  %v7265_v30 = vld [vmem:[%s9831_s3 + $0x7c4] ss:$8 sps:$4 sm:$0xff]  }
 0x13c   : > { %2576 = vmatmul.mubr.bf16.gmra.mrb[52].mxu1 %v8588_v16  ;;  %4615 = vmatmul.mubr.bf16.gmra.mrb[20].mxu0 %v10118_v42  ;;  %v10121_v42 = vld [vmem:[#allocation47_spill] sm:$0xff]  ;;  %v10129_v16 = vld [vmem:[#allocation30_spill] sm:$0xff] }
 0x13d   : > { %2585 = vmatprep.mubr.bf16.mxu1 %v8630_v61  ;;  %4624 = vmatprep.mubr.bf16.mxu0 %v10119_v36  ;;  %v7271_v36 = vld [vmem:[%s9831_s3 + $0x7d4] ss:$8 sps:$4 sm:$0xff]   ;;  %v7236_v61 = vld [vmem:[%s9831_s3] ss:$8 sps:$4 sm:$0xff]  }
 0x13e   : > { %4746 = vmatpush1.bf16.msra.mxu0 %v7251_v41  ;;  %v10120_v41 = vld [vmem:[#allocation18_spill] sm:$0xff] }
 0x13f   : > { %4747 = vmatprep.subr.bf16.mxu0 %v7259_v57  ;;  %v10122_v57 = vld [vmem:[#allocation19_spill] sm:$0xff] }
 0x142   : > { %4748 = vmatpush1.bf16.msra.mxu0 %v7257_v10  ;;  %v7269_v10 = vld [vmem:[%s9831_s3 + $0x7d0] ss:$8 sps:$4 sm:$0xff]  }
 0x143   : > { %4749 = vmatprep.subr.bf16.mxu0 %v7265_v30  ;;  %v7277_v30 = vld [vmem:[%s9831_s3 + $0x7e4] ss:$8 sps:$4 sm:$0xff]  }
 0x144   : > { %2586 = vmatmul.mubr.bf16.gmra.mrb[56].mxu1 %v8668_v28  ;;  %4625 = vmatmul.mubr.bf16.gmra.mrb[24].mxu0 %v10120_v41  ;;  %v7275_v28 = vld [vmem:[%s9831_s3 + $0x7e0] ss:$8 sps:$4 sm:$0xff]  }
 0x145   : > { %2595 = vmatprep.mubr.bf16.mxu1 %v10121_v42  ;;  %4634 = vmatprep.mubr.bf16.mxu0 %v10122_v57  ;;  %v7283_v57 = vld [vmem:[%s9831_s3 + $0x7f4] ss:$8 sps:$4 sm:$0xff]   ;;  %v10124_v41 = vld [vmem:[#allocation20_spill] sm:$0xff] }
 0x146   : > { %4750 = vmatpush1.bf16.msra.mxu0 %v7263_v24  ;;  %v10123_v24 = vld [vmem:[#allocation21_spill] sm:$0xff] }
 0x147   : > { %4751 = vmatprep.subr.bf16.mxu0 %v7271_v36  ;;  %v10125_v36 = vld [vmem:[#allocation23_spill] sm:$0xff] }
 0x14a   : > { %4752 = vmatpush1.bf16.msra.mxu0 %v7269_v10  ;;  %v7281_v10 = vld [vmem:[%s9831_s3 + $0x7f0] ss:$8 sps:$4 sm:$0xff]  }
 0x14b   : > { %4753 = vmatprep.subr.bf16.mxu0 %v7277_v30  ;;  %v7289_v30 = vld [vmem:[%s9831_s3 + $0x804] ss:$8 sps:$4 sm:$0xff]  }
 0x14c   : > { %2596 = vmatmul.mubr.bf16.gmra.mrb[60].mxu1 %v8720_v50  ;;  %4635 = vmatmul.mubr.bf16.gmra.mrb[28].mxu0 %v10123_v24  ;;  %v7242_v24 = vld [vmem:[%s9831_s3 + $0x10] ss:$8 sps:$4 sm:$0xff]  }
 0x14d   : > { %2638 = vmatprep.mubr.bf16.mxu1 %v10124_v41  ;;  %4644 = vmatprep.mubr.bf16.mxu0 %v10125_v36  ;;  %v7244_v41 = vld [vmem:[%s9831_s3 + $0x14] ss:$8 sps:$4 sm:$0xff]   ;;  %v10127_v36 = vld [vmem:[#allocation27_spill] sm:$0xff] }
 0x14e   : > { %4754 = vmatpush1.bf16.msra.mxu0 %v7275_v28  ;;  %v10126_v28 = vld [vmem:[#allocation22_spill] sm:$0xff] }
 0x14f   : > { %4755 = vmatprep.subr.bf16.mxu0 %v7283_v57  ;;  %v10128_v57 = vld [vmem:[#allocation24_spill] sm:$0xff] }
 0x152   : > { %4756 = vmatpush1.bf16.msra.mxu0 %v7281_v10  ;;  %v7248_v10 = vld [vmem:[%s9831_s3 + $0x20] ss:$8 sps:$4 sm:$0xff]  }
 0x153   : > { %4918 = vmatprep.subr.bf16.mxu0 %v7289_v30  ;;  %v10130_v30 = vld [vmem:[#allocation28_spill] sm:$0xff] }
 0x154   : > { %2639 = vmatmul.mubr.bf16.vlgmr.msra.gmra.mrb[0].mxu1 %v10126_v28  ;;  %4645 = vmatmul.mubr.bf16.gmra.mrb[32].mxu0 %v10127_v36  ;;  %v10131_v28 = vld [vmem:[#allocation32_spill] sm:$0xff] }
 0x155   : > { %3280 = vmatpush1.bf16.msra.mxu1 %v7236_v61  ;;  %2648 = vmatprep.mubr.bf16.mxu1 %v10128_v57  ;;  %v7256_v61 = vld [vmem:[%s9831_s3 + $0x34] ss:$8 sps:$4 sm:$0xff]   ;;  %v7260_v36 = vld [vmem:[%s9831_s3 + $0x40] ss:$8 sps:$4 sm:$0xff]  }
 0x156   : > { %4654 = vmatprep.mubr.bf16.mxu0 %v10129_v16  ;;  %3281 = vmatprep.subr.bf16.mxu1 %v7244_v41  ;;  %v10132_v16 = vld [vmem:[#allocation31_spill] sm:$0xff]  ;;  %v10133_v41 = vld [vmem:[#allocation33_spill] sm:$0xff] }
 0x159   : > { %3282 = vmatpush1.bf16.msra.mxu1 %v7242_v24  ;;  %v7254_v24 = vld [vmem:[%s9831_s3 + $0x30] ss:$8 sps:$4 sm:$0xff]  }
 0x15a   : > { %3283 = vmatprep.subr.bf16.mxu1 %v7250_v25  ;;  %v7262_v25 = vld [vmem:[%s9831_s3 + $0x44] ss:$8 sps:$4 sm:$0xff]  }
 0x15c   : > { %2649 = vmatmul.mubr.bf16.gmra.mrb[4].mxu1 %v10130_v30  ;;  %4655 = vmatmul.mubr.bf16.gmra.mrb[36].mxu0 %v10131_v28  ;;  %v10135_v28 = vld [vmem:[#allocation37_spill] sm:$0xff] }
 0x15d   : > { %2658 = vmatprep.mubr.bf16.mxu1 %v10132_v16  ;;  %4664 = vmatprep.mubr.bf16.mxu0 %v10133_v41  ;;  %v7268_v41 = vld [vmem:[%s9831_s3 + $0x54] ss:$8 sps:$4 sm:$0xff]   ;;  %v10136_v16 = vld [vmem:[#allocation36_spill] sm:$0xff] }
 0x15e   : > { %3284 = vmatpush1.bf16.msra.mxu1 %v7248_v10  ;;  %v10134_v10 = vld [vmem:[#allocation34_spill] sm:$0xff] }
 0x15f   : > { %3285 = vmatprep.subr.bf16.mxu1 %v7256_v61  ;;  %v10137_v61 = vld [vmem:[#allocation39_spill] sm:$0xff] }
 0x162   : > { %3286 = vmatpush1.bf16.msra.mxu1 %v7254_v24  ;;  %v7266_v24 = vld [vmem:[%s9831_s3 + $0x50] ss:$8 sps:$4 sm:$0xff]  }
 0x163   : > { %3287 = vmatprep.subr.bf16.mxu1 %v7262_v25  ;;  %v7274_v25 = vld [vmem:[%s9831_s3 + $0x64] ss:$8 sps:$4 sm:$0xff]  }
 0x164   : > { %2659 = vmatmul.mubr.bf16.gmra.mrb[8].mxu1 %v10134_v10  ;;  %4665 = vmatmul.mubr.bf16.gmra.mrb[40].mxu0 %v10135_v28  ;;  %v7272_v10 = vld [vmem:[%s9831_s3 + $0x60] ss:$8 sps:$4 sm:$0xff]   ;;  %v10139_v28 = vld [vmem:[#allocation41_spill] sm:$0xff] }
 0x165   : > { %2668 = vmatprep.mubr.bf16.mxu1 %v10136_v16  ;;  %4674 = vmatprep.mubr.bf16.mxu0 %v10137_v61  ;;  %v7280_v61 = vld [vmem:[%s9831_s3 + $0x74] ss:$8 sps:$4 sm:$0xff]  }
 0x166   : > { %3288 = vmatpush1.bf16.msra.mxu1 %v7260_v36  ;;  %v10138_v36 = vld [vmem:[#allocation40_spill] sm:$0xff]  ;;  %v10140_v16 = vld [vmem:[#allocation42_spill] sm:$0xff] }
 0x167   : > { %3289 = vmatprep.subr.bf16.mxu1 %v7268_v41  ;;  %v10141_v41 = vld [vmem:[#allocation44_spill] sm:$0xff] }
 0x16a   : > { %3290 = vmatpush1.bf16.msra.mxu1 %v7266_v24  ;;  %v7278_v24 = vld [vmem:[%s9831_s3 + $0x70] ss:$8 sps:$4 sm:$0xff]  }
 0x16b   : > { %3291 = vmatprep.subr.bf16.mxu1 %v7274_v25  ;;  %v7286_v25 = vld [vmem:[%s9831_s3 + $0x84] ss:$8 sps:$4 sm:$0xff]  }
 0x16c   : > { %2669 = vmatmul.mubr.bf16.gmra.mrb[12].mxu1 %v10138_v36  ;;  %4675 = vmatmul.mubr.bf16.gmra.mrb[44].mxu0 %v10139_v28  ;;  %v7284_v36 = vld [vmem:[%s9831_s3 + $0x80] ss:$8 sps:$4 sm:$0xff]  }
 0x16d   : > { %2678 = vmatprep.mubr.bf16.mxu1 %v10140_v16  ;;  %4684 = vmatprep.mubr.bf16.mxu0 %v10141_v41  ;;  %v7292_v41 = vld [vmem:[%s9831_s3 + $0x94] ss:$8 sps:$4 sm:$0xff]   ;;  %v10143_v28 = vld [vmem:[#allocation48_spill] sm:$0xff] }
 0x16e   : > { %3292 = vmatpush1.bf16.msra.mxu1 %v7272_v10  ;;  %v10142_v10 = vld [vmem:[#allocation46_spill] sm:$0xff] }
 0x16f   : > { %3293 = vmatprep.subr.bf16.mxu1 %v7280_v61  ;;  %v10144_v16 = vld [vmem:[#allocation50_spill] sm:$0xff]  ;;  %v10145_v61 = vld [vmem:[#allocation49_spill] sm:$0xff] }
 0x172   : > { %3294 = vmatpush1.bf16.msra.mxu1 %v7278_v24  ;;  %v7290_v24 = vld [vmem:[%s9831_s3 + $0x90] ss:$8 sps:$4 sm:$0xff]  }
 0x173   : > { %3295 = vmatprep.subr.bf16.mxu1 %v7286_v25  ;;  %v7298_v25 = vld [vmem:[%s9831_s3 + $0xa4] ss:$8 sps:$4 sm:$0xff]  }
 0x174   : > { %2679 = vmatmul.mubr.bf16.gmra.mrb[16].mxu1 %v10142_v10  ;;  %4685 = vmatmul.mubr.bf16.gmra.mrb[48].mxu0 %v10143_v28  ;;  %v7296_v10 = vld [vmem:[%s9831_s3 + $0xa0] ss:$8 sps:$4 sm:$0xff]  }
 0x175   : > { %2688 = vmatprep.mubr.bf16.mxu1 %v10144_v16  ;;  %4694 = vmatprep.mubr.bf16.mxu0 %v10145_v61  ;;  %v7304_v61 = vld [vmem:[%s9831_s3 + $0xb4] ss:$8 sps:$4 sm:$0xff]  }
 0x176   : > { %3296 = vmatpush1.bf16.msra.mxu1 %v7284_v36  ;;  %v10146_v36 = vld [vmem:[#allocation52_spill] sm:$0xff] }
 0x177   : > { %3297 = vmatprep.subr.bf16.mxu1 %v7292_v41  ;;  %v10147_v41 = vmov 0  }
 0x178   : > { %v812_v28 = vrot.slane %v10147_v41, 7 }
 0x17a   : > { %3298 = vmatpush1.bf16.msra.mxu1 %v7290_v24  ;;  %v7302_v24 = vld [vmem:[%s9831_s3 + $0xb0] ss:$8 sps:$4 sm:$0xff]  }
 0x17b   : > { %3299 = vmatprep.subr.bf16.mxu1 %v7298_v25  ;;  %v7310_v25 = vld [vmem:[%s9831_s3 + $0xc4] ss:$8 sps:$4 sm:$0xff]  }
 0x17c   : > { %2689 = vmatmul.mubr.bf16.gmra.mrb[20].mxu1 %v8776_v13  ;;  %4695 = vmatmul.mubr.bf16.gmra.mrb[52].mxu0 %v8814_v40  ;;  %v9339_v13 = vsel %vm7718_vm2, 0, %v812_v28  ;;  %v7322_v28 = vld [vmem:[%s9831_s3 + $0xe4] ss:$8 sps:$4 sm:$0xff]  }
 0x17d   : > { %2698 = vmatprep.mubr.bf16.mxu1 %v8823_v53  ;;  %4704 = vmatprep.mubr.bf16.mxu0 %v10146_v36  ;;  %v7308_v36 = vld [vmem:[%s9831_s3 + $0xc0] ss:$8 sps:$4 sm:$0xff]  }
 0x17e   : > { %3300 = vmatpush1.bf16.msra.mxu1 %v7296_v10  ;;  %v7316_v10 = vld [vmem:[%s9831_s3 + $0xd4] ss:$8 sps:$4 sm:$0xff]  }
 0x17f   : > { %3301 = vmatprep.subr.bf16.mxu1 %v7304_v61  ;;  %v7320_v61 = vld [vmem:[%s9831_s3 + $0xe0] ss:$8 sps:$4 sm:$0xff]  }
 0x182   : > { %3302 = vmatpush1.bf16.msra.mxu1 %v7302_v24  ;;  %v7326_v24 = vld [vmem:[%s9831_s3 + $0xf0] ss:$8 sps:$4 sm:$0xff]  }
 0x183   : > { %3303 = vmatprep.subr.bf16.mxu1 %v7310_v25  ;;  %v7287_v25 = vld [vmem:[%s9831_s3 + $0x800] ss:$8 sps:$4 sm:$0xff]  }
 0x184   : > { %2699 = vmatmul.mubr.bf16.gmra.mrb[24].mxu1 %v8890_v4  ;;  %4705 = vmatmul.mubr.bf16.gmra.mrb[56].mxu0 %v8885_v14  ;;  %v7328_v14 = vld [vmem:[%s9831_s3 + $0xf4] ss:$8 sps:$4 sm:$0xff]  }
 0x185   : > { %2708 = vmatprep.mubr.bf16.mxu1 %v8897_v43  ;;  %4714 = vmatprep.mubr.bf16.mxu0 %v9339_v13 }
 0x186   : > { %3304 = vmatpush1.bf16.msra.mxu1 %v7308_v36  ;;  %v7295_v36 = vld [vmem:[%s9831_s3 + $0x814] ss:$8 sps:$4 sm:$0xff]  }
 0x187   : > { %3305 = vmatprep.subr.bf16.mxu1 %v7316_v10  ;;  %v7356_v10 = vld [vmem:[%s9831_s3 + $0x104] ss:$8 sps:$4 sm:$0xff]  }
 0x18a   : > { %3306 = vmatpush1.bf16.msra.mxu1 %v7314_v60  ;;  %v7301_v60 = vld [vmem:[%s9831_s3 + $0x824] ss:$8 sps:$4 sm:$0xff]  }
 0x18b   : > { %3307 = vmatprep.subr.bf16.mxu1 %v7322_v28  ;;  %v7299_v28 = vld [vmem:[%s9831_s3 + $0x820] ss:$8 sps:$4 sm:$0xff]  }
 0x18c   : > { %2709 = vmatmul.mubr.bf16.gmra.mrb[28].mxu1 %v8915_v33  ;;  %4715 = vmatmul.mubr.bf16.gmra.mrb[60].mxu0 %v9339_v13 }
 0x18d   : > { %2718 = vmatprep.mubr.bf16.mxu1 %v8923_v15  ;;  %4757 = vmatprep.mubr.bf16.mxu0 %v7724_v62  ;;  %v7293_v62 = vld [vmem:[%s9831_s3 + $0x810] ss:$8 sps:$4 sm:$0xff]  }
 0x18e   : > { %3308 = vmatpush1.bf16.msra.mxu1 %v7320_v61  ;;  %v7313_v61 = vld [vmem:[%s9831_s3 + $0x844] ss:$8 sps:$4 sm:$0xff]  }
 0x18f   : > { %3309 = vmatprep.subr.bf16.mxu1 %v7328_v14  ;;  %v7311_v14 = vld [vmem:[%s9831_s3 + $0x840] ss:$8 sps:$4 sm:$0xff]  }
 0x192   : > { %3310 = vmatpush1.bf16.msra.mxu1 %v7326_v24  ;;  %v7325_v24 = vld [vmem:[%s9831_s3 + $0x864] ss:$8 sps:$4 sm:$0xff]  }
 0x193   : > { %6355 = vmatprep.subr.bf16.mxu1 %v7356_v10  ;;  %v7332_v10 = vld [vmem:[%s9831_s3 + $0x880] ss:$8 sps:$4 sm:$0xff]  }
 0x194   : > { %2719 = vmatmul.mubr.bf16.gmra.mrb[32].mxu1 %v8938_v35  ;;  %4758 = vmatmul.mubr.bf16.vlgmr.msra.gmra.mrb[0].mxu0 %v7734_v5  ;;  %v7307_v5 = vld [vmem:[%s9831_s3 + $0x834] ss:$8 sps:$4 sm:$0xff]  }
 0x195   : > { %4919 = vmatpush1.bf16.msra.mxu0 %v7287_v25  ;;  %2728 = vmatprep.mubr.bf16.mxu1 %v8943_v51  ;;  %v7323_v25 = vld [vmem:[%s9831_s3 + $0x860] ss:$8 sps:$4 sm:$0xff]  }
 0x196   : > { %4767 = vmatprep.mubr.bf16.mxu0 %v7792_v47  ;;  %4920 = vmatprep.subr.bf16.mxu0 %v7295_v36  ;;  %v7305_v47 = vld [vmem:[%s9831_s3 + $0x830] ss:$8 sps:$4 sm:$0xff]   ;;  %v7334_v36 = vld [vmem:[%s9831_s3 + $0x884] ss:$8 sps:$4 sm:$0xff]  }
 0x199   : > { %4921 = vmatpush1.bf16.msra.mxu0 %v7293_v62  ;;  %v7340_v62 = vld [vmem:[%s9831_s3 + $0x8a4] ss:$8 sps:$4 sm:$0xff]  }
 0x19a   : > { %4922 = vmatprep.subr.bf16.mxu0 %v7301_v60  ;;  %v10148_v60 = vshll.u32 %v10121_v42, 16 }
 0x19c   : > { %2729 = vmatmul.mubr.bf16.gmra.mrb[36].mxu1 %v8964_v32  ;;  %4768 = vmatmul.mubr.bf16.gmra.mrb[4].mxu0 %v7821_v9  ;;  %v7319_v9 = vld [vmem:[%s9831_s3 + $0x854] ss:$8 sps:$4 sm:$0xff]  }
 0x19d   : > { %2738 = vmatprep.mubr.bf16.mxu1 %v8969_v48  ;;  %4777 = vmatprep.mubr.bf16.mxu0 %v7843_v31  ;;  %v7317_v31 = vld [vmem:[%s9831_s3 + $0x850] ss:$8 sps:$4 sm:$0xff]  }
 0x19e   : > { %4923 = vmatpush1.bf16.msra.mxu0 %v7299_v28  ;;  %v1238_v28 = vrot.slane %v10148_v60, 1  ;;  %v7357_v60 = vld [vmem:[%s9831_s3 + $0x100] ss:$8 sps:$4 sm:$0xff]  }
 0x19f   : > { %4924 = vmatprep.subr.bf16.mxu0 %v7307_v5  ;;  %v10149_v5 = vshrl.u32 %v10121_v42, 16 }
 0x1a2   : > { %4925 = vmatpush1.bf16.msra.mxu0 %v7305_v47  ;;  %v1239_v47 = vor.u32 %v1238_v28, %v10149_v5  ;;  %v10152_v28 = vld [vmem:[#allocation3_spill] sm:$0xff]  ;;  %v10153_v5 = vld [vmem:[#allocation4_spill] sm:$0xff] }
 0x1a3   : > { %4926 = vmatprep.subr.bf16.mxu0 %v7313_v61  ;;  %v7341_v61 = vld [vmem:[%s9831_s3 + $0x8b0] ss:$8 sps:$4 sm:$0xff]  }
 0x1a4   : > { %2739 = vmatmul.mubr.bf16.gmra.mrb[40].mxu1 %v8990_v0  ;;  %4778 = vmatmul.mubr.bf16.gmra.mrb[8].mxu0 %v7866_v56  ;;  %v7331_v56 = vld [vmem:[%s9831_s3 + $0x874] ss:$8 sps:$4 sm:$0xff]  }
 0x1a5   : > { %2748 = vmatprep.mubr.bf16.mxu1 %v8995_v29  ;;  %4787 = vmatprep.mubr.bf16.mxu0 %v7895_v26  ;;  %v7329_v26 = vld [vmem:[%s9831_s3 + $0x870] ss:$8 sps:$4 sm:$0xff]  }
 0x1a6   : > { %4927 = vmatpush1.bf16.msra.mxu0 %v7311_v14  ;;  %v7346_v14 = vld [vmem:[%s9831_s3 + $0x8c4] ss:$8 sps:$4 sm:$0xff]  }
 0x1a7   : > { %4928 = vmatprep.subr.bf16.mxu0 %v7319_v9  ;;  %v10150_v9 = vshll.u32 %v8720_v50, 16 }
 0x1aa   : > { %4929 = vmatpush1.bf16.msra.mxu0 %v7317_v31  ;;  %v9477_v31 = vsel %vm8038_vm5, %v1239_v47, 0  ;;  %v7361_v47 = vld [vmem:[%s9831_s3 + $0x120] ss:$8 sps:$4 sm:$0xff]  }
 0x1ab   : > { %4930 = vmatprep.subr.bf16.mxu0 %v7325_v24  ;;  %v7344_v24 = vld [vmem:[%s9831_s3 + $0x8c0] ss:$8 sps:$4 sm:$0xff]  }
 0x1ac   : > { %2749 = vmatmul.mubr.bf16.gmra.mrb[44].mxu1 %v9016_v1  ;;  %4788 = vmatmul.mubr.bf16.gmra.mrb[12].mxu0 %v7936_v22  ;;  %v7337_v22 = vld [vmem:[%s9831_s3 + $0x894] ss:$8 sps:$4 sm:$0xff]  }
 0x1ad   : > { %2758 = vmatprep.mubr.bf16.mxu1 %v9021_v54  ;;  %4797 = vmatprep.mubr.bf16.mxu0 %v7973_v6  ;;  %v7335_v6 = vld [vmem:[%s9831_s3 + $0x890] ss:$8 sps:$4 sm:$0xff]  }
 0x1ae   : > { %4931 = vmatpush1.bf16.msra.mxu0 %v7323_v25  ;;  %v7349_v25 = vld [vmem:[%s9831_s3 + $0x8d4] ss:$8 sps:$4 sm:$0xff]  }
 0x1af   : > { %4932 = vmatprep.subr.bf16.mxu0 %v7331_v56  ;;  %v10151_v56 = vshrl.u32 %v8720_v50, 16 }
 0x1b2   : > { %4933 = vmatpush1.bf16.msra.mxu0 %v7329_v26 }
 0x1b3   : > { %4934 = vmatprep.subr.bf16.mxu0 %v7334_v36  ;;  %v7347_v36 = vld [vmem:[%s9831_s3 + $0x8d0] ss:$8 sps:$4 sm:$0xff]  }
 0x1b4   : > { %2759 = vmatmul.mubr.bf16.gmra.mrb[48].mxu1 %v9042_v34  ;;  %4798 = vmatmul.mubr.bf16.gmra.mrb[16].mxu0 %v7992_v7  ;;  %v7338_v7 = vld [vmem:[%s9831_s3 + $0x8a0] ss:$8 sps:$4 sm:$0xff]  }
 0x1b5   : > { %2768 = vmatprep.mubr.bf16.mxu1 %v9047_v58  ;;  %4807 = vmatprep.mubr.bf16.mxu0 %v8007_v19  ;;  %v7343_v19 = vld [vmem:[%s9831_s3 + $0x8b4] ss:$8 sps:$4 sm:$0xff]  }
 0x1b6   : > { %4935 = vmatpush1.bf16.msra.mxu0 %v7332_v10  ;;  %v7352_v10 = vld [vmem:[%s9831_s3 + $0x8e4] ss:$8 sps:$4 sm:$0xff]  }
 0x1b7   : > { %4936 = vmatprep.subr.bf16.mxu0 %v7337_v22 }
 0x1ba   : > { %4937 = vmatpush1.bf16.msra.mxu0 %v7335_v6  ;;  %v7350_v6 = vld [vmem:[%s9831_s3 + $0x8e0] ss:$8 sps:$4 sm:$0xff]  }
 0x1bb   : > { %4938 = vmatprep.subr.bf16.mxu0 %v7340_v62  ;;  %v7355_v62 = vld [vmem:[%s9831_s3 + $0x8f4] ss:$8 sps:$4 sm:$0xff]  }
 0x1bc   : > { %2769 = vmatmul.mubr.bf16.gmra.mrb[52].mxu1 %v9068_v27  ;;  %4808 = vmatmul.mubr.bf16.gmra.mrb[20].mxu0 %v8058_v38  ;;  %v1236_v38 = vrot.slane %v10150_v9, 1  ;;  %v7365_v9 = vld [vmem:[%s9831_s3 + $0x140] ss:$8 sps:$4 sm:$0xff]  }
 0x1bd   : > { %2778 = vmatprep.mubr.bf16.mxu1 %v9073_v21  ;;  %4817 = vmatprep.mubr.bf16.mxu0 %v8083_v55 }
 0x1be   : > { %4939 = vmatpush1.bf16.msra.mxu0 %v7338_v7  ;;  %v1237_v26 = vor.u32 %v1236_v38, %v10151_v56  ;;  %v7358_v7 = vld [vmem:[%s9831_s3 + $0x114] ss:$8 sps:$4 sm:$0xff]  }
 0x1bf   : > { %4940 = vmatprep.subr.bf16.mxu0 %v7343_v19  ;;  %v7360_v19 = vld [vmem:[%s9831_s3 + $0x124] ss:$8 sps:$4 sm:$0xff]   ;;  %v7366_v38 = vld [vmem:[%s9831_s3 + $0x154] ss:$8 sps:$4 sm:$0xff]  }
 0x1c0   : > { %v9499_v22 = vsel %vm8038_vm5, %v1237_v26, 0  ;;  %v7370_v56 = vld [vmem:[%s9831_s3 + $0x174] ss:$8 sps:$4 sm:$0xff]  }
 0x1c1   : > { %v10155_v26 = vld [vmem:[#allocation9_spill] sm:$0xff] }
 0x1c2   : > { %4941 = vmatpush1.bf16.msra.mxu0 %v7341_v61  ;;  %v7362_v61 = vld [vmem:[%s9831_s3 + $0x134] ss:$8 sps:$4 sm:$0xff]  }
 0x1c3   : > { %4942 = vmatprep.subr.bf16.mxu0 %v7346_v14  ;;  %v7363_v14 = vld [vmem:[%s9831_s3 + $0x130] ss:$8 sps:$4 sm:$0xff]  }
 0x1c4   : > { %2779 = vmatmul.mubr.bf16.gmra.mrb[56].mxu1 %v9094_v20  ;;  %4818 = vmatmul.mubr.bf16.gmra.mrb[24].mxu0 %v8123_v12 }
 0x1c5   : > { %2788 = vmatprep.mubr.bf16.mxu1 %v9477_v31  ;;  %4827 = vmatprep.mubr.bf16.mxu0 %v8146_v11 }
 0x1c6   : > { %4943 = vmatpush1.bf16.msra.mxu0 %v7344_v24  ;;  %v10154_v24 = vld [vmem:[#allocation35_spill] sm:$0xff] }
 0x1c7   : > { %4944 = vmatprep.subr.bf16.mxu0 %v7349_v25  ;;  %v7369_v25 = vld [vmem:[%s9831_s3 + $0x160] ss:$8 sps:$4 sm:$0xff]  }
 0x1ca   : > { %4945 = vmatpush1.bf16.msra.mxu0 %v7347_v36  ;;  %v10156_v36 = vld [vmem:[#allocation38_spill] sm:$0xff] }
 0x1cb   : > { %4946 = vmatprep.subr.bf16.mxu0 %v7352_v10  ;;  %v10157_v10 = vld [vmem:[#allocation10_spill] sm:$0xff] }
 0x1cc   : > { %2789 = vmatmul.mubr.bf16.gmra.mrb[60].mxu1 %v9499_v22  ;;  %4828 = vmatmul.mubr.bf16.gmra.mrb[28].mxu0 %v8176_v39 }
 0x1cd   : > { %3311 = vmatprep.mubr.bf16.mxu1 %v9339_v13  ;;  %4837 = vmatprep.mubr.bf16.mxu0 %v8208_v37 }
 0x1ce   : > { %4947 = vmatpush1.bf16.msra.mxu0 %v7350_v6  ;;  %v10158_v6 = vld [vmem:[#allocation43_spill] sm:$0xff] }
 0x1cf   : > { %4948 = vmatprep.subr.bf16.mxu0 %v7355_v62  ;;  %v7373_v62 = vld [vmem:[%s9831_s3 + $0x180] ss:$8 sps:$4 sm:$0xff]  }
 0x1d2   : > { %4949 = vmatpush1.bf16.msra.mxu0 %v7353_v8  ;;  %v7374_v8 = vld [vmem:[%s9831_s3 + $0x194] ss:$8 sps:$4 sm:$0xff]  }
 0x1d4   : > { %3312 = vmatmul.mubr.bf16.vlgmr.msra.gmra.mrb[0].mxu1 %v9339_v13  ;;  %4838 = vmatmul.mubr.bf16.gmra.mrb[32].mxu0 %v8274_v2  ;;  %v7359_v13 = vld [vmem:[%s9831_s3 + $0x110] ss:$8 sps:$4 sm:$0xff]  }
 0x1d5   : > { %6371 = vmatpush1.bf16.msra.mxu1 %v7357_v60  ;;  %3321 = vmatprep.mubr.bf16.mxu1 %v10152_v28  ;;  %v7375_v60 = vld [vmem:[%s9831_s3 + $0x190] ss:$8 sps:$4 sm:$0xff]   ;;  %v7376_v28 = vld [vmem:[%s9831_s3 + $0x1a4] ss:$8 sps:$4 sm:$0xff]  }
 0x1d6   : > { %4847 = vmatprep.mubr.bf16.mxu0 %v8301_v23  ;;  %6356 = vmatprep.subr.bf16.mxu1 %v7358_v7  ;;  %v10159_v7 = vld [vmem:[#allocation11_spill] sm:$0xff] }
 0x1d9   : > { %6372 = vmatpush1.bf16.msra.mxu1 %v7359_v13  ;;  %v10160_v13 = vld [vmem:[#allocation45_spill] sm:$0xff] }
 0x1da   : > { %6357 = vmatprep.subr.bf16.mxu1 %v7360_v19  ;;  %v10161_v19 = vld [vmem:[#allocation12_spill] sm:$0xff] }
 0x1dc   : > { %3322 = vmatmul.mubr.bf16.gmra.mrb[4].mxu1 %v10153_v5  ;;  %4848 = vmatmul.mubr.bf16.gmra.mrb[36].mxu0 %v10109_v44  ;;  %v7377_v5 = vld [vmem:[%s9831_s3 + $0x1a0] ss:$8 sps:$4 sm:$0xff]  }
 0x1dd   : > { %3331 = vmatprep.mubr.bf16.mxu1 %v7790_v46  ;;  %4857 = vmatprep.mubr.bf16.mxu0 %v10111_v17  ;;  %v7364_v46 = vld [vmem:[%s9831_s3 + $0x144] ss:$8 sps:$4 sm:$0xff]  }
 0x1de   : > { %6373 = vmatpush1.bf16.msra.mxu1 %v7361_v47  ;;  %v7378_v47 = vld [vmem:[%s9831_s3 + $0x1b4] ss:$8 sps:$4 sm:$0xff]  }
 0x1df   : > { %6358 = vmatprep.subr.bf16.mxu1 %v7362_v61  ;;  %v7379_v61 = vld [vmem:[%s9831_s3 + $0x1b0] ss:$8 sps:$4 sm:$0xff]  }
 0x1e2   : > { %6374 = vmatpush1.bf16.msra.mxu1 %v7363_v14  ;;  %v7380_v14 = vld [vmem:[%s9831_s3 + $0x1c4] ss:$8 sps:$4 sm:$0xff]  }
 0x1e3   : > { %6359 = vmatprep.subr.bf16.mxu1 %v7364_v46  ;;  %v10163_v46 = vld [vmem:[#allocation15_spill] sm:$0xff] }
 0x1e4   : > { %3332 = vmatmul.mubr.bf16.gmra.mrb[8].mxu1 %v10105_v45  ;;  %4858 = vmatmul.mubr.bf16.gmra.mrb[40].mxu0 %v10113_v63  ;;  %v7367_v45 = vld [vmem:[%s9831_s3 + $0x150] ss:$8 sps:$4 sm:$0xff]  }
 0x1e5   : > { %3341 = vmatprep.mubr.bf16.mxu1 %v10106_v49  ;;  %4867 = vmatprep.mubr.bf16.mxu0 %v8485_v18  ;;  %v7368_v49 = vld [vmem:[%s9831_s3 + $0x164] ss:$8 sps:$4 sm:$0xff]  }
 0x1e6   : > { %6375 = vmatpush1.bf16.msra.mxu1 %v7365_v9  ;;  %v7381_v9 = vld [vmem:[%s9831_s3 + $0x1c0] ss:$8 sps:$4 sm:$0xff]  }
 0x1e7   : > { %6360 = vmatprep.subr.bf16.mxu1 %v7366_v38  ;;  %v7382_v38 = vld [vmem:[%s9831_s3 + $0x1d4] ss:$8 sps:$4 sm:$0xff]  }
 0x1ea   : > { %6376 = vmatpush1.bf16.msra.mxu1 %v7367_v45  ;;  %v7383_v45 = vld [vmem:[%s9831_s3 + $0x1d0] ss:$8 sps:$4 sm:$0xff]  }
 0x1eb   : > { %6361 = vmatprep.subr.bf16.mxu1 %v7368_v49  ;;  %v10164_v49 = vld [vmem:[#allocation16_spill] sm:$0xff] }
 0x1ec   : > { %3342 = vmatmul.mubr.bf16.gmra.mrb[12].mxu1 %v10107_v59  ;;  %4868 = vmatmul.mubr.bf16.gmra.mrb[44].mxu0 %v8512_v52  ;;  %v7371_v59 = vld [vmem:[%s9831_s3 + $0x170] ss:$8 sps:$4 sm:$0xff]  }
 0x1ed   : > { %3351 = vmatprep.mubr.bf16.mxu1 %v10108_v3  ;;  %4877 = vmatprep.mubr.bf16.mxu0 %v10154_v24  ;;  %v7372_v3 = vld [vmem:[%s9831_s3 + $0x184] ss:$8 sps:$4 sm:$0xff]  }
 0x1ee   : > { %6377 = vmatpush1.bf16.msra.mxu1 %v7369_v25  ;;  %v10165_v25 = vld [vmem:[#allocation17_spill] sm:$0xff] }
 0x1ef   : > { %6362 = vmatprep.subr.bf16.mxu1 %v7370_v56  ;;  %v7385_v56 = vld [vmem:[%s9831_s3 + $0x1e0] ss:$8 sps:$4 sm:$0xff]  }
 0x1f2   : > { %6378 = vmatpush1.bf16.msra.mxu1 %v7371_v59  ;;  %v7386_v59 = vld [vmem:[%s9831_s3 + $0x1f4] ss:$8 sps:$4 sm:$0xff]  }
 0x1f3   : > { %6363 = vmatprep.subr.bf16.mxu1 %v7372_v3  ;;  %v7387_v3 = vld [vmem:[%s9831_s3 + $0x1f0] ss:$8 sps:$4 sm:$0xff]  }
 0x1f4   : > { %3352 = vmatmul.mubr.bf16.gmra.mrb[16].mxu1 %v10155_v26  ;;  %4878 = vmatmul.mubr.bf16.gmra.mrb[48].mxu0 %v10156_v36  ;;  %v10168_v26 = vld [vmem:[#allocation31_spill] sm:$0xff] }
 0x1f5   : > { %3361 = vmatprep.mubr.bf16.mxu1 %v10157_v10  ;;  %4887 = vmatprep.mubr.bf16.mxu0 %v10158_v6  ;;  %v10169_v10 = vld [vmem:[#allocation21_spill] sm:$0xff] }
 0x1f6   : > { %6379 = vmatpush1.bf16.msra.mxu1 %v7373_v62  ;;  %v10170_v62 = vld [vmem:[#allocation34_spill] sm:$0xff] }
 0x1f7   : > { %6364 = vmatprep.subr.bf16.mxu1 %v7374_v8  ;;  %v10171_v8 = vld [vmem:[#allocation23_spill] sm:$0xff] }
 0x1fa   : > { %6380 = vmatpush1.bf16.msra.mxu1 %v7375_v60  ;;  %v10172_v60 = vld [vmem:[#allocation36_spill] sm:$0xff] }
 0x1fb   : > { %6365 = vmatprep.subr.bf16.mxu1 %v7376_v28  ;;  %v10173_v28 = vld [vmem:[#allocation27_spill] sm:$0xff] }
 0x1fc   : > { %3362 = vmatmul.mubr.bf16.gmra.mrb[20].mxu1 %v10159_v7  ;;  %4888 = vmatmul.mubr.bf16.gmra.mrb[52].mxu0 %v10160_v13  ;;  %v10174_v7 = vld [vmem:[#allocation40_spill] sm:$0xff] }
 0x1fd   : > { %3371 = vmatprep.mubr.bf16.mxu1 %v10161_v19  ;;  %4897 = vmatprep.mubr.bf16.mxu0 %v10121_v42  ;;  %v10162_v42 = vld [vmem:[#allocation14_spill] sm:$0xff] }
 0x1fe   : > { %6381 = vmatpush1.bf16.msra.mxu1 %v7377_v5  ;;  %v10175_v19 = vld [vmem:[#allocation30_spill] sm:$0xff] }
 0x1ff   : > { %6366 = vmatprep.subr.bf16.mxu1 %v7378_v47  ;;  %v10176_v5 = vld [vmem:[#allocation42_spill] sm:$0xff] }
 0x200   : > { %v10178_v47 = vld [vmem:[#allocation46_spill] sm:$0xff] }
 0x202   : > { %6382 = vmatpush1.bf16.msra.mxu1 %v7379_v61  ;;  %v10179_v61 = vld [vmem:[#allocation33_spill] sm:$0xff] }
 0x203   : > { %6367 = vmatprep.subr.bf16.mxu1 %v7380_v14  ;;  %v10180_v14 = vld [vmem:[#allocation37_spill] sm:$0xff] }
 0x204   : > { %3372 = vmatmul.mubr.bf16.gmra.mrb[24].mxu1 %v10162_v42  ;;  %4898 = vmatmul.mubr.bf16.gmra.mrb[56].mxu0 %v8720_v50  ;;  %v7384_v50 = vld [vmem:[%s9831_s3 + $0x1e4] ss:$8 sps:$4 sm:$0xff]  }
 0x205   : > { %3381 = vmatprep.mubr.bf16.mxu1 %v10163_v46  ;;  %4907 = vmatprep.mubr.bf16.mxu0 %v10147_v41  ;;  %v10181_v42 = vld [vmem:[#allocation51_spill] sm:$0xff] }
 0x206   : > { %6383 = vmatpush1.bf16.msra.mxu1 %v7381_v9  ;;  %v10182_v46 = vld [vmem:[#allocation39_spill] sm:$0xff]  ;;  %v10183_v9 = vld [vmem:[#allocation41_spill] sm:$0xff] }
 0x207   : > { %6368 = vmatprep.subr.bf16.mxu1 %v7382_v38  ;;  %v10184_v38 = vld [vmem:[#allocation44_spill] sm:$0xff] }
 0x20a   : > { %6384 = vmatpush1.bf16.msra.mxu1 %v7383_v45  ;;  %v10185_v45 = vld [vmem:[#allocation48_spill] sm:$0xff] }
 0x20b   : > { %6369 = vmatprep.subr.bf16.mxu1 %v7384_v50 }
 0x20c   : > { %3382 = vmatmul.mubr.bf16.gmra.mrb[28].mxu1 %v10164_v49  ;;  %4908 = vmatmul.mubr.bf16.gmra.mrb[60].mxu0 %v10147_v41  ;;  %v10166_v41 = vld [vmem:[#allocation18_spill] sm:$0xff] }
 0x20d   : > { %3391 = vmatprep.mubr.bf16.mxu1 %v10165_v25  ;;  %4950 = vmatprep.mubr.bf16.mxu0 %v10128_v57  ;;  %v10167_v57 = vld [vmem:[#allocation19_spill] sm:$0xff] }
 0x20e   : > { %6385 = vmatpush1.bf16.msra.mxu1 %v7385_v56 }
 0x20f   : > { %6370 = vmatprep.subr.bf16.mxu1 %v7386_v59 }
 0x212   : > { %6386 = vmatpush1.bf16.msra.mxu1 %v7387_v3 }
 0x214   : > { %3392 = vmatmul.mubr.bf16.gmra.mrb[32].mxu1 %v10166_v41  ;;  %4951 = vmatmul.mubr.bf16.vlgmr.msra.gmra.mrb[0].mxu0 %v10130_v30  ;;  %v10177_v30 = vld [vmem:[#allocation32_spill] sm:$0xff] }
 0x215   : > { %3401 = vmatprep.mubr.bf16.mxu1 %v10167_v57  ;;  %4960 = vmatprep.mubr.bf16.mxu0 %v10168_v26 }
 0x21c   : > { %3402 = vmatmul.mubr.bf16.gmra.mrb[36].mxu1 %v10169_v10  ;;  %4961 = vmatmul.mubr.bf16.gmra.mrb[4].mxu0 %v10170_v62 }
 0x21d   : > { %3411 = vmatprep.mubr.bf16.mxu1 %v10171_v8  ;;  %4970 = vmatprep.mubr.bf16.mxu0 %v10172_v60 }
 0x224   : > { %3412 = vmatmul.mubr.bf16.gmra.mrb[40].mxu1 %v10173_v28  ;;  %4971 = vmatmul.mubr.bf16.gmra.mrb[8].mxu0 %v10174_v7 }
 0x225   : > { %3421 = vmatprep.mubr.bf16.mxu1 %v10175_v19  ;;  %4980 = vmatprep.mubr.bf16.mxu0 %v10176_v5 }
 0x22c   : > { %3422 = vmatmul.mubr.bf16.gmra.mrb[44].mxu1 %v10177_v30  ;;  %4981 = vmatmul.mubr.bf16.gmra.mrb[12].mxu0 %v10178_v47 }
 0x22d   : > { %3431 = vmatprep.mubr.bf16.mxu1 %v10179_v61  ;;  %4990 = vmatprep.mubr.bf16.mxu0 %v10144_v16  ;;  %v10186_v16 = vld [vmem:[#allocation49_spill] sm:$0xff] }
 0x234   : > { %3432 = vmatmul.mubr.bf16.gmra.mrb[48].mxu1 %v10180_v14  ;;  %4991 = vmatmul.mubr.bf16.gmra.mrb[16].mxu0 %v10181_v42 }
 0x235   : > { %3441 = vmatprep.mubr.bf16.mxu1 %v10182_v46  ;;  %5000 = vmatprep.mubr.bf16.mxu0 %v8823_v53 }
 0x23c   : > { %3442 = vmatmul.mubr.bf16.gmra.mrb[52].mxu1 %v10183_v9  ;;  %5001 = vmatmul.mubr.bf16.gmra.mrb[20].mxu0 %v8890_v4 }
 0x23d   : > { %3451 = vmatprep.mubr.bf16.mxu1 %v10184_v38  ;;  %5010 = vmatprep.mubr.bf16.mxu0 %v8897_v43 }
 0x244   : > { %3452 = vmatmul.mubr.bf16.gmra.mrb[56].mxu1 %v10185_v45  ;;  %5011 = vmatmul.mubr.bf16.gmra.mrb[24].mxu0 %v8915_v33 }
 0x245   : > { %3461 = vmatprep.mubr.bf16.mxu1 %v10186_v16  ;;  %5020 = vmatprep.mubr.bf16.mxu0 %v8923_v15 }
 0x24c   : > { %3462 = vmatmul.mubr.bf16.gmra.mrb[60].mxu1 %v8814_v40  ;;  %5021 = vmatmul.mubr.bf16.gmra.mrb[28].mxu0 %v8938_v35 }
 0x24d   : > { %3584 = vmatprep.mubr.bf16.mxu1 %v8083_v55  ;;  %5030 = vmatprep.mubr.bf16.mxu0 %v8943_v51 }
 0x254   : > { %3585 = vmatmul.mubr.bf16.vlgmr.msra.gmra.mrb[32].mxu1 %v8123_v12  ;;  %5031 = vmatmul.mubr.bf16.gmra.mrb[32].mxu0 %v8964_v32  ;;  %v10187_v12 = vld [vmem:[#allocation13_spill] sm:$0xff] }
 0x255   : > { %3594 = vmatprep.mubr.bf16.mxu1 %v8146_v11  ;;  %5040 = vmatprep.mubr.bf16.mxu0 %v8969_v48 }
 0x25c   : > { %3595 = vmatmul.mubr.bf16.gmra.mrb[36].mxu1 %v8176_v39  ;;  %5041 = vmatmul.mubr.bf16.gmra.mrb[36].mxu0 %v8990_v0 }
 0x25d   : > { %3604 = vmatprep.mubr.bf16.mxu1 %v8208_v37  ;;  %5050 = vmatprep.mubr.bf16.mxu0 %v8995_v29 }
 0x264   : > { %3605 = vmatmul.mubr.bf16.gmra.mrb[40].mxu1 %v8274_v2  ;;  %5051 = vmatmul.mubr.bf16.gmra.mrb[40].mxu0 %v9016_v1 }
 0x265   : > { %3614 = vmatprep.mubr.bf16.mxu1 %v8301_v23  ;;  %5060 = vmatprep.mubr.bf16.mxu0 %v9021_v54 }
 0x26c   : > { %3615 = vmatmul.mubr.bf16.gmra.mrb[44].mxu1 %v10109_v44  ;;  %5061 = vmatmul.mubr.bf16.gmra.mrb[44].mxu0 %v9042_v34 }
 0x26d   : > { %3624 = vmatprep.mubr.bf16.mxu1 %v10111_v17  ;;  %5070 = vmatprep.mubr.bf16.mxu0 %v9047_v58 }
 0x274   : > { %3625 = vmatmul.mubr.bf16.gmra.mrb[48].mxu1 %v10113_v63  ;;  %5071 = vmatmul.mubr.bf16.gmra.mrb[48].mxu0 %v9068_v27 }
 0x275   : > { %3634 = vmatprep.mubr.bf16.mxu1 %v8485_v18  ;;  %5080 = vmatprep.mubr.bf16.mxu0 %v9073_v21 }
 0x27c   : > { %3635 = vmatmul.mubr.bf16.gmra.mrb[52].mxu1 %v8512_v52  ;;  %5081 = vmatmul.mubr.bf16.gmra.mrb[52].mxu0 %v9094_v20 }
 0x27d   : > { %3644 = vmatprep.mubr.bf16.mxu1 %v10154_v24  ;;  %5090 = vmatprep.mubr.bf16.mxu0 %v9477_v31 }
 0x284   : > { %3645 = vmatmul.mubr.bf16.gmra.mrb[56].mxu1 %v10156_v36  ;;  %5091 = vmatmul.mubr.bf16.gmra.mrb[56].mxu0 %v9499_v22 }
 0x285   : > { %3654 = vmatprep.mubr.bf16.mxu1 %v10158_v6  ;;  %5100 = vmatprep.mubr.bf16.mxu0 %v10187_v12 }
 0x28c   : > { %3655 = vmatmul.mubr.bf16.gmra.mrb[60].mxu1 %v10160_v13  ;;  %5101 = vmatmul.mubr.bf16.gmra.mrb[60].mxu0 %v10187_v12 }
 0x2a7   : > { %v3313_v55 = vpop.f32.mrb[0].mxu1 }
 0x2a8   : > { %v3315_v39 = vpop.f32.mrb[1].mxu1 }
 0x2a9   : > { %v3317_v11 = vpop.f32.mrb[2].mxu1 }
 0x2aa   : > { %v3319_v37 = vpop.f32.mrb[3].mxu1 }
 0x2af   : > { %v3323_v2 = vpop.f32.mrb[4].mxu1 }
 0x2b0   : > { %v3325_v23 = vpop.f32.mrb[5].mxu1 }
 0x2b1   : > { %v3327_v18 = vpop.f32.mrb[6].mxu1 }
 0x2b2   : > { %v3329_v52 = vpop.f32.mrb[7].mxu1 }
 0x2b7   : > { %v9701_v40 = vpop.f32.mrb[8].mxu1 }
 0x2b8   : > { %v9703_v53 = vpop.f32.mrb[9].mxu1 }
 0x2b9   : > { %v9705_v4 = vpop.f32.mrb[10].mxu1 }
 0x2ba   : > { %v9707_v43 = vpop.f32.mrb[11].mxu1 }
 0x2bf   : > { %v9709_v33 = vpop.f32.mrb[12].mxu1 }
 0x2c0   : > { %v9711_v15 = vpop.f32.mrb[13].mxu1 }
 0x2c1   : > { %v9713_v35 = vpop.f32.mrb[14].mxu1 }
 0x2c2   : > { %v9715_v51 = vpop.f32.mrb[15].mxu1 }
 0x2c7   : > { %v9717_v32 = vpop.f32.mrb[16].mxu1 }
 0x2c8   : > { %v9719_v48 = vpop.f32.mrb[17].mxu1 }
 0x2c9   : > { %v9721_v0 = vpop.f32.mrb[18].mxu1 }
 0x2ca   : > { %v9723_v29 = vpop.f32.mrb[19].mxu1 }
 0x2cf   : > { %v9725_v1 = vpop.f32.mrb[20].mxu1 }
 0x2d0   : > { %v9727_v54 = vpop.f32.mrb[21].mxu1 }
 0x2d1   : > { %v9729_v34 = vpop.f32.mrb[22].mxu1 }
 0x2d2   : > { %v9731_v58 = vpop.f32.mrb[23].mxu1 }
 0x2d7   : > { %v9733_v27 = vpop.f32.mrb[24].mxu1 }
 0x2d8   : > { %v9735_v21 = vpop.f32.mrb[25].mxu1 }
 0x2d9   : > { %v9737_v20 = vpop.f32.mrb[26].mxu1 }
 0x2da   : > { %v9739_v44 = vpop.f32.mrb[27].mxu1 }
 0x2df   : > { %v9741_v17 = vpop.f32.mrb[28].mxu1 }
 0x2e0   : > { %v9743_v63 = vpop.f32.mrb[29].mxu1 }
 0x2e1   : > { %v9745_v31 = vpop.f32.mrb[30].mxu1 }
 0x2e2   : > { %v9747_v22 = vpop.f32.mrb[31].mxu1 }
 0x2e7   : > { %v4952_v24 = vpop.f32.mrb[0].mxu0 }
 0x2e8   : > { %v6387_v36 = vadd.f32 %v4952_v24, %v3313_v55  ;;  %v4954_v6 = vpop.f32.mrb[1].mxu0 }
 0x2e9   : > { %v6388_v13 = vadd.f32 %v4954_v6, %v3315_v39  ;;  %v4956_v50 = vpop.f32.mrb[2].mxu0 }
 0x2ea   : > { %v6389_v49 = vadd.f32 %v4956_v50, %v3317_v11  ;;  %v4958_v25 = vpop.f32.mrb[3].mxu0  ;;  %v5463_v3 = vmul.f32 %v6387_v36, %v6387_v36 }
 0x2eb   : > { %v6323_v56 = vpack.c.bf16 %v6388_v13, %v6387_v36  ;;  %v6390_v59 = vadd.f32 %v4958_v25, %v3319_v37  ;;  %v5464_v26 = vmul.f32 %v6388_v13, %v6388_v13 }
 0x2ec   : > { %v5399_v41 = vadd.f32 %v6389_v49, %v6387_v36  ;;  %v5465_v57 = vmul.f32 %v6389_v49, %v6389_v49 }
 0x2ed   : > { %5367 = vst [vmem:[%s9754_s11] sm:$0xff] %v6323_v56  ;;  %v6324_v10 = vpack.c.bf16 %v6390_v59, %v6389_v49  ;;  %v5430_v62 = vadd.f32 %v6390_v59, %v6388_v13  ;;  %v5466_v8 = vmul.f32 %v6390_v59, %v6390_v59 }
 0x2ee   : > { %v5527_v60 = vadd.f32 %v5465_v57, %v5463_v3 }
 0x2ef   : > { %5368 = vst [vmem:[%s9754_s11 + $0x8] sm:$0xff] %v6324_v10  ;;  %v5558_v28 = vadd.f32 %v5466_v8, %v5464_v26  ;;  %v4962_v7 = vpop.f32.mrb[4].mxu0 }
 0x2f0   : > { %v6391_v19 = vadd.f32 %v4962_v7, %v3323_v2  ;;  %v4964_v5 = vpop.f32.mrb[5].mxu0 }
 0x2f1   : > { %v6392_v30 = vadd.f32 %v4964_v5, %v3325_v23  ;;  %v4966_v47 = vpop.f32.mrb[6].mxu0 }
 0x2f2   : > { %v5400_v61 = vadd.f32 %v6391_v19, %v5399_v41  ;;  %v5467_v14 = vmul.f32 %v6391_v19, %v6391_v19  ;;  %v6393_v42 = vadd.f32 %v4966_v47, %v3327_v18  ;;  %v4968_v46 = vpop.f32.mrb[7].mxu0 }
 0x2f3   : > { %v6325_v9 = vpack.c.bf16 %v6392_v30, %v6391_v19  ;;  %v5431_v38 = vadd.f32 %v6392_v30, %v5430_v62  ;;  %v5468_v45 = vmul.f32 %v6392_v30, %v6392_v30  ;;  %v6394_v16 = vadd.f32 %v4968_v46, %v3329_v52 }
 0x2f4   : > { %v5528_v12 = vadd.f32 %v5527_v60, %v5467_v14  ;;  %v5401_v55 = vadd.f32 %v6393_v42, %v5400_v61  ;;  %v5469_v39 = vmul.f32 %v6393_v42, %v6393_v42 }
 0x2f5   : > { %5369 = vst [vmem:[%s9754_s11 + $0x10] sm:$0xff] %v6325_v9  ;;  %v5559_v11 = vadd.f32 %v5558_v28, %v5468_v45  ;;  %v6326_v37 = vpack.c.bf16 %v6394_v16, %v6393_v42  ;;  %v5432_v24 = vadd.f32 %v6394_v16, %v5431_v38  ;;  %v5470_v2 = vmul.f32 %v6394_v16, %v6394_v16 }
 0x2f6   : > { %v5529_v36 = vadd.f32 %v5528_v12, %v5469_v39 }
 0x2f7   : > { %5370 = vst [vmem:[%s9754_s11 + $0x18] sm:$0xff] %v6326_v37  ;;  %v5560_v23 = vadd.f32 %v5559_v11, %v5470_v2  ;;  %v4972_v6 = vpop.f32.mrb[8].mxu0 }
 0x2f8   : > { %v6395_v18 = vadd.f32 %v4972_v6, %v9701_v40  ;;  %v4974_v13 = vpop.f32.mrb[9].mxu0 }
 0x2f9   : > { %v6396_v50 = vadd.f32 %v4974_v13, %v9703_v53  ;;  %v4976_v49 = vpop.f32.mrb[10].mxu0 }
 0x2fa   : > { %v5402_v52 = vadd.f32 %v6395_v18, %v5401_v55  ;;  %v5471_v25 = vmul.f32 %v6395_v18, %v6395_v18  ;;  %v6397_v56 = vadd.f32 %v4976_v49, %v9705_v4  ;;  %v4978_v59 = vpop.f32.mrb[11].mxu0 }
 0x2fb   : > { %v6327_v3 = vpack.c.bf16 %v6396_v50, %v6395_v18  ;;  %v5433_v41 = vadd.f32 %v6396_v50, %v5432_v24  ;;  %v5472_v57 = vmul.f32 %v6396_v50, %v6396_v50  ;;  %v6398_v26 = vadd.f32 %v4978_v59, %v9707_v43 }
 0x2fc   : > { %v5530_v10 = vadd.f32 %v5529_v36, %v5471_v25  ;;  %v5403_v62 = vadd.f32 %v6397_v56, %v5402_v52  ;;  %v5473_v8 = vmul.f32 %v6397_v56, %v6397_v56 }
 0x2fd   : > { %5371 = vst [vmem:[%s9754_s11 + $0x20] sm:$0xff] %v6327_v3  ;;  %v5561_v40 = vadd.f32 %v5560_v23, %v5472_v57  ;;  %v6328_v60 = vpack.c.bf16 %v6398_v26, %v6397_v56  ;;  %v5434_v28 = vadd.f32 %v6398_v26, %v5433_v41  ;;  %v5474_v53 = vmul.f32 %v6398_v26, %v6398_v26 }
 0x2fe   : > { %v5531_v7 = vadd.f32 %v5530_v10, %v5473_v8 }
 0x2ff   : > { %5372 = vst [vmem:[%s9754_s11 + $0x28] sm:$0xff] %v6328_v60  ;;  %v5562_v19 = vadd.f32 %v5561_v40, %v5474_v53  ;;  %v4982_v5 = vpop.f32.mrb[12].mxu0 }
 0x300   : > { %v6399_v4 = vadd.f32 %v4982_v5, %v9709_v33  ;;  %v4984_v30 = vpop.f32.mrb[13].mxu0 }
 0x301   : > { %v6400_v47 = vadd.f32 %v4984_v30, %v9711_v15  ;;  %v4986_v61 = vpop.f32.mrb[14].mxu0 }
 0x302   : > { %v5404_v43 = vadd.f32 %v6399_v4, %v5403_v62  ;;  %v5475_v14 = vmul.f32 %v6399_v4, %v6399_v4  ;;  %v6401_v42 = vadd.f32 %v4986_v61, %v9713_v35  ;;  %v4988_v46 = vpop.f32.mrb[15].mxu0 }
 0x303   : > { %v6329_v9 = vpack.c.bf16 %v6400_v47, %v6399_v4  ;;  %v5435_v38 = vadd.f32 %v6400_v47, %v5434_v28  ;;  %v5476_v45 = vmul.f32 %v6400_v47, %v6400_v47  ;;  %v6402_v16 = vadd.f32 %v4988_v46, %v9715_v51 }
 0x304   : > { %v5532_v12 = vadd.f32 %v5531_v7, %v5475_v14  ;;  %v5405_v55 = vadd.f32 %v6401_v42, %v5404_v43  ;;  %v5477_v39 = vmul.f32 %v6401_v42, %v6401_v42 }
 0x305   : > { %5373 = vst [vmem:[%s9754_s11 + $0x30] sm:$0xff] %v6329_v9  ;;  %v5563_v33 = vadd.f32 %v5562_v19, %v5476_v45  ;;  %v6330_v11 = vpack.c.bf16 %v6402_v16, %v6401_v42  ;;  %v5436_v37 = vadd.f32 %v6402_v16, %v5435_v38  ;;  %v5478_v15 = vmul.f32 %v6402_v16, %v6402_v16 }
 0x306   : > { %v5533_v24 = vadd.f32 %v5532_v12, %v5477_v39 }
 0x307   : > { %5374 = vst [vmem:[%s9754_s11 + $0x38] sm:$0xff] %v6330_v11  ;;  %v5564_v2 = vadd.f32 %v5563_v33, %v5478_v15  ;;  %v4992_v36 = vpop.f32.mrb[16].mxu0 }
 0x308   : > { %v6403_v35 = vadd.f32 %v4992_v36, %v9717_v32  ;;  %v4994_v23 = vpop.f32.mrb[17].mxu0 }
 0x309   : > { %v6404_v6 = vadd.f32 %v4994_v23, %v9719_v48  ;;  %v4996_v18 = vpop.f32.mrb[18].mxu0 }
 0x30a   : > { %v5406_v51 = vadd.f32 %v6403_v35, %v5405_v55  ;;  %v5479_v13 = vmul.f32 %v6403_v35, %v6403_v35  ;;  %v6405_v50 = vadd.f32 %v4996_v18, %v9721_v0  ;;  %v4998_v49 = vpop.f32.mrb[19].mxu0 }
 0x30b   : > { %v6331_v52 = vpack.c.bf16 %v6404_v6, %v6403_v35  ;;  %v5437_v25 = vadd.f32 %v6404_v6, %v5436_v37  ;;  %v5480_v56 = vmul.f32 %v6404_v6, %v6404_v6  ;;  %v6406_v59 = vadd.f32 %v4998_v49, %v9723_v29 }
 0x30c   : > { %v5534_v3 = vadd.f32 %v5533_v24, %v5479_v13  ;;  %v5407_v41 = vadd.f32 %v6405_v50, %v5406_v51  ;;  %v5481_v57 = vmul.f32 %v6405_v50, %v6405_v50 }
 0x30d   : > { %5375 = vst [vmem:[%s9754_s11 + $0x40] sm:$0xff] %v6331_v52  ;;  %v5565_v32 = vadd.f32 %v5564_v2, %v5480_v56  ;;  %v6332_v26 = vpack.c.bf16 %v6406_v59, %v6405_v50  ;;  %v5438_v10 = vadd.f32 %v6406_v59, %v5437_v25  ;;  %v5482_v48 = vmul.f32 %v6406_v59, %v6406_v59 }
 0x30e   : > { %v5535_v62 = vadd.f32 %v5534_v3, %v5481_v57 }
 0x30f   : > { %5376 = vst [vmem:[%s9754_s11 + $0x48] sm:$0xff] %v6332_v26  ;;  %v5566_v8 = vadd.f32 %v5565_v32, %v5482_v48  ;;  %v5002_v40 = vpop.f32.mrb[20].mxu0 }
 0x310   : > { %v6407_v0 = vadd.f32 %v5002_v40, %v9725_v1  ;;  %v5004_v60 = vpop.f32.mrb[21].mxu0 }
 0x311   : > { %v6408_v28 = vadd.f32 %v5004_v60, %v9727_v54  ;;  %v5006_v53 = vpop.f32.mrb[22].mxu0 }
 0x312   : > { %v5408_v29 = vadd.f32 %v6407_v0, %v5407_v41  ;;  %v5483_v7 = vmul.f32 %v6407_v0, %v6407_v0  ;;  %v6409_v19 = vadd.f32 %v5006_v53, %v9729_v34  ;;  %v5008_v5 = vpop.f32.mrb[23].mxu0 }
 0x313   : > { %v6333_v4 = vpack.c.bf16 %v6408_v28, %v6407_v0  ;;  %v5439_v30 = vadd.f32 %v6408_v28, %v5438_v10  ;;  %v5484_v47 = vmul.f32 %v6408_v28, %v6408_v28  ;;  %v6410_v61 = vadd.f32 %v5008_v5, %v9731_v58 }
 0x314   : > { %v5536_v43 = vadd.f32 %v5535_v62, %v5483_v7  ;;  %v5409_v14 = vadd.f32 %v6409_v19, %v5408_v29  ;;  %v5485_v42 = vmul.f32 %v6409_v19, %v6409_v19 }
 0x315   : > { %5377 = vst [vmem:[%s9754_s11 + $0x50] sm:$0xff] %v6333_v4  ;;  %v5567_v1 = vadd.f32 %v5566_v8, %v5484_v47  ;;  %v6334_v46 = vpack.c.bf16 %v6410_v61, %v6409_v19  ;;  %v5440_v9 = vadd.f32 %v6410_v61, %v5439_v30  ;;  %v5486_v54 = vmul.f32 %v6410_v61, %v6410_v61 }
 0x316   : > { %v5537_v38 = vadd.f32 %v5536_v43, %v5485_v42 }
 0x317   : > { %5378 = vst [vmem:[%s9754_s11 + $0x58] sm:$0xff] %v6334_v46  ;;  %v5568_v45 = vadd.f32 %v5567_v1, %v5486_v54  ;;  %v5012_v16 = vpop.f32.mrb[24].mxu0 }
 0x318   : > { %v6411_v34 = vadd.f32 %v5012_v16, %v9733_v27  ;;  %v5014_v12 = vpop.f32.mrb[25].mxu0 }
 0x319   : > { %v6412_v55 = vadd.f32 %v5014_v12, %v9735_v21  ;;  %v5016_v39 = vpop.f32.mrb[26].mxu0 }
 0x31a   : > { %v5410_v58 = vadd.f32 %v6411_v34, %v5409_v14  ;;  %v5487_v33 = vmul.f32 %v6411_v34, %v6411_v34  ;;  %v6413_v11 = vadd.f32 %v5016_v39, %v9737_v20  ;;  %v5018_v37 = vpop.f32.mrb[27].mxu0 }
 0x31b   : > { %v6335_v15 = vpack.c.bf16 %v6412_v55, %v6411_v34  ;;  %v5441_v24 = vadd.f32 %v6412_v55, %v5440_v9  ;;  %v5488_v2 = vmul.f32 %v6412_v55, %v6412_v55  ;;  %v6414_v36 = vadd.f32 %v5018_v37, %v9739_v44 }
 0x31c   : > { %v5538_v35 = vadd.f32 %v5537_v38, %v5487_v33  ;;  %v5411_v23 = vadd.f32 %v6413_v11, %v5410_v58  ;;  %v5489_v6 = vmul.f32 %v6413_v11, %v6413_v11 }
 0x31d   : > { %5379 = vst [vmem:[%s9754_s11 + $0x60] sm:$0xff] %v6335_v15  ;;  %v5569_v27 = vadd.f32 %v5568_v45, %v5488_v2  ;;  %v6336_v18 = vpack.c.bf16 %v6414_v36, %v6413_v11  ;;  %v5442_v51 = vadd.f32 %v6414_v36, %v5441_v24  ;;  %v5490_v21 = vmul.f32 %v6414_v36, %v6414_v36 }
 0x31e   : > { %v5539_v13 = vadd.f32 %v5538_v35, %v5489_v6 }
 0x31f   : > { %5380 = vst [vmem:[%s9754_s11 + $0x68] sm:$0xff] %v6336_v18  ;;  %v5570_v50 = vadd.f32 %v5569_v27, %v5490_v21  ;;  %v5022_v49 = vpop.f32.mrb[28].mxu0 }
 0x320   : > { %v6415_v20 = vadd.f32 %v5022_v49, %v9741_v17  ;;  %v5024_v52 = vpop.f32.mrb[29].mxu0 }
 0x321   : > { %v6416_v25 = vadd.f32 %v5024_v52, %v9743_v63  ;;  %v5026_v56 = vpop.f32.mrb[30].mxu0 }
 0x322   : > { %v5412_v44 = vadd.f32 %v6415_v20, %v5411_v23  ;;  %v5491_v59 = vmul.f32 %v6415_v20, %v6415_v20  ;;  %v6417_v3 = vadd.f32 %v5026_v56, %v9745_v31  ;;  %v5028_v41 = vpop.f32.mrb[31].mxu0 }
 0x323   : > { %v6337_v57 = vpack.c.bf16 %v6416_v25, %v6415_v20  ;;  %v5443_v32 = vadd.f32 %v6416_v25, %v5442_v51  ;;  %v5492_v26 = vmul.f32 %v6416_v25, %v6416_v25  ;;  %v6418_v10 = vadd.f32 %v5028_v41, %v9747_v22 }
 0x324   : > { %v5540_v48 = vadd.f32 %v5539_v13, %v5491_v59  ;;  %v5413_v62 = vadd.f32 %v6417_v3, %v5412_v44  ;;  %v5493_v8 = vmul.f32 %v6417_v3, %v6417_v3 }
 0x325   : > { %5381 = vst [vmem:[%s9754_s11 + $0x70] sm:$0xff] %v6337_v57  ;;  %v5571_v17 = vadd.f32 %v5570_v50, %v5492_v26  ;;  %v6338_v40 = vpack.c.bf16 %v6418_v10, %v6417_v3  ;;  %v5444_v0 = vadd.f32 %v6418_v10, %v5443_v32  ;;  %v5494_v63 = vmul.f32 %v6418_v10, %v6418_v10 }
 0x326   : > { %v5541_v60 = vadd.f32 %v5540_v48, %v5493_v8 }
 0x327   : > { %5382 = vst [vmem:[%s9754_s11 + $0x78] sm:$0xff] %v6338_v40  ;;  %v5572_v28 = vadd.f32 %v5571_v17, %v5494_v63  ;;  %v3586_v53 = vpop.f32.mrb[32].mxu1  ;;  %v5032_v29 = vpop.f32.mrb[32].mxu0 }
 0x328   : > { %v6419_v31 = vadd.f32 %v5032_v29, %v3586_v53  ;;  %v3588_v7 = vpop.f32.mrb[33].mxu1  ;;  %v5034_v19 = vpop.f32.mrb[33].mxu0 }
 0x329   : > { %v6420_v5 = vadd.f32 %v5034_v19, %v3588_v7  ;;  %v3590_v4 = vpop.f32.mrb[34].mxu1  ;;  %v5036_v22 = vpop.f32.mrb[34].mxu0 }
 0x32a   : > { %v5414_v30 = vadd.f32 %v6419_v31, %v5413_v62  ;;  %v5495_v47 = vmul.f32 %v6419_v31, %v6419_v31  ;;  %v6421_v61 = vadd.f32 %v5036_v22, %v3590_v4  ;;  %v3592_v43 = vpop.f32.mrb[35].mxu1  ;;  %v5038_v14 = vpop.f32.mrb[35].mxu0 }
 0x32b   : > { %v6339_v42 = vpack.c.bf16 %v6420_v5, %v6419_v31  ;;  %v5445_v1 = vadd.f32 %v6420_v5, %v5444_v0  ;;  %v5496_v46 = vmul.f32 %v6420_v5, %v6420_v5  ;;  %v6422_v9 = vadd.f32 %v5038_v14, %v3592_v43 }
 0x32c   : > { %v5542_v54 = vadd.f32 %v5541_v60, %v5495_v47  ;;  %v5415_v38 = vadd.f32 %v6421_v61, %v5414_v30  ;;  %v5497_v45 = vmul.f32 %v6421_v61, %v6421_v61 }
 0x32d   : > { %5383 = vst [vmem:[%s9754_s11 + $0x80] sm:$0xff] %v6339_v42  ;;  %v5573_v16 = vadd.f32 %v5572_v28, %v5496_v46  ;;  %v6340_v34 = vpack.c.bf16 %v6422_v9, %v6421_v61  ;;  %v5446_v12 = vadd.f32 %v6422_v9, %v5445_v1  ;;  %v5498_v55 = vmul.f32 %v6422_v9, %v6422_v9 }
 0x32e   : > { %v5543_v39 = vadd.f32 %v5542_v54, %v5497_v45 }
 0x32f   : > { %5384 = vst [vmem:[%s9754_s11 + $0x88] sm:$0xff] %v6340_v34  ;;  %v5574_v58 = vadd.f32 %v5573_v16, %v5498_v55  ;;  %v3596_v33 = vpop.f32.mrb[36].mxu1  ;;  %v5042_v11 = vpop.f32.mrb[36].mxu0 }
 0x330   : > { %v6423_v37 = vadd.f32 %v5042_v11, %v3596_v33  ;;  %v3598_v15 = vpop.f32.mrb[37].mxu1  ;;  %v5044_v24 = vpop.f32.mrb[37].mxu0 }
 0x331   : > { %v6424_v2 = vadd.f32 %v5044_v24, %v3598_v15  ;;  %v3600_v36 = vpop.f32.mrb[38].mxu1  ;;  %v5046_v35 = vpop.f32.mrb[38].mxu0 }
 0x332   : > { %v5416_v23 = vadd.f32 %v6423_v37, %v5415_v38  ;;  %v5499_v6 = vmul.f32 %v6423_v37, %v6423_v37  ;;  %v6425_v27 = vadd.f32 %v5046_v35, %v3600_v36  ;;  %v3602_v18 = vpop.f32.mrb[39].mxu1  ;;  %v5048_v51 = vpop.f32.mrb[39].mxu0 }
 0x333   : > { %v6341_v21 = vpack.c.bf16 %v6424_v2, %v6423_v37  ;;  %v5447_v13 = vadd.f32 %v6424_v2, %v5446_v12  ;;  %v5500_v50 = vmul.f32 %v6424_v2, %v6424_v2  ;;  %v6426_v49 = vadd.f32 %v5048_v51, %v3602_v18 }
 0x334   : > { %v5544_v20 = vadd.f32 %v5543_v39, %v5499_v6  ;;  %v5417_v52 = vadd.f32 %v6425_v27, %v5416_v23  ;;  %v5501_v25 = vmul.f32 %v6425_v27, %v6425_v27 }
 0x335   : > { %5385 = vst [vmem:[%s9754_s11 + $0x90] sm:$0xff] %v6341_v21  ;;  %v5575_v56 = vadd.f32 %v5574_v58, %v5500_v50  ;;  %v6342_v44 = vpack.c.bf16 %v6426_v49, %v6425_v27  ;;  %v5448_v59 = vadd.f32 %v6426_v49, %v5447_v13  ;;  %v5502_v3 = vmul.f32 %v6426_v49, %v6426_v49 }
 0x336   : > { %v5545_v41 = vadd.f32 %v5544_v20, %v5501_v25 }
 0x337   : > { %5386 = vst [vmem:[%s9754_s11 + $0x98] sm:$0xff] %v6342_v44  ;;  %v5576_v57 = vadd.f32 %v5575_v56, %v5502_v3  ;;  %v3606_v32 = vpop.f32.mrb[40].mxu1  ;;  %v5052_v26 = vpop.f32.mrb[40].mxu0 }
 0x338   : > { %v6427_v10 = vadd.f32 %v5052_v26, %v3606_v32  ;;  %v3608_v48 = vpop.f32.mrb[41].mxu1  ;;  %v5054_v62 = vpop.f32.mrb[41].mxu0 }
 0x339   : > { %v6428_v8 = vadd.f32 %v5054_v62, %v3608_v48  ;;  %v3610_v17 = vpop.f32.mrb[42].mxu1  ;;  %v5056_v40 = vpop.f32.mrb[42].mxu0 }
 0x33a   : > { %v5418_v0 = vadd.f32 %v6427_v10, %v5417_v52  ;;  %v5503_v63 = vmul.f32 %v6427_v10, %v6427_v10  ;;  %v6429_v60 = vadd.f32 %v5056_v40, %v3610_v17  ;;  %v3612_v28 = vpop.f32.mrb[43].mxu1  ;;  %v5058_v53 = vpop.f32.mrb[43].mxu0 }
 0x33b   : > { %v6343_v29 = vpack.c.bf16 %v6428_v8, %v6427_v10  ;;  %v5449_v31 = vadd.f32 %v6428_v8, %v5448_v59  ;;  %v5504_v7 = vmul.f32 %v6428_v8, %v6428_v8  ;;  %v6430_v19 = vadd.f32 %v5058_v53, %v3612_v28 }
 0x33c   : > { %v5546_v5 = vadd.f32 %v5545_v41, %v5503_v63  ;;  %v5419_v4 = vadd.f32 %v6429_v60, %v5418_v0  ;;  %v5505_v22 = vmul.f32 %v6429_v60, %v6429_v60 }
 0x33d   : > { %5387 = vst [vmem:[%s9754_s11 + $0xa0] sm:$0xff] %v6343_v29  ;;  %v5577_v30 = vadd.f32 %v5576_v57, %v5504_v7  ;;  %v6344_v47 = vpack.c.bf16 %v6430_v19, %v6429_v60  ;;  %v5450_v61 = vadd.f32 %v6430_v19, %v5449_v31  ;;  %v5506_v43 = vmul.f32 %v6430_v19, %v6430_v19 }
 0x33e   : > { %v5547_v14 = vadd.f32 %v5546_v5, %v5505_v22 }
 0x33f   : > { %5388 = vst [vmem:[%s9754_s11 + $0xa8] sm:$0xff] %v6344_v47  ;;  %v5578_v42 = vadd.f32 %v5577_v30, %v5506_v43  ;;  %v3616_v1 = vpop.f32.mrb[44].mxu1  ;;  %v5062_v46 = vpop.f32.mrb[44].mxu0 }
 0x340   : > { %v6431_v9 = vadd.f32 %v5062_v46, %v3616_v1  ;;  %v3618_v54 = vpop.f32.mrb[45].mxu1  ;;  %v5064_v38 = vpop.f32.mrb[45].mxu0 }
 0x341   : > { %v6432_v45 = vadd.f32 %v5064_v38, %v3618_v54  ;;  %v3620_v16 = vpop.f32.mrb[46].mxu1  ;;  %v5066_v34 = vpop.f32.mrb[46].mxu0 }
 0x342   : > { %v5420_v12 = vadd.f32 %v6431_v9, %v5419_v4  ;;  %v5507_v55 = vmul.f32 %v6431_v9, %v6431_v9  ;;  %v6433_v39 = vadd.f32 %v5066_v34, %v3620_v16  ;;  %v3622_v58 = vpop.f32.mrb[47].mxu1  ;;  %v5068_v33 = vpop.f32.mrb[47].mxu0 }
 0x343   : > { %v6345_v11 = vpack.c.bf16 %v6432_v45, %v6431_v9  ;;  %v5451_v37 = vadd.f32 %v6432_v45, %v5450_v61  ;;  %v5508_v15 = vmul.f32 %v6432_v45, %v6432_v45  ;;  %v6434_v24 = vadd.f32 %v5068_v33, %v3622_v58 }
 0x344   : > { %v5548_v2 = vadd.f32 %v5547_v14, %v5507_v55  ;;  %v5421_v36 = vadd.f32 %v6433_v39, %v5420_v12  ;;  %v5509_v35 = vmul.f32 %v6433_v39, %v6433_v39 }
 0x345   : > { %5389 = vst [vmem:[%s9754_s11 + $0xb0] sm:$0xff] %v6345_v11  ;;  %v5579_v23 = vadd.f32 %v5578_v42, %v5508_v15  ;;  %v6346_v6 = vpack.c.bf16 %v6434_v24, %v6433_v39  ;;  %v5452_v27 = vadd.f32 %v6434_v24, %v5451_v37  ;;  %v5510_v18 = vmul.f32 %v6434_v24, %v6434_v24 }
 0x346   : > { %v5549_v51 = vadd.f32 %v5548_v2, %v5509_v35 }
 0x347   : > { %5390 = vst [vmem:[%s9754_s11 + $0xb8] sm:$0xff] %v6346_v6  ;;  %v5580_v21 = vadd.f32 %v5579_v23, %v5510_v18  ;;  %v3626_v13 = vpop.f32.mrb[48].mxu1  ;;  %v5072_v50 = vpop.f32.mrb[48].mxu0 }
 0x348   : > { %v6435_v49 = vadd.f32 %v5072_v50, %v3626_v13  ;;  %v3628_v20 = vpop.f32.mrb[49].mxu1  ;;  %v5074_v52 = vpop.f32.mrb[49].mxu0 }
 0x349   : > { %v6436_v25 = vadd.f32 %v5074_v52, %v3628_v20  ;;  %v3630_v56 = vpop.f32.mrb[50].mxu1  ;;  %v5076_v44 = vpop.f32.mrb[50].mxu0 }
 0x34a   : > { %v5422_v59 = vadd.f32 %v6435_v49, %v5421_v36  ;;  %v5511_v3 = vmul.f32 %v6435_v49, %v6435_v49  ;;  %v6437_v41 = vadd.f32 %v5076_v44, %v3630_v56  ;;  %v3632_v57 = vpop.f32.mrb[51].mxu1  ;;  %v5078_v32 = vpop.f32.mrb[51].mxu0 }
 0x34b   : > { %v6347_v26 = vpack.c.bf16 %v6436_v25, %v6435_v49  ;;  %v5453_v10 = vadd.f32 %v6436_v25, %v5452_v27  ;;  %v5512_v48 = vmul.f32 %v6436_v25, %v6436_v25  ;;  %v6438_v62 = vadd.f32 %v5078_v32, %v3632_v57 }
 0x34c   : > { %v5550_v8 = vadd.f32 %v5549_v51, %v5511_v3  ;;  %v5423_v17 = vadd.f32 %v6437_v41, %v5422_v59  ;;  %v5513_v40 = vmul.f32 %v6437_v41, %v6437_v41 }
 0x34d   : > { %5391 = vst [vmem:[%s9754_s11 + $0xc0] sm:$0xff] %v6347_v26  ;;  %v5581_v0 = vadd.f32 %v5580_v21, %v5512_v48  ;;  %v6348_v63 = vpack.c.bf16 %v6438_v62, %v6437_v41  ;;  %v5454_v60 = vadd.f32 %v6438_v62, %v5453_v10  ;;  %v5514_v28 = vmul.f32 %v6438_v62, %v6438_v62 }
 0x34e   : > { %v5551_v53 = vadd.f32 %v5550_v8, %v5513_v40 }
 0x34f   : > { %5392 = vst [vmem:[%s9754_s11 + $0xc8] sm:$0xff] %v6348_v63  ;;  %v5582_v29 = vadd.f32 %v5581_v0, %v5514_v28  ;;  %v3636_v31 = vpop.f32.mrb[52].mxu1  ;;  %v5082_v7 = vpop.f32.mrb[52].mxu0 }
 0x350   : > { %v6439_v19 = vadd.f32 %v5082_v7, %v3636_v31  ;;  %v3638_v5 = vpop.f32.mrb[53].mxu1  ;;  %v5084_v4 = vpop.f32.mrb[53].mxu0 }
 0x351   : > { %v6440_v22 = vadd.f32 %v5084_v4, %v3638_v5  ;;  %v3640_v30 = vpop.f32.mrb[54].mxu1  ;;  %v5086_v47 = vpop.f32.mrb[54].mxu0 }
 0x352   : > { %v5424_v61 = vadd.f32 %v6439_v19, %v5423_v17  ;;  %v5515_v43 = vmul.f32 %v6439_v19, %v6439_v19  ;;  %v6441_v14 = vadd.f32 %v5086_v47, %v3640_v30  ;;  %v3642_v42 = vpop.f32.mrb[55].mxu1  ;;  %v5088_v1 = vpop.f32.mrb[55].mxu0 }
 0x353   : > { %v6349_v46 = vpack.c.bf16 %v6440_v22, %v6439_v19  ;;  %v5455_v9 = vadd.f32 %v6440_v22, %v5454_v60  ;;  %v5516_v54 = vmul.f32 %v6440_v22, %v6440_v22  ;;  %v6442_v38 = vadd.f32 %v5088_v1, %v3642_v42 }
 0x354   : > { %v5552_v45 = vadd.f32 %v5551_v53, %v5515_v43  ;;  %v5425_v16 = vadd.f32 %v6441_v14, %v5424_v61  ;;  %v5517_v34 = vmul.f32 %v6441_v14, %v6441_v14 }
 0x355   : > { %5393 = vst [vmem:[%s9754_s11 + $0xd0] sm:$0xff] %v6349_v46  ;;  %v5583_v12 = vadd.f32 %v5582_v29, %v5516_v54  ;;  %v6350_v55 = vpack.c.bf16 %v6442_v38, %v6441_v14  ;;  %v5456_v39 = vadd.f32 %v6442_v38, %v5455_v9  ;;  %v5518_v58 = vmul.f32 %v6442_v38, %v6442_v38 }
 0x356   : > { %v5553_v33 = vadd.f32 %v5552_v45, %v5517_v34 }
 0x357   : > { %5394 = vst [vmem:[%s9754_s11 + $0xd8] sm:$0xff] %v6350_v55  ;;  %v5584_v11 = vadd.f32 %v5583_v12, %v5518_v58  ;;  %v3646_v37 = vpop.f32.mrb[56].mxu1  ;;  %v5092_v15 = vpop.f32.mrb[56].mxu0 }
 0x358   : > { %v6443_v24 = vadd.f32 %v5092_v15, %v3646_v37  ;;  %v3648_v2 = vpop.f32.mrb[57].mxu1  ;;  %v5094_v36 = vpop.f32.mrb[57].mxu0 }
 0x359   : > { %v6444_v35 = vadd.f32 %v5094_v36, %v3648_v2  ;;  %v3650_v23 = vpop.f32.mrb[58].mxu1  ;;  %v5096_v6 = vpop.f32.mrb[58].mxu0 }
 0x35a   : > { %v5426_v27 = vadd.f32 %v6443_v24, %v5425_v16  ;;  %v5519_v18 = vmul.f32 %v6443_v24, %v6443_v24  ;;  %v6445_v51 = vadd.f32 %v5096_v6, %v3650_v23  ;;  %v3652_v21 = vpop.f32.mrb[59].mxu1  ;;  %v5098_v13 = vpop.f32.mrb[59].mxu0 }
 0x35b   : > { %v6351_v50 = vpack.c.bf16 %v6444_v35, %v6443_v24  ;;  %v5457_v49 = vadd.f32 %v6444_v35, %v5456_v39  ;;  %v5520_v20 = vmul.f32 %v6444_v35, %v6444_v35  ;;  %v6446_v52 = vadd.f32 %v5098_v13, %v3652_v21 }
 0x35c   : > { %v5554_v25 = vadd.f32 %v5553_v33, %v5519_v18  ;;  %v5427_v56 = vadd.f32 %v6445_v51, %v5426_v27  ;;  %v5521_v44 = vmul.f32 %v6445_v51, %v6445_v51 }
 0x35d   : > { %5395 = vst [vmem:[%s9754_s11 + $0xe0] sm:$0xff] %v6351_v50  ;;  %v5585_v59 = vadd.f32 %v5584_v11, %v5520_v20  ;;  %v6352_v3 = vpack.c.bf16 %v6446_v52, %v6445_v51  ;;  %v5458_v41 = vadd.f32 %v6446_v52, %v5457_v49  ;;  %v5522_v57 = vmul.f32 %v6446_v52, %v6446_v52 }
 0x35e   : > { %v5555_v32 = vadd.f32 %v5554_v25, %v5521_v44 }
 0x35f   : > { %5396 = vst [vmem:[%s9754_s11 + $0xe8] sm:$0xff] %v6352_v3  ;;  %v5586_v26 = vadd.f32 %v5585_v59, %v5522_v57  ;;  %v3656_v10 = vpop.f32.mrb[60].mxu1  ;;  %v5102_v48 = vpop.f32.mrb[60].mxu0 }
 0x360   : > { %v6447_v62 = vadd.f32 %v5102_v48, %v3656_v10  ;;  %v3658_v8 = vpop.f32.mrb[61].mxu1  ;;  %v5104_v17 = vpop.f32.mrb[61].mxu0 }
 0x361   : > { %v6448_v40 = vadd.f32 %v5104_v17, %v3658_v8  ;;  %v3660_v0 = vpop.f32.mrb[62].mxu1  ;;  %v5106_v63 = vpop.f32.mrb[62].mxu0 }
 0x362   : > { %v5428_v60 = vadd.f32 %v6447_v62, %v5427_v56  ;;  %v5523_v28 = vmul.f32 %v6447_v62, %v6447_v62  ;;  %v6449_v53 = vadd.f32 %v5106_v63, %v3660_v0  ;;  %v3662_v29 = vpop.f32.mrb[63].mxu1  ;;  %v5108_v31 = vpop.f32.mrb[63].mxu0 }
 0x363   : > { %v6353_v7 = vpack.c.bf16 %v6448_v40, %v6447_v62  ;;  %v5459_v19 = vadd.f32 %v6448_v40, %v5458_v41  ;;  %v5524_v5 = vmul.f32 %v6448_v40, %v6448_v40  ;;  %v6450_v4 = vadd.f32 %v5108_v31, %v3662_v29 }
 0x364   : > { %v5556_v22 = vadd.f32 %v5555_v32, %v5523_v28  ;;  %v5429_v30 = vadd.f32 %v6449_v53, %v5428_v60  ;;  %v5525_v47 = vmul.f32 %v6449_v53, %v6449_v53 }
 0x365   : > { %5397 = vst [vmem:[%s9754_s11 + $0xf0] sm:$0xff] %v6353_v7  ;;  %v5587_v61 = vadd.f32 %v5586_v26, %v5524_v5  ;;  %v6354_v43 = vpack.c.bf16 %v6450_v4, %v6449_v53  ;;  %v5460_v14 = vadd.f32 %v6450_v4, %v5459_v19  ;;  %v5526_v42 = vmul.f32 %v6450_v4, %v6450_v4 }
 0x366   : > { %5461 = vst [vmem:[%s312_s15] sm:$0xff] %v5429_v30  ;;  %v5557_v1 = vadd.f32 %v5556_v22, %v5525_v47 }
 0x367   : > { %5398 = vst [vmem:[%s9754_s11 + $0xf8] sm:$0xff] %v6354_v43  ;;  %5462 = vst [vmem:[%s312_s15 + $0x8] sm:$0xff] %v5460_v14  ;;  %v5588_v46 = vadd.f32 %v5587_v61, %v5526_v42 }
 0x368   : > { %5589 = vst [vmem:[%s321_s17] sm:$0xff] %v5557_v1 }
 0x369   : > { %5590 = vst [vmem:[%s321_s17 + $0x8] sm:$0xff] %v5588_v46 }
 0x36a PF: > { %s17_s23 = sadd.s32 1, %s7410_s23   ;;  %s10188_s21 = smov %s7406_s22 }
 0x36b   : > { %p14_p5 = scmp.ge.s32.totalorder %s17_s23, 4   ;;  %s10189_s22 = smov %s10191_s24 }
 0x36d   :  { %16 = sbr.rel (!%p14_p5) target bundleno = 2 (0x2), region = 98 }

// kernel: resnext_block.5
= control target key start
LH: loop header
LB: loop body
LE: loop exit
PB: predicated region body
PF: predicated region fallthrough
CT: control target
= control target key end

     0   :  { %s1212_s15 = smov 0   ;;  %s1571_s0 = inlined_call_operand.vmem [shape: bf16[2,256,256], index: 0, kind: input, shape index: {}]   ;;  %s1572_s1 = inlined_call_operand.vmem [shape: f32[1,256], index: 1, kind: input, shape index: {}]   ;;  %s1573_s2 = inlined_call_operand.vmem [shape: f32[1,256], index: 2, kind: input, shape index: {}]   ;;  %s1574_s3 = inlined_call_operand.vmem [shape: bf16[256,256], index: 3, kind: input, shape index: {}]   ;;  %s1575_s4 = inlined_call_operand.vmem [shape: f32[2,256,256], index: 4, kind: output, shape index: {}]  }
   0x1 LB: > { %s1046_s16 = sadd.s32 4294967295, %s1185_s15   ;;  %p1050_p0 = scmp.ge.s32.totalorder %s1185_s15, 1  ;;  %s1185_s15 = sphi %s1212_s15, %s14_s15  }
   0x2   : > { %p162_p1 = scmp.lt.s32.totalorder %s1185_s15, 3 }
   0x4   : > { %p163_p2 = pnand %p1050_p0, %p162_p1 }
   0x5   : > { %p188_p3 = scmp.lt.s32.totalorder (!%p163_p2), %s1046_s16, 1  ;;  %v296_v0 = vlaneseq (!%p163_p2)  ;;  %v294_v1 = vld [vmem:[%s1572_s1] sm:$0x3] (!%p163_p2)  ;;  %v1133_v59 = vld [vmem:[%s1574_s3 + $0x4] ss:$8 sps:$4 sm:$0xff] (!%p163_p2)  }
   0x6   : > { %166 = sbr.rel (%p163_p2) target bundleno = 427 (0x1ab), region = 36  ;;  %v370_v2 = vld [vmem:[%s1573_s2] sm:$0x3] (!%p163_p2)  ;;  %766 = vmatprep.mubr.bf16.mxu0 (!%p163_p2), %v1133_v59 }
   0x7   : > { %v297_v3 = vshrl.u32 (!%p163_p2), %v296_v0, 7  ;;  %v1136_v0 = vld [vmem:[%s1574_s3 + $0x84] ss:$8 sps:$4 sm:$0xff] (!%p163_p2)  }
   0x8   : > { %846 = vmatprep.mubr.bf16.mxu1 (!%p163_p2), %v1136_v0 }
   0x9   : > { %v302_v4 = vsub.s32 (!%p163_p2), 1, %v297_v3  ;;  %v298_v5 = vsub.s32 (!%p163_p2), 0, %v297_v3 }
   0xb   : > { %v1236_v8 = vrot.slane (!%p163_p2), %v294_v1, %v302_v4  ;;  %v1238_v9 = vrot.slane (!%p163_p2), %v370_v2, %v302_v4  ;;  %v1240_v10 = vrot.slane (!%p163_p2), %v294_v1, %v298_v5  ;;  %v1242_v11 = vrot.slane (!%p163_p2), %v370_v2, %v298_v5 }
   0xd   : > { %s1577_s16 = smov (!%p188_p3, %s1046_s16), 1 }
   0xe   : > { %s1089_s21 = sshll.u32 %s1577_s16, 8  ;;  %s1090_s17 = sshll.u32 %s1577_s16, 9 }
   0xf   : > { %s1232_s24 = scalar_lea.vmem %s1571_s0, %s1089_s21  ;;  %s1502_s20 = scalar_lea.vmem %s1575_s4, %s1090_s17 }
  0x10   : > { %v198_v6 = vld [vmem:[%s1232_s24] sm:$0xff]  ;;  %v199_v7 = vld [vmem:[%s1232_s24 + $0x8] sm:$0xff]  ;;  %v200_v12 = vld [vmem:[%s1232_s24 + $0x10] sm:$0xff] }
  0x11   : > { %v231_v13 = vunpack.c.h.bf16 %v198_v6  ;;  %v233_v14 = vunpack.c.h.bf16 %v199_v7  ;;  %v230_v15 = vunpack.c.l.bf16 %v198_v6  ;;  %v232_v16 = vunpack.c.l.bf16 %v199_v7  ;;  %v201_v17 = vld [vmem:[%s1232_s24 + $0x18] sm:$0xff]  ;;  %v202_v36 = vld [vmem:[%s1232_s24 + $0x20] sm:$0xff]  ;;  %v203_v37 = vld [vmem:[%s1232_s24 + $0x28] sm:$0xff] }
  0x12   : > { %v235_v18 = vunpack.c.h.bf16 %v200_v12  ;;  %v237_v19 = vunpack.c.h.bf16 %v201_v17  ;;  %v234_v20 = vunpack.c.l.bf16 %v200_v12  ;;  %v236_v21 = vunpack.c.l.bf16 %v201_v17  ;;  %v204_v46 = vld [vmem:[%s1232_s24 + $0x30] sm:$0xff]  ;;  %v205_v47 = vld [vmem:[%s1232_s24 + $0x38] sm:$0xff]  ;;  %v206_v4 = vld [vmem:[%s1232_s24 + $0x40] sm:$0xff] }
  0x13   : > { %v307_v22 = vmul.f32 %v1236_v8, %v231_v13  ;;  %v309_v23 = vmul.f32 %v1236_v8, %v233_v14  ;;  %v306_v24 = vmul.f32 %v1240_v10, %v230_v15  ;;  %v308_v25 = vmul.f32 %v1240_v10, %v232_v16  ;;  %v207_v5 = vld [vmem:[%s1232_s24 + $0x48] sm:$0xff] }
  0x14   : > { %v311_v26 = vmul.f32 %v1236_v8, %v235_v18  ;;  %v313_v27 = vmul.f32 %v1236_v8, %v237_v19  ;;  %v310_v28 = vmul.f32 %v1240_v10, %v234_v20  ;;  %v312_v29 = vmul.f32 %v1240_v10, %v236_v21 }
  0x15   : > { %v383_v30 = vadd.f32 %v1238_v9, %v307_v22  ;;  %v385_v31 = vadd.f32 %v1238_v9, %v309_v23  ;;  %v382_v32 = vadd.f32 %v1242_v11, %v306_v24  ;;  %v384_v33 = vadd.f32 %v1242_v11, %v308_v25 }
  0x16   : > { %v387_v34 = vadd.f32 %v1238_v9, %v311_v26  ;;  %v389_v35 = vadd.f32 %v1238_v9, %v313_v27  ;;  %v386_v44 = vadd.f32 %v1242_v11, %v310_v28  ;;  %v388_v45 = vadd.f32 %v1242_v11, %v312_v29 }
  0x17   : > { %v447_v38 = vmax.f32 %v383_v30, 0.0  ;;  %v449_v39 = vmax.f32 %v385_v31, 0.0  ;;  %v446_v40 = vmax.f32 %v382_v32, 0.0  ;;  %v448_v41 = vmax.f32 %v384_v33, 0.0  ;;  %v208_v31 = vld [vmem:[%s1232_s24 + $0x50] sm:$0xff]  ;;  %v209_v32 = vld [vmem:[%s1232_s24 + $0x58] sm:$0xff] }
  0x18   : > { %v451_v42 = vmax.f32 %v387_v34, 0.0  ;;  %v453_v43 = vmax.f32 %v389_v35, 0.0  ;;  %v239_v50 = vunpack.c.h.bf16 %v202_v36  ;;  %v241_v51 = vunpack.c.h.bf16 %v203_v37 }
  0x19   : > { %v543_v48 = vpack.c.bf16 %v449_v39, %v447_v38  ;;  %v542_v49 = vpack.c.bf16 %v448_v41, %v446_v40  ;;  %v238_v53 = vunpack.c.l.bf16 %v202_v36  ;;  %v240_v54 = vunpack.c.l.bf16 %v203_v37 }
  0x1a   : > { %v545_v52 = vpack.c.bf16 %v453_v43, %v451_v42  ;;  %v315_v55 = vmul.f32 %v1236_v8, %v239_v50  ;;  %v317_v56 = vmul.f32 %v1236_v8, %v241_v51  ;;  %v243_v57 = vunpack.c.h.bf16 %v204_v46  ;;  %v210_v51 = vld [vmem:[%s1232_s24 + $0x60] sm:$0xff] }
  0x1b   : > { %734 = vmatprep.subr.bf16.mxu0 %v543_v48  ;;  %1091 = vmatprep.subr.bf16.mxu1 %v543_v48  ;;  %v245_v58 = vunpack.c.h.bf16 %v205_v47  ;;  %v450_v60 = vmax.f32 %v386_v44, 0.0  ;;  %v452_v61 = vmax.f32 %v388_v45, 0.0  ;;  %v314_v62 = vmul.f32 %v1240_v10, %v238_v53 }
  0x1c   : > { %735 = vmatpush1.bf16.xpose.msra.mxu0 %v542_v49  ;;  %1107 = vmatpush1.bf16.xpose.msra.mxu1 %v542_v49  ;;  %v316_v63 = vmul.f32 %v1240_v10, %v240_v54  ;;  %v391_v1 = vadd.f32 %v1238_v9, %v315_v55  ;;  %v393_v2 = vadd.f32 %v1238_v9, %v317_v56  ;;  %v242_v13 = vunpack.c.l.bf16 %v204_v46 }
  0x1d   : > { %736 = vmatprep.subr.bf16.mxu0 %v545_v52  ;;  %1092 = vmatprep.subr.bf16.mxu1 %v545_v52  ;;  %v319_v3 = vmul.f32 %v1236_v8, %v243_v57  ;;  %v321_v6 = vmul.f32 %v1236_v8, %v245_v58  ;;  %v244_v14 = vunpack.c.l.bf16 %v205_v47  ;;  %v544_v15 = vpack.c.bf16 %v452_v61, %v450_v60  ;;  %v211_v52 = vld [vmem:[%s1232_s24 + $0x68] sm:$0xff] }
  0x1e   : > { %v455_v7 = vmax.f32 %v391_v1, 0.0  ;;  %v457_v12 = vmax.f32 %v393_v2, 0.0  ;;  %v390_v16 = vadd.f32 %v1242_v11, %v314_v62  ;;  %v392_v17 = vadd.f32 %v1242_v11, %v316_v63 }
  0x1f   : > { %v247_v18 = vunpack.c.h.bf16 %v206_v4  ;;  %v395_v20 = vadd.f32 %v1238_v9, %v319_v3  ;;  %v397_v21 = vadd.f32 %v1238_v9, %v321_v6  ;;  %v249_v22 = vunpack.c.h.bf16 %v207_v5 }
  0x20   : > { %v547_v19 = vpack.c.bf16 %v457_v12, %v455_v7  ;;  %v318_v23 = vmul.f32 %v1240_v10, %v242_v13  ;;  %v320_v24 = vmul.f32 %v1240_v10, %v244_v14  ;;  %v454_v25 = vmax.f32 %v390_v16, 0.0  ;;  %v212_v7 = vld [vmem:[%s1232_s24 + $0x70] sm:$0xff]  ;;  %v213_v12 = vld [vmem:[%s1232_s24 + $0x78] sm:$0xff] }
  0x21   : > { %v456_v26 = vmax.f32 %v392_v17, 0.0  ;;  %v459_v27 = vmax.f32 %v395_v20, 0.0  ;;  %v461_v28 = vmax.f32 %v397_v21, 0.0  ;;  %v323_v29 = vmul.f32 %v1236_v8, %v247_v18 }
  0x22   : > { %v325_v30 = vmul.f32 %v1236_v8, %v249_v22  ;;  %v394_v33 = vadd.f32 %v1242_v11, %v318_v23  ;;  %v396_v34 = vadd.f32 %v1242_v11, %v320_v24  ;;  %v246_v35 = vunpack.c.l.bf16 %v206_v4 }
  0x23   : > { %v546_v36 = vpack.c.bf16 %v456_v26, %v454_v25  ;;  %v248_v37 = vunpack.c.l.bf16 %v207_v5  ;;  %v251_v38 = vunpack.c.h.bf16 %v208_v31  ;;  %v253_v39 = vunpack.c.h.bf16 %v209_v32 }
  0x24   : > { %737 = vmatpush1.bf16.xpose.msra.mxu0 %v544_v15  ;;  %1108 = vmatpush1.bf16.xpose.msra.mxu1 %v544_v15  ;;  %v549_v40 = vpack.c.bf16 %v461_v28, %v459_v27  ;;  %v399_v41 = vadd.f32 %v1238_v9, %v323_v29  ;;  %v401_v42 = vadd.f32 %v1238_v9, %v325_v30  ;;  %v458_v43 = vmax.f32 %v394_v33, 0.0 }
  0x25   : > { %738 = vmatprep.subr.bf16.mxu0 %v547_v19  ;;  %1093 = vmatprep.subr.bf16.mxu1 %v547_v19  ;;  %v460_v44 = vmax.f32 %v396_v34, 0.0  ;;  %v322_v45 = vmul.f32 %v1240_v10, %v246_v35  ;;  %v324_v46 = vmul.f32 %v1240_v10, %v248_v37  ;;  %v327_v47 = vmul.f32 %v1236_v8, %v251_v38 }
  0x26   : > { %v329_v48 = vmul.f32 %v1236_v8, %v253_v39  ;;  %v463_v49 = vmax.f32 %v399_v41, 0.0  ;;  %v465_v50 = vmax.f32 %v401_v42, 0.0  ;;  %v250_v54 = vunpack.c.l.bf16 %v208_v31  ;;  %v214_v31 = vld [vmem:[%s1232_s24 + $0x80] sm:$0xff] }
  0x27   : > { %v548_v53 = vpack.c.bf16 %v460_v44, %v458_v43  ;;  %v252_v55 = vunpack.c.l.bf16 %v209_v32  ;;  %v398_v56 = vadd.f32 %v1242_v11, %v322_v45  ;;  %v400_v57 = vadd.f32 %v1242_v11, %v324_v46  ;;  %v215_v32 = vld [vmem:[%s1232_s24 + $0x88] sm:$0xff] }
  0x28   : > { %v403_v58 = vadd.f32 %v1238_v9, %v327_v47  ;;  %v405_v59 = vadd.f32 %v1238_v9, %v329_v48  ;;  %v551_v60 = vpack.c.bf16 %v465_v50, %v463_v49  ;;  %v255_v61 = vunpack.c.h.bf16 %v210_v51 }
  0x29   : > { %v257_v62 = vunpack.c.h.bf16 %v211_v52  ;;  %v326_v63 = vmul.f32 %v1240_v10, %v250_v54  ;;  %v328_v0 = vmul.f32 %v1240_v10, %v252_v55  ;;  %v462_v1 = vmax.f32 %v398_v56, 0.0 }
  0x2a   : > { %v464_v2 = vmax.f32 %v400_v57, 0.0  ;;  %v467_v3 = vmax.f32 %v403_v58, 0.0  ;;  %v469_v4 = vmax.f32 %v405_v59, 0.0  ;;  %v331_v5 = vmul.f32 %v1236_v8, %v255_v61 }
  0x2b   : > { %v333_v6 = vmul.f32 %v1236_v8, %v257_v62  ;;  %v402_v13 = vadd.f32 %v1242_v11, %v326_v63  ;;  %v404_v14 = vadd.f32 %v1242_v11, %v328_v0  ;;  %v254_v17 = vunpack.c.l.bf16 %v210_v51  ;;  %v216_v51 = vld [vmem:[%s1232_s24 + $0x90] sm:$0xff] }
  0x2c   : > { %739 = vmatpush1.bf16.xpose.msra.mxu0 %v546_v36  ;;  %1109 = vmatpush1.bf16.xpose.msra.mxu1 %v546_v36  ;;  %v550_v15 = vpack.c.bf16 %v464_v2, %v462_v1  ;;  %v553_v16 = vpack.c.bf16 %v469_v4, %v467_v3  ;;  %v256_v18 = vunpack.c.l.bf16 %v211_v52  ;;  %v407_v19 = vadd.f32 %v1238_v9, %v331_v5  ;;  %v217_v52 = vld [vmem:[%s1232_s24 + $0x98] sm:$0xff] }
  0x2d   : > { %740 = vmatprep.subr.bf16.mxu0 %v549_v40  ;;  %1094 = vmatprep.subr.bf16.mxu1 %v549_v40  ;;  %v409_v20 = vadd.f32 %v1238_v9, %v333_v6  ;;  %v259_v21 = vunpack.c.h.bf16 %v212_v7  ;;  %v261_v22 = vunpack.c.h.bf16 %v213_v12  ;;  %v466_v23 = vmax.f32 %v402_v13, 0.0 }
  0x2e   : > { %v468_v24 = vmax.f32 %v404_v14, 0.0  ;;  %v330_v25 = vmul.f32 %v1240_v10, %v254_v17  ;;  %v332_v26 = vmul.f32 %v1240_v10, %v256_v18  ;;  %v471_v27 = vmax.f32 %v407_v19, 0.0 }
  0x2f   : > { %v473_v28 = vmax.f32 %v409_v20, 0.0  ;;  %v335_v29 = vmul.f32 %v1236_v8, %v259_v21  ;;  %v337_v30 = vmul.f32 %v1236_v8, %v261_v22  ;;  %v258_v33 = vunpack.c.l.bf16 %v212_v7  ;;  %v218_v7 = vld [vmem:[%s1232_s24 + $0xa0] sm:$0xff] }
  0x30   : > { %v260_v34 = vunpack.c.l.bf16 %v213_v12  ;;  %v552_v35 = vpack.c.bf16 %v468_v24, %v466_v23  ;;  %v406_v36 = vadd.f32 %v1242_v11, %v330_v25  ;;  %v408_v37 = vadd.f32 %v1242_v11, %v332_v26  ;;  %v219_v12 = vld [vmem:[%s1232_s24 + $0xa8] sm:$0xff] }
  0x31   : > { %v263_v38 = vunpack.c.h.bf16 %v214_v31  ;;  %v555_v39 = vpack.c.bf16 %v473_v28, %v471_v27  ;;  %v411_v40 = vadd.f32 %v1238_v9, %v335_v29  ;;  %v413_v41 = vadd.f32 %v1238_v9, %v337_v30 }
  0x32   : > { %v265_v42 = vunpack.c.h.bf16 %v215_v32  ;;  %v334_v43 = vmul.f32 %v1240_v10, %v258_v33  ;;  %v336_v44 = vmul.f32 %v1240_v10, %v260_v34  ;;  %v470_v45 = vmax.f32 %v406_v36, 0.0 }
  0x33   : > { %v472_v46 = vmax.f32 %v408_v37, 0.0  ;;  %v339_v47 = vmul.f32 %v1236_v8, %v263_v38  ;;  %v475_v48 = vmax.f32 %v411_v40, 0.0  ;;  %v477_v49 = vmax.f32 %v413_v41, 0.0 }
  0x34   : > { %741 = vmatpush1.bf16.xpose.msra.mxu0 %v548_v53  ;;  %1110 = vmatpush1.bf16.xpose.msra.mxu1 %v548_v53  ;;  %v341_v50 = vmul.f32 %v1236_v8, %v265_v42  ;;  %v410_v53 = vadd.f32 %v1242_v11, %v334_v43  ;;  %v412_v54 = vadd.f32 %v1242_v11, %v336_v44  ;;  %v262_v55 = vunpack.c.l.bf16 %v214_v31  ;;  %v220_v31 = vld [vmem:[%s1232_s24 + $0xb0] sm:$0xff] }
  0x35   : > { %742 = vmatprep.subr.bf16.mxu0 %v551_v60  ;;  %1095 = vmatprep.subr.bf16.mxu1 %v551_v60  ;;  %v554_v56 = vpack.c.bf16 %v472_v46, %v470_v45  ;;  %v415_v57 = vadd.f32 %v1238_v9, %v339_v47  ;;  %v264_v58 = vunpack.c.l.bf16 %v215_v32  ;;  %v557_v59 = vpack.c.bf16 %v477_v49, %v475_v48  ;;  %v221_v32 = vld [vmem:[%s1232_s24 + $0xb8] sm:$0xff] }
  0x36   : > { %v417_v60 = vadd.f32 %v1238_v9, %v341_v50  ;;  %v267_v61 = vunpack.c.h.bf16 %v216_v51  ;;  %v269_v62 = vunpack.c.h.bf16 %v217_v52  ;;  %v474_v63 = vmax.f32 %v410_v53, 0.0 }
  0x37   : > { %v476_v0 = vmax.f32 %v412_v54, 0.0  ;;  %v338_v1 = vmul.f32 %v1240_v10, %v262_v55  ;;  %v340_v2 = vmul.f32 %v1240_v10, %v264_v58  ;;  %v479_v3 = vmax.f32 %v415_v57, 0.0 }
  0x38   : > { %v481_v4 = vmax.f32 %v417_v60, 0.0  ;;  %v343_v5 = vmul.f32 %v1236_v8, %v267_v61  ;;  %v345_v6 = vmul.f32 %v1236_v8, %v269_v62  ;;  %v268_v17 = vunpack.c.l.bf16 %v217_v52  ;;  %v223_v52 = vld [vmem:[%s1232_s24 + $0xc8] sm:$0xff] }
  0x39   : > { %v556_v13 = vpack.c.bf16 %v476_v0, %v474_v63  ;;  %v414_v14 = vadd.f32 %v1242_v11, %v338_v1  ;;  %v271_v18 = vunpack.c.h.bf16 %v218_v7  ;;  %v273_v22 = vunpack.c.h.bf16 %v219_v12 }
  0x3a   : > { %v559_v19 = vpack.c.bf16 %v481_v4, %v479_v3  ;;  %v419_v20 = vadd.f32 %v1238_v9, %v343_v5  ;;  %v421_v21 = vadd.f32 %v1238_v9, %v345_v6  ;;  %v344_v26 = vmul.f32 %v1240_v10, %v268_v17 }
  0x3b   : > { %v478_v23 = vmax.f32 %v414_v14, 0.0  ;;  %v347_v27 = vmul.f32 %v1236_v8, %v271_v18  ;;  %v349_v30 = vmul.f32 %v1236_v8, %v273_v22  ;;  %v270_v33 = vunpack.c.l.bf16 %v218_v7  ;;  %v224_v7 = vld [vmem:[%s1232_s24 + $0xd0] sm:$0xff] }
  0x3c   : > { %743 = vmatpush1.bf16.xpose.msra.mxu0 %v550_v15  ;;  %1111 = vmatpush1.bf16.xpose.msra.mxu1 %v550_v15  ;;  %v416_v15 = vadd.f32 %v1242_v11, %v340_v2  ;;  %v483_v28 = vmax.f32 %v419_v20, 0.0  ;;  %v485_v29 = vmax.f32 %v421_v21, 0.0  ;;  %v272_v34 = vunpack.c.l.bf16 %v219_v12  ;;  %v225_v12 = vld [vmem:[%s1232_s24 + $0xd8] sm:$0xff] }
  0x3d   : > { %744 = vmatprep.subr.bf16.mxu0 %v553_v16  ;;  %1096 = vmatprep.subr.bf16.mxu1 %v553_v16  ;;  %v266_v16 = vunpack.c.l.bf16 %v216_v51  ;;  %v420_v37 = vadd.f32 %v1242_v11, %v344_v26  ;;  %v423_v38 = vadd.f32 %v1238_v9, %v347_v27  ;;  %v425_v40 = vadd.f32 %v1238_v9, %v349_v30  ;;  %v222_v51 = vld [vmem:[%s1232_s24 + $0xc0] sm:$0xff] }
  0x3e   : > { %v480_v24 = vmax.f32 %v416_v15, 0.0  ;;  %v275_v41 = vunpack.c.h.bf16 %v220_v31  ;;  %v277_v42 = vunpack.c.h.bf16 %v221_v32  ;;  %v346_v43 = vmul.f32 %v1240_v10, %v270_v33 }
  0x3f   : > { %v342_v25 = vmul.f32 %v1240_v10, %v266_v16  ;;  %v348_v44 = vmul.f32 %v1240_v10, %v272_v34  ;;  %v484_v46 = vmax.f32 %v420_v37, 0.0  ;;  %v487_v47 = vmax.f32 %v423_v38, 0.0 }
  0x40   : > { %v489_v48 = vmax.f32 %v425_v40, 0.0  ;;  %v351_v49 = vmul.f32 %v1236_v8, %v275_v41  ;;  %v353_v50 = vmul.f32 %v1236_v8, %v277_v42  ;;  %v422_v53 = vadd.f32 %v1242_v11, %v346_v43 }
  0x41   : > { %v418_v36 = vadd.f32 %v1242_v11, %v342_v25  ;;  %v424_v54 = vadd.f32 %v1242_v11, %v348_v44  ;;  %v274_v55 = vunpack.c.l.bf16 %v220_v31  ;;  %v276_v57 = vunpack.c.l.bf16 %v221_v32  ;;  %v226_v31 = vld [vmem:[%s1232_s24 + $0xe0] sm:$0xff]  ;;  %v227_v32 = vld [vmem:[%s1232_s24 + $0xe8] sm:$0xff] }
  0x42   : > { %v279_v58 = vunpack.c.h.bf16 %v222_v51  ;;  %v427_v60 = vadd.f32 %v1238_v9, %v351_v49  ;;  %v429_v61 = vadd.f32 %v1238_v9, %v353_v50  ;;  %v281_v62 = vunpack.c.h.bf16 %v223_v52 }
  0x43   : > { %v482_v45 = vmax.f32 %v418_v36, 0.0  ;;  %v486_v63 = vmax.f32 %v422_v53, 0.0  ;;  %v488_v0 = vmax.f32 %v424_v54, 0.0  ;;  %v350_v1 = vmul.f32 %v1240_v10, %v274_v55 }
  0x44   : > { %745 = vmatpush1.bf16.xpose.msra.mxu0 %v552_v35  ;;  %1112 = vmatpush1.bf16.xpose.msra.mxu1 %v552_v35  ;;  %v558_v35 = vpack.c.bf16 %v480_v24, %v478_v23  ;;  %v352_v2 = vmul.f32 %v1240_v10, %v276_v57  ;;  %v355_v3 = vmul.f32 %v1236_v8, %v279_v58  ;;  %v491_v4 = vmax.f32 %v427_v60, 0.0 }
  0x45   : > { %746 = vmatprep.subr.bf16.mxu0 %v555_v39  ;;  %1097 = vmatprep.subr.bf16.mxu1 %v555_v39  ;;  %v561_v39 = vpack.c.bf16 %v485_v29, %v483_v28  ;;  %v493_v5 = vmax.f32 %v429_v61, 0.0  ;;  %v357_v6 = vmul.f32 %v1236_v8, %v281_v62  ;;  %v426_v14 = vadd.f32 %v1242_v11, %v350_v1 }
  0x46   : > { %v428_v15 = vadd.f32 %v1242_v11, %v352_v2  ;;  %v431_v16 = vadd.f32 %v1238_v9, %v355_v3  ;;  %v278_v17 = vunpack.c.l.bf16 %v222_v51  ;;  %v280_v18 = vunpack.c.l.bf16 %v223_v52  ;;  %v228_v51 = vld [vmem:[%s1232_s24 + $0xf0] sm:$0xff]  ;;  %v229_v52 = vld [vmem:[%s1232_s24 + $0xf8] sm:$0xff] }
  0x47   : > { %v433_v20 = vadd.f32 %v1238_v9, %v357_v6  ;;  %v283_v21 = vunpack.c.h.bf16 %v224_v7  ;;  %v285_v22 = vunpack.c.h.bf16 %v225_v12  ;;  %v490_v23 = vmax.f32 %v426_v14, 0.0 }
  0x48   : > { %v492_v24 = vmax.f32 %v428_v15, 0.0  ;;  %v354_v25 = vmul.f32 %v1240_v10, %v278_v17  ;;  %v356_v26 = vmul.f32 %v1240_v10, %v280_v18  ;;  %v495_v27 = vmax.f32 %v431_v16, 0.0 }
  0x49   : > { %v497_v28 = vmax.f32 %v433_v20, 0.0  ;;  %v359_v29 = vmul.f32 %v1236_v8, %v283_v21  ;;  %v361_v30 = vmul.f32 %v1236_v8, %v285_v22  ;;  %v282_v33 = vunpack.c.l.bf16 %v224_v7 }
  0x4a   : > { %v284_v34 = vunpack.c.l.bf16 %v225_v12  ;;  %v430_v36 = vadd.f32 %v1242_v11, %v354_v25  ;;  %v432_v37 = vadd.f32 %v1242_v11, %v356_v26  ;;  %v287_v38 = vunpack.c.h.bf16 %v226_v31 }
  0x4b   : > { %v435_v40 = vadd.f32 %v1238_v9, %v359_v29  ;;  %v437_v41 = vadd.f32 %v1238_v9, %v361_v30  ;;  %v289_v42 = vunpack.c.h.bf16 %v227_v32  ;;  %v358_v43 = vmul.f32 %v1240_v10, %v282_v33  ;;  %v1134_v30 = vld [vmem:[%s1574_s3 + $0x80] ss:$8 sps:$4 sm:$0xff]   ;;  %v1142_v33 = vld [vmem:[%s1574_s3 + $0x90] ss:$8 sps:$4 sm:$0xff]  }
  0x4c   : > { %747 = vmatpush1.bf16.xpose.msra.mxu0 %v554_v56  ;;  %1113 = vmatpush1.bf16.xpose.msra.mxu1 %v554_v56  ;;  %v560_v56 = vpack.c.bf16 %v484_v46, %v482_v45  ;;  %v360_v44 = vmul.f32 %v1240_v10, %v284_v34  ;;  %v494_v45 = vmax.f32 %v430_v36, 0.0  ;;  %v496_v46 = vmax.f32 %v432_v37, 0.0  ;;  %v1143_v34 = vld [vmem:[%s1574_s3 + $0x24] ss:$8 sps:$4 sm:$0xff]   ;;  %v1147_v36 = vld [vmem:[%s1574_s3 + $0x20] ss:$8 sps:$4 sm:$0xff]  }
  0x4d   : > { %748 = vmatprep.subr.bf16.mxu0 %v557_v59  ;;  %1098 = vmatprep.subr.bf16.mxu1 %v557_v59  ;;  %v563_v59 = vpack.c.bf16 %v489_v48, %v487_v47  ;;  %v363_v47 = vmul.f32 %v1236_v8, %v287_v38  ;;  %v499_v48 = vmax.f32 %v435_v40, 0.0  ;;  %v501_v49 = vmax.f32 %v437_v41, 0.0  ;;  %v1148_v37 = vld [vmem:[%s1574_s3 + $0xa0] ss:$8 sps:$4 sm:$0xff]   ;;  %v1149_v38 = vld [vmem:[%s1574_s3 + $0x34] ss:$8 sps:$4 sm:$0xff]  }
  0x4e   : > { %v365_v50 = vmul.f32 %v1236_v8, %v289_v42  ;;  %v434_v53 = vadd.f32 %v1242_v11, %v358_v43  ;;  %v436_v54 = vadd.f32 %v1242_v11, %v360_v44  ;;  %v566_v55 = vpack.c.bf16 %v496_v46, %v494_v45  ;;  %v1153_v40 = vld [vmem:[%s1574_s3 + $0x30] ss:$8 sps:$4 sm:$0xff]   ;;  %v1155_v42 = vld [vmem:[%s1574_s3 + $0x44] ss:$8 sps:$4 sm:$0xff]   ;;  %v1159_v44 = vld [vmem:[%s1574_s3 + $0x40] ss:$8 sps:$4 sm:$0xff]  }
  0x4f   : > { %v286_v57 = vunpack.c.l.bf16 %v226_v31  ;;  %v288_v58 = vunpack.c.l.bf16 %v227_v32  ;;  %v291_v61 = vunpack.c.h.bf16 %v228_v51  ;;  %v293_v62 = vunpack.c.h.bf16 %v229_v52  ;;  %v1139_v31 = vld [vmem:[%s1574_s3 + $0x94] ss:$8 sps:$4 sm:$0xff]   ;;  %v1141_v32 = vld [vmem:[%s1574_s3 + $0x10] ss:$8 sps:$4 sm:$0xff]   ;;  %v1157_v43 = vld [vmem:[%s1574_s3 + $0xc4] ss:$8 sps:$4 sm:$0xff]  }
  0x50   : > { %v441_v60 = vadd.f32 %v1238_v9, %v365_v50  ;;  %v290_v14 = vunpack.c.l.bf16 %v228_v51  ;;  %v292_v15 = vunpack.c.l.bf16 %v229_v52  ;;  %v1154_v41 = vld [vmem:[%s1574_s3 + $0xb0] ss:$8 sps:$4 sm:$0xff]   ;;  %v1160_v45 = vld [vmem:[%s1574_s3 + $0xc0] ss:$8 sps:$4 sm:$0xff]   ;;  %v1161_v46 = vld [vmem:[%s1574_s3 + $0x54] ss:$8 sps:$4 sm:$0xff]  }
  0x51   : > { %v362_v1 = vmul.f32 %v1240_v10, %v286_v57  ;;  %v364_v2 = vmul.f32 %v1240_v10, %v288_v58  ;;  %v369_v6 = vmul.f32 %v1236_v8, %v293_v62  ;;  %v1167_v50 = vld [vmem:[%s1574_s3 + $0x64] ss:$8 sps:$4 sm:$0xff]   ;;  %v1171_v52 = vld [vmem:[%s1574_s3 + $0x60] ss:$8 sps:$4 sm:$0xff]   ;;  %v1178_v57 = vld [vmem:[%s1574_s3 + $0xf0] ss:$8 sps:$4 sm:$0xff]  }
  0x52   : > { %v366_v21 = vmul.f32 %v1240_v10, %v290_v14  ;;  %v1169_v51 = vld [vmem:[%s1574_s3 + $0xe4] ss:$8 sps:$4 sm:$0xff]  }
  0x53   : > { %v438_v12 = vadd.f32 %v1242_v11, %v362_v1  ;;  %v445_v18 = vadd.f32 %v1238_v9, %v369_v6 }
  0x54   : > { %749 = vmatpush1.bf16.xpose.msra.mxu0 %v556_v13  ;;  %1114 = vmatpush1.bf16.xpose.msra.mxu1 %v556_v13  ;;  %v562_v13 = vpack.c.bf16 %v488_v0, %v486_v63  ;;  %v498_v63 = vmax.f32 %v434_v53, 0.0  ;;  %v500_v0 = vmax.f32 %v436_v54, 0.0  ;;  %v442_v25 = vadd.f32 %v1242_v11, %v366_v21  ;;  %v1172_v53 = vld [vmem:[%s1574_s3 + $0xe0] ss:$8 sps:$4 sm:$0xff]   ;;  %v1173_v54 = vld [vmem:[%s1574_s3 + $0x74] ss:$8 sps:$4 sm:$0xff]  }
  0x55   : > { %750 = vmatprep.subr.bf16.mxu0 %v559_v19  ;;  %1099 = vmatprep.subr.bf16.mxu1 %v559_v19  ;;  %v565_v19 = vpack.c.bf16 %v493_v5, %v491_v4  ;;  %v505_v4 = vmax.f32 %v441_v60, 0.0  ;;  %v367_v5 = vmul.f32 %v1236_v8, %v291_v61  ;;  %v368_v8 = vmul.f32 %v1240_v10, %v292_v15  ;;  %v1131_v10 = vld [vmem:[%s1574_s3] ss:$8 sps:$4 sm:$0xff]  }
  0x56   : > { %v568_v7 = vpack.c.bf16 %v500_v0, %v498_v63 }
  0x57   : > { %v443_v17 = vadd.f32 %v1238_v9, %v367_v5  ;;  %v444_v26 = vadd.f32 %v1242_v11, %v368_v8 }
  0x59   : > { %v507_v22 = vmax.f32 %v443_v17, 0.0 }
  0x5c   : > { %751 = vmatpush1.bf16.xpose.msra.mxu0 %v558_v35  ;;  %1115 = vmatpush1.bf16.xpose.msra.mxu1 %v558_v35  ;;  %v564_v35 = vpack.c.bf16 %v492_v24, %v490_v23  ;;  %v509_v23 = vmax.f32 %v445_v18, 0.0 }
  0x5d   : > { %752 = vmatprep.subr.bf16.mxu0 %v561_v39  ;;  %1100 = vmatprep.subr.bf16.mxu1 %v561_v39  ;;  %v567_v39 = vpack.c.bf16 %v497_v28, %v495_v27  ;;  %v508_v28 = vmax.f32 %v444_v26, 0.0 }
  0x5e   : > { %v573_v27 = vpack.c.bf16 %v509_v23, %v507_v22 }
  0x64   : > { %753 = vmatpush1.bf16.xpose.msra.mxu0 %v560_v56  ;;  %1116 = vmatpush1.bf16.xpose.msra.mxu1 %v560_v56  ;;  %v439_v56 = vadd.f32 %v1238_v9, %v363_v47  ;;  %v506_v9 = vmax.f32 %v442_v25, 0.0  ;;  %v1163_v47 = vld [vmem:[%s1574_s3 + $0xd4] ss:$8 sps:$4 sm:$0xff]  }
  0x65   : > { %754 = vmatprep.subr.bf16.mxu0 %v563_v59  ;;  %1101 = vmatprep.subr.bf16.mxu1 %v563_v59  ;;  %v569_v59 = vpack.c.bf16 %v501_v49, %v499_v48  ;;  %v1165_v48 = vld [vmem:[%s1574_s3 + $0x50] ss:$8 sps:$4 sm:$0xff]  }
  0x66   : > { %v503_v3 = vmax.f32 %v439_v56, 0.0  ;;  %v572_v29 = vpack.c.bf16 %v508_v28, %v506_v9  ;;  %v1166_v49 = vld [vmem:[%s1574_s3 + $0xd0] ss:$8 sps:$4 sm:$0xff]  }
  0x67   : > { %v1177_v56 = vld [vmem:[%s1574_s3 + $0x70] ss:$8 sps:$4 sm:$0xff]  }
  0x68   : > { %v571_v16 = vpack.c.bf16 %v505_v4, %v503_v3 }
  0x6c   : > { %755 = vmatpush1.bf16.xpose.msra.mxu0 %v562_v13  ;;  %1117 = vmatpush1.bf16.xpose.msra.mxu1 %v562_v13  ;;  %v440_v13 = vadd.f32 %v1242_v11, %v364_v2  ;;  %v1137_v11 = vld [vmem:[%s1574_s3 + $0x14] ss:$8 sps:$4 sm:$0xff]  }
  0x6d   : > { %756 = vmatprep.subr.bf16.mxu0 %v565_v19  ;;  %1102 = vmatprep.subr.bf16.mxu1 %v565_v19  ;;  %v502_v19 = vmax.f32 %v438_v12, 0.0 }
  0x6e   : > { %v504_v20 = vmax.f32 %v440_v13, 0.0 }
  0x70   : > { %v570_v24 = vpack.c.bf16 %v504_v20, %v502_v19 }
  0x74   : > { %757 = vmatpush1.bf16.xpose.msra.mxu0 %v564_v35  ;;  %1118 = vmatpush1.bf16.xpose.msra.mxu1 %v564_v35  ;;  %v1145_v35 = vld [vmem:[%s1574_s3 + $0xa4] ss:$8 sps:$4 sm:$0xff]  }
  0x75   : > { %758 = vmatprep.subr.bf16.mxu0 %v567_v39  ;;  %1103 = vmatprep.subr.bf16.mxu1 %v567_v39  ;;  %v1151_v39 = vld [vmem:[%s1574_s3 + $0xb4] ss:$8 sps:$4 sm:$0xff]  }
  0x7c   : > { %759 = vmatpush1.bf16.xpose.msra.mxu0 %v566_v55  ;;  %1119 = vmatpush1.bf16.xpose.msra.mxu1 %v566_v55  ;;  %v1175_v55 = vld [vmem:[%s1574_s3 + $0xf4] ss:$8 sps:$4 sm:$0xff]  }
  0x7d   : > { %760 = vmatprep.subr.bf16.mxu0 %v569_v59  ;;  %1104 = vmatprep.subr.bf16.mxu1 %v569_v59 }
  0x84   : > { %761 = vmatpush1.bf16.xpose.msra.mxu0 %v568_v7  ;;  %1120 = vmatpush1.bf16.xpose.msra.mxu1 %v568_v7 }
  0x85   : > { %762 = vmatprep.subr.bf16.mxu0 %v571_v16  ;;  %1105 = vmatprep.subr.bf16.mxu1 %v571_v16 }
  0x8c   : > { %763 = vmatpush1.bf16.xpose.msra.mxu0 %v570_v24  ;;  %1121 = vmatpush1.bf16.xpose.msra.mxu1 %v570_v24 }
  0x8d   : > { %764 = vmatprep.subr.bf16.mxu0 %v573_v27  ;;  %1106 = vmatprep.subr.bf16.mxu1 %v573_v27 }
  0x94   : > { %765 = vmatpush1.bf16.xpose.msra.mxu0 %v572_v29  ;;  %1122 = vmatpush1.bf16.xpose.msra.mxu1 %v572_v29 }
  0x9b   : > { %767 = vmatmul.mubr.bf16.vlgmr.msra.gmra.mrb[0].mxu0 %v1131_v10  ;;  %847 = vmatmul.mubr.bf16.vlgmr.msra.gmra.mrb[0].mxu1 %v1134_v30 }
  0x9c   : > { %776 = vmatprep.mubr.bf16.mxu0 %v1137_v11  ;;  %856 = vmatprep.mubr.bf16.mxu1 %v1139_v31 }
  0xa3   : > { %777 = vmatmul.mubr.bf16.gmra.mrb[4].mxu0 %v1141_v32  ;;  %857 = vmatmul.mubr.bf16.gmra.mrb[4].mxu1 %v1142_v33 }
  0xa4   : > { %786 = vmatprep.mubr.bf16.mxu0 %v1143_v34  ;;  %866 = vmatprep.mubr.bf16.mxu1 %v1145_v35 }
  0xab   : > { %787 = vmatmul.mubr.bf16.gmra.mrb[8].mxu0 %v1147_v36  ;;  %867 = vmatmul.mubr.bf16.gmra.mrb[8].mxu1 %v1148_v37 }
  0xac   : > { %796 = vmatprep.mubr.bf16.mxu0 %v1149_v38  ;;  %876 = vmatprep.mubr.bf16.mxu1 %v1151_v39 }
  0xb3   : > { %797 = vmatmul.mubr.bf16.gmra.mrb[12].mxu0 %v1153_v40  ;;  %877 = vmatmul.mubr.bf16.gmra.mrb[12].mxu1 %v1154_v41 }
  0xb4   : > { %806 = vmatprep.mubr.bf16.mxu0 %v1155_v42  ;;  %886 = vmatprep.mubr.bf16.mxu1 %v1157_v43 }
  0xbb   : > { %807 = vmatmul.mubr.bf16.gmra.mrb[16].mxu0 %v1159_v44  ;;  %887 = vmatmul.mubr.bf16.gmra.mrb[16].mxu1 %v1160_v45 }
  0xbc   : > { %816 = vmatprep.mubr.bf16.mxu0 %v1161_v46  ;;  %896 = vmatprep.mubr.bf16.mxu1 %v1163_v47 }
  0xc3   : > { %817 = vmatmul.mubr.bf16.gmra.mrb[20].mxu0 %v1165_v48  ;;  %897 = vmatmul.mubr.bf16.gmra.mrb[20].mxu1 %v1166_v49 }
  0xc4   : > { %826 = vmatprep.mubr.bf16.mxu0 %v1167_v50  ;;  %906 = vmatprep.mubr.bf16.mxu1 %v1169_v51 }
  0xcb   : > { %827 = vmatmul.mubr.bf16.gmra.mrb[24].mxu0 %v1171_v52  ;;  %907 = vmatmul.mubr.bf16.gmra.mrb[24].mxu1 %v1172_v53 }
  0xcc   : > { %836 = vmatprep.mubr.bf16.mxu0 %v1173_v54  ;;  %916 = vmatprep.mubr.bf16.mxu1 %v1175_v55 }
  0xd3   : > { %837 = vmatmul.mubr.bf16.gmra.mrb[28].mxu0 %v1177_v56  ;;  %917 = vmatmul.mubr.bf16.gmra.mrb[28].mxu1 %v1178_v57 }
 0x16e   : > { %v768_v58 = vpop.f32.mrb[0].mxu0  ;;  %v848_v59 = vpop.f32.mrb[0].mxu1 }
 0x16f   : > { %927 = vst [vmem:[%s1502_s20] sm:$0xff] %v768_v58  ;;  %959 = vst [vmem:[%s1502_s20 + $0x100] sm:$0xff] %v848_v59  ;;  %v770_v60 = vpop.f32.mrb[1].mxu0  ;;  %v850_v61 = vpop.f32.mrb[1].mxu1 }
 0x170   : > { %928 = vst [vmem:[%s1502_s20 + $0x8] sm:$0xff] %v770_v60  ;;  %960 = vst [vmem:[%s1502_s20 + $0x108] sm:$0xff] %v850_v61  ;;  %v772_v62 = vpop.f32.mrb[2].mxu0  ;;  %v852_v63 = vpop.f32.mrb[2].mxu1 }
 0x171   : > { %929 = vst [vmem:[%s1502_s20 + $0x10] sm:$0xff] %v772_v62  ;;  %961 = vst [vmem:[%s1502_s20 + $0x110] sm:$0xff] %v852_v63  ;;  %v774_v0 = vpop.f32.mrb[3].mxu0  ;;  %v854_v1 = vpop.f32.mrb[3].mxu1 }
 0x172   : > { %930 = vst [vmem:[%s1502_s20 + $0x18] sm:$0xff] %v774_v0  ;;  %962 = vst [vmem:[%s1502_s20 + $0x118] sm:$0xff] %v854_v1 }
 0x176   : > { %v778_v2 = vpop.f32.mrb[4].mxu0  ;;  %v858_v3 = vpop.f32.mrb[4].mxu1 }
 0x177   : > { %931 = vst [vmem:[%s1502_s20 + $0x20] sm:$0xff] %v778_v2  ;;  %963 = vst [vmem:[%s1502_s20 + $0x120] sm:$0xff] %v858_v3  ;;  %v780_v4 = vpop.f32.mrb[5].mxu0  ;;  %v860_v5 = vpop.f32.mrb[5].mxu1 }
 0x178   : > { %932 = vst [vmem:[%s1502_s20 + $0x28] sm:$0xff] %v780_v4  ;;  %964 = vst [vmem:[%s1502_s20 + $0x128] sm:$0xff] %v860_v5  ;;  %v782_v6 = vpop.f32.mrb[6].mxu0  ;;  %v862_v7 = vpop.f32.mrb[6].mxu1 }
 0x179   : > { %933 = vst [vmem:[%s1502_s20 + $0x30] sm:$0xff] %v782_v6  ;;  %965 = vst [vmem:[%s1502_s20 + $0x130] sm:$0xff] %v862_v7  ;;  %v784_v12 = vpop.f32.mrb[7].mxu0  ;;  %v864_v13 = vpop.f32.mrb[7].mxu1 }
 0x17a   : > { %934 = vst [vmem:[%s1502_s20 + $0x38] sm:$0xff] %v784_v12  ;;  %966 = vst [vmem:[%s1502_s20 + $0x138] sm:$0xff] %v864_v13 }
 0x17e   : > { %v788_v14 = vpop.f32.mrb[8].mxu0  ;;  %v868_v15 = vpop.f32.mrb[8].mxu1 }
 0x17f   : > { %935 = vst [vmem:[%s1502_s20 + $0x40] sm:$0xff] %v788_v14  ;;  %967 = vst [vmem:[%s1502_s20 + $0x140] sm:$0xff] %v868_v15  ;;  %v790_v16 = vpop.f32.mrb[9].mxu0  ;;  %v870_v17 = vpop.f32.mrb[9].mxu1 }
 0x180   : > { %936 = vst [vmem:[%s1502_s20 + $0x48] sm:$0xff] %v790_v16  ;;  %968 = vst [vmem:[%s1502_s20 + $0x148] sm:$0xff] %v870_v17  ;;  %v792_v18 = vpop.f32.mrb[10].mxu0  ;;  %v872_v19 = vpop.f32.mrb[10].mxu1 }
 0x181   : > { %937 = vst [vmem:[%s1502_s20 + $0x50] sm:$0xff] %v792_v18  ;;  %969 = vst [vmem:[%s1502_s20 + $0x150] sm:$0xff] %v872_v19  ;;  %v794_v20 = vpop.f32.mrb[11].mxu0  ;;  %v874_v21 = vpop.f32.mrb[11].mxu1 }
 0x182   : > { %938 = vst [vmem:[%s1502_s20 + $0x58] sm:$0xff] %v794_v20  ;;  %970 = vst [vmem:[%s1502_s20 + $0x158] sm:$0xff] %v874_v21 }
 0x186   : > { %v798_v8 = vpop.f32.mrb[12].mxu0  ;;  %v878_v22 = vpop.f32.mrb[12].mxu1 }
 0x187   : > { %939 = vst [vmem:[%s1502_s20 + $0x60] sm:$0xff] %v798_v8  ;;  %971 = vst [vmem:[%s1502_s20 + $0x160] sm:$0xff] %v878_v22  ;;  %v800_v23 = vpop.f32.mrb[13].mxu0  ;;  %v880_v24 = vpop.f32.mrb[13].mxu1 }
 0x188   : > { %940 = vst [vmem:[%s1502_s20 + $0x68] sm:$0xff] %v800_v23  ;;  %972 = vst [vmem:[%s1502_s20 + $0x168] sm:$0xff] %v880_v24  ;;  %v802_v25 = vpop.f32.mrb[14].mxu0  ;;  %v882_v26 = vpop.f32.mrb[14].mxu1 }
 0x189   : > { %941 = vst [vmem:[%s1502_s20 + $0x70] sm:$0xff] %v802_v25  ;;  %973 = vst [vmem:[%s1502_s20 + $0x170] sm:$0xff] %v882_v26  ;;  %v804_v27 = vpop.f32.mrb[15].mxu0  ;;  %v884_v9 = vpop.f32.mrb[15].mxu1 }
 0x18a   : > { %942 = vst [vmem:[%s1502_s20 + $0x78] sm:$0xff] %v804_v27  ;;  %974 = vst [vmem:[%s1502_s20 + $0x178] sm:$0xff] %v884_v9 }
 0x18e   : > { %v808_v28 = vpop.f32.mrb[16].mxu0  ;;  %v888_v29 = vpop.f32.mrb[16].mxu1 }
 0x18f   : > { %943 = vst [vmem:[%s1502_s20 + $0x80] sm:$0xff] %v808_v28  ;;  %975 = vst [vmem:[%s1502_s20 + $0x180] sm:$0xff] %v888_v29  ;;  %v810_v10 = vpop.f32.mrb[17].mxu0  ;;  %v890_v30 = vpop.f32.mrb[17].mxu1 }
 0x190   : > { %944 = vst [vmem:[%s1502_s20 + $0x88] sm:$0xff] %v810_v10  ;;  %976 = vst [vmem:[%s1502_s20 + $0x188] sm:$0xff] %v890_v30  ;;  %v812_v11 = vpop.f32.mrb[18].mxu0  ;;  %v892_v31 = vpop.f32.mrb[18].mxu1 }
 0x191   : > { %945 = vst [vmem:[%s1502_s20 + $0x90] sm:$0xff] %v812_v11  ;;  %977 = vst [vmem:[%s1502_s20 + $0x190] sm:$0xff] %v892_v31  ;;  %v814_v32 = vpop.f32.mrb[19].mxu0  ;;  %v894_v33 = vpop.f32.mrb[19].mxu1 }
 0x192   : > { %946 = vst [vmem:[%s1502_s20 + $0x98] sm:$0xff] %v814_v32  ;;  %978 = vst [vmem:[%s1502_s20 + $0x198] sm:$0xff] %v894_v33 }
 0x196   : > { %v818_v34 = vpop.f32.mrb[20].mxu0  ;;  %v898_v35 = vpop.f32.mrb[20].mxu1 }
 0x197   : > { %947 = vst [vmem:[%s1502_s20 + $0xa0] sm:$0xff] %v818_v34  ;;  %979 = vst [vmem:[%s1502_s20 + $0x1a0] sm:$0xff] %v898_v35  ;;  %v820_v36 = vpop.f32.mrb[21].mxu0  ;;  %v900_v37 = vpop.f32.mrb[21].mxu1 }
 0x198   : > { %948 = vst [vmem:[%s1502_s20 + $0xa8] sm:$0xff] %v820_v36  ;;  %980 = vst [vmem:[%s1502_s20 + $0x1a8] sm:$0xff] %v900_v37  ;;  %v822_v38 = vpop.f32.mrb[22].mxu0  ;;  %v902_v39 = vpop.f32.mrb[22].mxu1 }
 0x199   : > { %949 = vst [vmem:[%s1502_s20 + $0xb0] sm:$0xff] %v822_v38  ;;  %981 = vst [vmem:[%s1502_s20 + $0x1b0] sm:$0xff] %v902_v39  ;;  %v824_v40 = vpop.f32.mrb[23].mxu0  ;;  %v904_v41 = vpop.f32.mrb[23].mxu1 }
 0x19a   : > { %950 = vst [vmem:[%s1502_s20 + $0xb8] sm:$0xff] %v824_v40  ;;  %982 = vst [vmem:[%s1502_s20 + $0x1b8] sm:$0xff] %v904_v41 }
 0x19e   : > { %v828_v42 = vpop.f32.mrb[24].mxu0  ;;  %v908_v43 = vpop.f32.mrb[24].mxu1 }
 0x19f   : > { %951 = vst [vmem:[%s1502_s20 + $0xc0] sm:$0xff] %v828_v42  ;;  %983 = vst [vmem:[%s1502_s20 + $0x1c0] sm:$0xff] %v908_v43  ;;  %v830_v44 = vpop.f32.mrb[25].mxu0  ;;  %v910_v45 = vpop.f32.mrb[25].mxu1 }
 0x1a0   : > { %952 = vst [vmem:[%s1502_s20 + $0xc8] sm:$0xff] %v830_v44  ;;  %984 = vst [vmem:[%s1502_s20 + $0x1c8] sm:$0xff] %v910_v45  ;;  %v832_v46 = vpop.f32.mrb[26].mxu0  ;;  %v912_v47 = vpop.f32.mrb[26].mxu1 }
 0x1a1   : > { %953 = vst [vmem:[%s1502_s20 + $0xd0] sm:$0xff] %v832_v46  ;;  %985 = vst [vmem:[%s1502_s20 + $0x1d0] sm:$0xff] %v912_v47  ;;  %v834_v48 = vpop.f32.mrb[27].mxu0  ;;  %v914_v49 = vpop.f32.mrb[27].mxu1 }
 0x1a2   : > { %954 = vst [vmem:[%s1502_s20 + $0xd8] sm:$0xff] %v834_v48  ;;  %986 = vst [vmem:[%s1502_s20 + $0x1d8] sm:$0xff] %v914_v49 }
 0x1a6   : > { %v838_v50 = vpop.f32.mrb[28].mxu0  ;;  %v918_v51 = vpop.f32.mrb[28].mxu1 }
 0x1a7   : > { %955 = vst [vmem:[%s1502_s20 + $0xe0] sm:$0xff] %v838_v50  ;;  %987 = vst [vmem:[%s1502_s20 + $0x1e0] sm:$0xff] %v918_v51  ;;  %v840_v52 = vpop.f32.mrb[29].mxu0  ;;  %v920_v53 = vpop.f32.mrb[29].mxu1 }
 0x1a8   : > { %956 = vst [vmem:[%s1502_s20 + $0xe8] sm:$0xff] %v840_v52  ;;  %988 = vst [vmem:[%s1502_s20 + $0x1e8] sm:$0xff] %v920_v53  ;;  %v842_v54 = vpop.f32.mrb[30].mxu0  ;;  %v922_v55 = vpop.f32.mrb[30].mxu1 }
 0x1a9   : > { %957 = vst [vmem:[%s1502_s20 + $0xf0] sm:$0xff] %v842_v54  ;;  %989 = vst [vmem:[%s1502_s20 + $0x1f0] sm:$0xff] %v922_v55  ;;  %v844_v56 = vpop.f32.mrb[31].mxu0  ;;  %v924_v57 = vpop.f32.mrb[31].mxu1 }
 0x1aa   : > { %958 = vst [vmem:[%s1502_s20 + $0xf8] sm:$0xff] %v844_v56  ;;  %990 = vst [vmem:[%s1502_s20 + $0x1f8] sm:$0xff] %v924_v57 }
 0x1ab PF: > { %s14_s15 = sadd.s32 1, %s1185_s15  }
 0x1ac   : > { %p11_p4 = scmp.ge.s32.totalorder %s14_s15, 4  }
 0x1ae   :  { %13 = sbr.rel (!%p11_p4) target bundleno = 1 (0x1), region = 66 }

</bundles_post_ra>
